<compile_context>
chip_gen: v7x
topology: tpu7x:2x2x1
jax: 0.10.0
libtpu: 0.0.40
codegen_flags: <defaults>
</compile_context>

<pallas_src>
import functools

import jax
import jax.numpy as jnp
from jax import lax
from jax.experimental import pallas as pl
from jax.experimental.pallas import tpu as pltpu


# ------------------------------ Pallas kernel -------------------------------

def _conv3x3_bn_relu_kernel(xp_ref, w_ref, s_ref, b_ref, o_ref, *, th, width):
    """One (sample, row-tile) step of Conv3x3('same') + BN-affine + ReLU.

    xp_ref : (1, H+2, W+2, Cin)  zero-padded input, full sample (VMEM resident)
    w_ref  : (9, Cin, Cout)      tap-major conv weights (dy*3 + dx)
    s_ref  : (1, Cout)           fused BN scale
    b_ref  : (1, Cout)           fused BN shift (includes conv bias)
    o_ref  : (1, TH*W, Cout)     lane-dense output slab for this row tile
    """
    cin = xp_ref.shape[-1]
    cout = o_ref.shape[-1]

    m = pl.program_id(1)
    row0 = pl.multiple_of(m * th, th)

    acc = jnp.zeros((th * width, cout), jnp.float32)
    # 9 shifted-window taps, unrolled: one MXU matmul per (dy, dx).
    for t in range(9):
        dy, dx = t // 3, t % 3
        slab = xp_ref[0, pl.ds(row0 + dy, th), pl.ds(dx, width), :]
        slab = slab.reshape(th * width, cin)
        acc = acc + jnp.dot(slab, w_ref[t],
                            preferred_element_type=jnp.float32)

    y = acc * s_ref[...] + b_ref[...]          # fused BatchNorm (running stats)
    o_ref[0] = jnp.maximum(y, 0.0).astype(o_ref.dtype)


def _pick_tile_rows(h, w, target_rows=128):
    """Largest divisor `th` of H with th*W <= target_rows and th*W % 8 == 0."""
    cands = [th for th in range(1, h + 1)
             if h % th == 0 and (th * w) % 8 == 0 and th * w <= target_rows]
    if not cands:
        return h               # single full-height tile (block == full dims)
    return max(cands)


def conv3x3_bn_relu(x, w_taps, scale, shift, *, out_dtype):
    """x: (N,H,W,Cin) bf16 ; w_taps: (9,Cin,Cout) bf16 ; scale/shift: (1,Cout) f32."""
    n, h, w, cin = x.shape
    cout = w_taps.shape[-1]
    th = _pick_tile_rows(h, w)
    tm = th * w

    # 'same' zero padding (cheap XLA glue; the heavy lifting stays in-kernel).
    xp = jnp.pad(x, ((0, 0), (1, 1), (1, 1), (0, 0)))
    hp, wp = h + 2, w + 2

    kernel = functools.partial(_conv3x3_bn_relu_kernel, th=th, width=w)
    out = pl.pallas_call(
        kernel,
        out_shape=jax.ShapeDtypeStruct((n, h * w, cout), out_dtype),
        grid=(n, h // th),
        in_specs=[
            # Full padded sample; block index constant in m -> stays resident.
            pl.BlockSpec((1, hp, wp, cin), lambda ni, mi: (ni, 0, 0, 0)),
            pl.BlockSpec((9, cin, cout), lambda ni, mi: (0, 0, 0)),
            pl.BlockSpec((1, cout), lambda ni, mi: (0, 0)),
            pl.BlockSpec((1, cout), lambda ni, mi: (0, 0)),
        ],
        out_specs=pl.BlockSpec((1, tm, cout), lambda ni, mi: (ni, mi, 0)),
        compiler_params=pltpu.CompilerParams(
            dimension_semantics=("parallel", "parallel")),
    )(xp, w_taps, scale, shift)
    return out.reshape(n, h, w, cout)


# --------------------------- parameter utilities ----------------------------

def _init_conv(key, cin, cout, k=3):
    kw, kb = jax.random.split(key)
    fan_in = cin * k * k
    w = jax.random.normal(kw, (cout, cin, k, k), jnp.float32) / jnp.sqrt(fan_in)
    b = 0.01 * jax.random.normal(kb, (cout,), jnp.float32)
    return w, b


def _init_bn(key, c):
    k1, k2, k3, k4 = jax.random.split(key, 4)
    gamma = 1.0 + 0.1 * jax.random.normal(k1, (c,), jnp.float32)
    beta = 0.1 * jax.random.normal(k2, (c,), jnp.float32)
    mean = 0.1 * jax.random.normal(k3, (c,), jnp.float32)
    var = 1.0 + 0.1 * jnp.abs(jax.random.normal(k4, (c,), jnp.float32))
    return gamma, beta, mean, var


def _fuse_bn(conv_bias, gamma, beta, mean, var, eps=1e-5):
    inv = gamma / jnp.sqrt(var + eps)
    scale = inv
    shift = beta + (conv_bias - mean) * inv
    return (scale.reshape(1, -1).astype(jnp.float32),
            shift.reshape(1, -1).astype(jnp.float32))


def _conv_w_to_taps(w_oihw):
    """PyTorch Conv2d weight (Cout, Cin, 3, 3) -> tap-major (9, Cin, Cout)."""
    cout, cin = w_oihw.shape[:2]
    return jnp.transpose(w_oihw, (2, 3, 1, 0)).reshape(9, cin, cout)


def init_convolution_block(key, in_channels, out_channels):
    k1, k2, k3, k4 = jax.random.split(key, 4)
    w1, b1 = _init_conv(k1, in_channels, out_channels)
    bn1 = _init_bn(k2, out_channels)
    w2, b2 = _init_conv(k3, out_channels, out_channels)
    bn2 = _init_bn(k4, out_channels)
    s1, sh1 = _fuse_bn(b1, *bn1)
    s2, sh2 = _fuse_bn(b2, *bn2)
    return dict(
        w1=_conv_w_to_taps(w1).astype(jnp.bfloat16), s1=s1, sh1=sh1,
        w2=_conv_w_to_taps(w2).astype(jnp.bfloat16), s2=s2, sh2=sh2)


# ------------------------- ConvolutionBlock forward -------------------------

def convolution_block_forward(params, x_nchw):
    x = jnp.transpose(x_nchw, (0, 2, 3, 1)).astype(jnp.bfloat16)   # NCHW->NHWC
    h = conv3x3_bn_relu(x, params["w1"], params["s1"], params["sh1"],
                        out_dtype=jnp.bfloat16)
    y = conv3x3_bn_relu(h, params["w2"], params["s2"], params["sh2"],
                        out_dtype=jnp.float32)
    return jnp.transpose(y, (0, 3, 1, 2))                          # NHWC->NCHW


# ----------------------------- pure-JAX reference ----------------------------

def _ref_conv_bn_relu(x_f32, w_taps_bf16, scale, shift):
    cin, cout = w_taps_bf16.shape[1], w_taps_bf16.shape[2]
    w_hwio = w_taps_bf16.astype(jnp.float32).reshape(3, 3, cin, cout)
    y = lax.conv_general_dilated(
        x_f32, w_hwio, window_strides=(1, 1), padding="SAME",
        dimension_numbers=("NHWC", "HWIO", "NHWC"),
        precision=lax.Precision.HIGHEST)
    y = y * scale.reshape(1, 1, 1, -1) + shift.reshape(1, 1, 1, -1)
    return jnp.maximum(y, 0.0)


def reference_forward(params, x_nchw):
    x = jnp.transpose(x_nchw, (0, 2, 3, 1))
    x = x.astype(jnp.bfloat16).astype(jnp.float32)        # same bf16 rounding
    h = _ref_conv_bn_relu(x, params["w1"], params["s1"], params["sh1"])
    h = h.astype(jnp.bfloat16).astype(jnp.float32)        # bf16 inter-layer act
    y = _ref_conv_bn_relu(h, params["w2"], params["s2"], params["sh2"])
    return jnp.transpose(y, (0, 3, 1, 2))


# ----------------------------------- main ------------------------------------

if __name__ == "__main__":
    key = jax.random.PRNGKey(0)
    kp, kx = jax.random.split(key)

    in_channels, out_channels = 4, 32
    params = init_convolution_block(kp, in_channels, out_channels)

    # PyTorch-style NCHW input: batch=2, channels=4, 16x16 spatial.
    x = jax.random.normal(kx, (2, in_channels, 16, 16), jnp.float32)

    y = jax.jit(convolution_block_forward)(params, x)
    jax.block_until_ready(y)

    assert y.shape == (2, out_channels, 16, 16), y.shape
    assert bool(jnp.all(jnp.isfinite(y)))
    assert bool(jnp.all(y >= 0.0))                        # ReLU output range

    y_ref = reference_forward(params, x)
    err = float(jnp.max(jnp.abs(y - y_ref)))
    assert err < 2e-2, f"max abs err vs reference: {err}"

    print("KERNEL_OK")
</pallas_src>

<mosaic_0001>
module attributes {stable_mosaic.version = 11 : i64} {
  func.func @_conv3x3_bn_relu_kernel(%arg0: i32, %arg1: i32, %arg2: memref<1x18x18x4xbf16, #tpu.memory_space<vmem>>, %arg3: memref<9x4x32xbf16, #tpu.memory_space<vmem>>, %arg4: memref<1x32xf32, #tpu.memory_space<vmem>>, %arg5: memref<1x32xf32, #tpu.memory_space<vmem>>, %arg6: memref<1x128x32xbf16, #tpu.memory_space<vmem>>) attributes {dimension_semantics = [#tpu.dimension_semantics<parallel>, #tpu.dimension_semantics<parallel>], iteration_bounds = array<i64: 2, 2>, scalar_prefetch = 0 : i64, scratch_operands = 0 : i64, tpu.core_type = #tpu.core_type<tc>, window_params = [{transform_indices = @transform_0, window_bounds = array<i64: 1, 18, 18, 4>}, {pipeline_mode = #tpu.pipeline_mode<synchronous>, transform_indices = @transform_1, window_bounds = array<i64: 9, 4, 32>}, {pipeline_mode = #tpu.pipeline_mode<synchronous>, transform_indices = @transform_2, window_bounds = array<i64: 1, 32>}, {pipeline_mode = #tpu.pipeline_mode<synchronous>, transform_indices = @transform_3, window_bounds = array<i64: 1, 32>}, {transform_indices = @transform_4, window_bounds = array<i64: 1, 128, 32>}]} {
    %c8_i32 = arith.constant 8 : i32
    %0 = arith.muli %arg1, %c8_i32 : i32
    %1 = tpu.assume_multiple %0, 8 : i32
    %cst = arith.constant 0.000000e+00 : f32
    %2 = vector.broadcast %cst : f32 to vector<128x32xf32>
    %c0_i32 = arith.constant 0 : i32
    %3 = arith.addi %1, %c0_i32 : i32
    %c0 = arith.constant 0 : index
    %4 = arith.index_cast %3 : i32 to index
    %c0_0 = arith.constant 0 : index
    %c0_1 = arith.constant 0 : index
    %5 = vector.load %arg2[%c0, %4, %c0_0, %c0_1] : memref<1x18x18x4xbf16, #tpu.memory_space<vmem>>, vector<1x8x16x4xbf16>
    %6 = vector.shape_cast %5 : vector<1x8x16x4xbf16> to vector<8x16x4xbf16>
    %7 = vector.shape_cast %6 : vector<8x16x4xbf16> to vector<128x4xbf16>
    %c0_2 = arith.constant 0 : index
    %c0_3 = arith.constant 0 : index
    %c0_4 = arith.constant 0 : index
    %8 = vector.load %arg3[%c0_2, %c0_3, %c0_4] : memref<9x4x32xbf16, #tpu.memory_space<vmem>>, vector<1x4x32xbf16>
    %9 = vector.shape_cast %8 : vector<1x4x32xbf16> to vector<4x32xbf16>
    %cst_5 = arith.constant dense<0.000000e+00> : vector<128x32xf32>
    %10 = tpu.matmul %7, %9, %cst_5 {dimension_numbers = #tpu.dot_dimension_numbers<[1], [0], [0], [1], [0, 0, 1, 1], [], []>} : vector<128x4xbf16>, vector<4x32xbf16>, vector<128x32xf32> -> vector<128x32xf32>
    %11 = arith.addf %2, %10 : vector<128x32xf32>
    %c0_i32_6 = arith.constant 0 : i32
    %12 = arith.addi %1, %c0_i32_6 : i32
    %c0_7 = arith.constant 0 : index
    %13 = arith.index_cast %12 : i32 to index
    %c1 = arith.constant 1 : index
    %c0_8 = arith.constant 0 : index
    %14 = vector.load %arg2[%c0_7, %13, %c1, %c0_8] : memref<1x18x18x4xbf16, #tpu.memory_space<vmem>>, vector<1x8x16x4xbf16>
    %15 = vector.shape_cast %14 : vector<1x8x16x4xbf16> to vector<8x16x4xbf16>
    %16 = vector.shape_cast %15 : vector<8x16x4xbf16> to vector<128x4xbf16>
    %c1_9 = arith.constant 1 : index
    %c0_10 = arith.constant 0 : index
    %c0_11 = arith.constant 0 : index
    %17 = vector.load %arg3[%c1_9, %c0_10, %c0_11] : memref<9x4x32xbf16, #tpu.memory_space<vmem>>, vector<1x4x32xbf16>
    %18 = vector.shape_cast %17 : vector<1x4x32xbf16> to vector<4x32xbf16>
    %cst_12 = arith.constant dense<0.000000e+00> : vector<128x32xf32>
    %19 = tpu.matmul %16, %18, %cst_12 {dimension_numbers = #tpu.dot_dimension_numbers<[1], [0], [0], [1], [0, 0, 1, 1], [], []>} : vector<128x4xbf16>, vector<4x32xbf16>, vector<128x32xf32> -> vector<128x32xf32>
    %20 = arith.addf %11, %19 : vector<128x32xf32>
    %c0_i32_13 = arith.constant 0 : i32
    %21 = arith.addi %1, %c0_i32_13 : i32
    %c0_14 = arith.constant 0 : index
    %22 = arith.index_cast %21 : i32 to index
    %c2 = arith.constant 2 : index
    %c0_15 = arith.constant 0 : index
    %23 = vector.load %arg2[%c0_14, %22, %c2, %c0_15] : memref<1x18x18x4xbf16, #tpu.memory_space<vmem>>, vector<1x8x16x4xbf16>
    %24 = vector.shape_cast %23 : vector<1x8x16x4xbf16> to vector<8x16x4xbf16>
    %25 = vector.shape_cast %24 : vector<8x16x4xbf16> to vector<128x4xbf16>
    %c2_16 = arith.constant 2 : index
    %c0_17 = arith.constant 0 : index
    %c0_18 = arith.constant 0 : index
    %26 = vector.load %arg3[%c2_16, %c0_17, %c0_18] : memref<9x4x32xbf16, #tpu.memory_space<vmem>>, vector<1x4x32xbf16>
    %27 = vector.shape_cast %26 : vector<1x4x32xbf16> to vector<4x32xbf16>
    %cst_19 = arith.constant dense<0.000000e+00> : vector<128x32xf32>
    %28 = tpu.matmul %25, %27, %cst_19 {dimension_numbers = #tpu.dot_dimension_numbers<[1], [0], [0], [1], [0, 0, 1, 1], [], []>} : vector<128x4xbf16>, vector<4x32xbf16>, vector<128x32xf32> -> vector<128x32xf32>
    %29 = arith.addf %20, %28 : vector<128x32xf32>
    %c1_i32 = arith.constant 1 : i32
    %30 = arith.addi %1, %c1_i32 : i32
    %c0_20 = arith.constant 0 : index
    %31 = arith.index_cast %30 : i32 to index
    %c0_21 = arith.constant 0 : index
    %c0_22 = arith.constant 0 : index
    %32 = vector.load %arg2[%c0_20, %31, %c0_21, %c0_22] : memref<1x18x18x4xbf16, #tpu.memory_space<vmem>>, vector<1x8x16x4xbf16>
    %33 = vector.shape_cast %32 : vector<1x8x16x4xbf16> to vector<8x16x4xbf16>
    %34 = vector.shape_cast %33 : vector<8x16x4xbf16> to vector<128x4xbf16>
    %c3 = arith.constant 3 : index
    %c0_23 = arith.constant 0 : index
    %c0_24 = arith.constant 0 : index
    %35 = vector.load %arg3[%c3, %c0_23, %c0_24] : memref<9x4x32xbf16, #tpu.memory_space<vmem>>, vector<1x4x32xbf16>
    %36 = vector.shape_cast %35 : vector<1x4x32xbf16> to vector<4x32xbf16>
    %cst_25 = arith.constant dense<0.000000e+00> : vector<128x32xf32>
    %37 = tpu.matmul %34, %36, %cst_25 {dimension_numbers = #tpu.dot_dimension_numbers<[1], [0], [0], [1], [0, 0, 1, 1], [], []>} : vector<128x4xbf16>, vector<4x32xbf16>, vector<128x32xf32> -> vector<128x32xf32>
    %38 = arith.addf %29, %37 : vector<128x32xf32>
    %c1_i32_26 = arith.constant 1 : i32
    %39 = arith.addi %1, %c1_i32_26 : i32
    %c0_27 = arith.constant 0 : index
    %40 = arith.index_cast %39 : i32 to index
    %c1_28 = arith.constant 1 : index
    %c0_29 = arith.constant 0 : index
    %41 = vector.load %arg2[%c0_27, %40, %c1_28, %c0_29] : memref<1x18x18x4xbf16, #tpu.memory_space<vmem>>, vector<1x8x16x4xbf16>
    %42 = vector.shape_cast %41 : vector<1x8x16x4xbf16> to vector<8x16x4xbf16>
    %43 = vector.shape_cast %42 : vector<8x16x4xbf16> to vector<128x4xbf16>
    %c4 = arith.constant 4 : index
    %c0_30 = arith.constant 0 : index
    %c0_31 = arith.constant 0 : index
    %44 = vector.load %arg3[%c4, %c0_30, %c0_31] : memref<9x4x32xbf16, #tpu.memory_space<vmem>>, vector<1x4x32xbf16>
    %45 = vector.shape_cast %44 : vector<1x4x32xbf16> to vector<4x32xbf16>
    %cst_32 = arith.constant dense<0.000000e+00> : vector<128x32xf32>
    %46 = tpu.matmul %43, %45, %cst_32 {dimension_numbers = #tpu.dot_dimension_numbers<[1], [0], [0], [1], [0, 0, 1, 1], [], []>} : vector<128x4xbf16>, vector<4x32xbf16>, vector<128x32xf32> -> vector<128x32xf32>
    %47 = arith.addf %38, %46 : vector<128x32xf32>
    %c1_i32_33 = arith.constant 1 : i32
    %48 = arith.addi %1, %c1_i32_33 : i32
    %c0_34 = arith.constant 0 : index
    %49 = arith.index_cast %48 : i32 to index
    %c2_35 = arith.constant 2 : index
    %c0_36 = arith.constant 0 : index
    %50 = vector.load %arg2[%c0_34, %49, %c2_35, %c0_36] : memref<1x18x18x4xbf16, #tpu.memory_space<vmem>>, vector<1x8x16x4xbf16>
    %51 = vector.shape_cast %50 : vector<1x8x16x4xbf16> to vector<8x16x4xbf16>
    %52 = vector.shape_cast %51 : vector<8x16x4xbf16> to vector<128x4xbf16>
    %c5 = arith.constant 5 : index
    %c0_37 = arith.constant 0 : index
    %c0_38 = arith.constant 0 : index
    %53 = vector.load %arg3[%c5, %c0_37, %c0_38] : memref<9x4x32xbf16, #tpu.memory_space<vmem>>, vector<1x4x32xbf16>
    %54 = vector.shape_cast %53 : vector<1x4x32xbf16> to vector<4x32xbf16>
    %cst_39 = arith.constant dense<0.000000e+00> : vector<128x32xf32>
    %55 = tpu.matmul %52, %54, %cst_39 {dimension_numbers = #tpu.dot_dimension_numbers<[1], [0], [0], [1], [0, 0, 1, 1], [], []>} : vector<128x4xbf16>, vector<4x32xbf16>, vector<128x32xf32> -> vector<128x32xf32>
    %56 = arith.addf %47, %55 : vector<128x32xf32>
    %c2_i32 = arith.constant 2 : i32
    %57 = arith.addi %1, %c2_i32 : i32
    %c0_40 = arith.constant 0 : index
    %58 = arith.index_cast %57 : i32 to index
    %c0_41 = arith.constant 0 : index
    %c0_42 = arith.constant 0 : index
    %59 = vector.load %arg2[%c0_40, %58, %c0_41, %c0_42] : memref<1x18x18x4xbf16, #tpu.memory_space<vmem>>, vector<1x8x16x4xbf16>
    %60 = vector.shape_cast %59 : vector<1x8x16x4xbf16> to vector<8x16x4xbf16>
    %61 = vector.shape_cast %60 : vector<8x16x4xbf16> to vector<128x4xbf16>
    %c6 = arith.constant 6 : index
    %c0_43 = arith.constant 0 : index
    %c0_44 = arith.constant 0 : index
    %62 = vector.load %arg3[%c6, %c0_43, %c0_44] : memref<9x4x32xbf16, #tpu.memory_space<vmem>>, vector<1x4x32xbf16>
    %63 = vector.shape_cast %62 : vector<1x4x32xbf16> to vector<4x32xbf16>
    %cst_45 = arith.constant dense<0.000000e+00> : vector<128x32xf32>
    %64 = tpu.matmul %61, %63, %cst_45 {dimension_numbers = #tpu.dot_dimension_numbers<[1], [0], [0], [1], [0, 0, 1, 1], [], []>} : vector<128x4xbf16>, vector<4x32xbf16>, vector<128x32xf32> -> vector<128x32xf32>
    %65 = arith.addf %56, %64 : vector<128x32xf32>
    %c2_i32_46 = arith.constant 2 : i32
    %66 = arith.addi %1, %c2_i32_46 : i32
    %c0_47 = arith.constant 0 : index
    %67 = arith.index_cast %66 : i32 to index
    %c1_48 = arith.constant 1 : index
    %c0_49 = arith.constant 0 : index
    %68 = vector.load %arg2[%c0_47, %67, %c1_48, %c0_49] : memref<1x18x18x4xbf16, #tpu.memory_space<vmem>>, vector<1x8x16x4xbf16>
    %69 = vector.shape_cast %68 : vector<1x8x16x4xbf16> to vector<8x16x4xbf16>
    %70 = vector.shape_cast %69 : vector<8x16x4xbf16> to vector<128x4xbf16>
    %c7 = arith.constant 7 : index
    %c0_50 = arith.constant 0 : index
    %c0_51 = arith.constant 0 : index
    %71 = vector.load %arg3[%c7, %c0_50, %c0_51] : memref<9x4x32xbf16, #tpu.memory_space<vmem>>, vector<1x4x32xbf16>
    %72 = vector.shape_cast %71 : vector<1x4x32xbf16> to vector<4x32xbf16>
    %cst_52 = arith.constant dense<0.000000e+00> : vector<128x32xf32>
    %73 = tpu.matmul %70, %72, %cst_52 {dimension_numbers = #tpu.dot_dimension_numbers<[1], [0], [0], [1], [0, 0, 1, 1], [], []>} : vector<128x4xbf16>, vector<4x32xbf16>, vector<128x32xf32> -> vector<128x32xf32>
    %74 = arith.addf %65, %73 : vector<128x32xf32>
    %c2_i32_53 = arith.constant 2 : i32
    %75 = arith.addi %1, %c2_i32_53 : i32
    %c0_54 = arith.constant 0 : index
    %76 = arith.index_cast %75 : i32 to index
    %c2_55 = arith.constant 2 : index
    %c0_56 = arith.constant 0 : index
    %77 = vector.load %arg2[%c0_54, %76, %c2_55, %c0_56] : memref<1x18x18x4xbf16, #tpu.memory_space<vmem>>, vector<1x8x16x4xbf16>
    %78 = vector.shape_cast %77 : vector<1x8x16x4xbf16> to vector<8x16x4xbf16>
    %79 = vector.shape_cast %78 : vector<8x16x4xbf16> to vector<128x4xbf16>
    %c8 = arith.constant 8 : index
    %c0_57 = arith.constant 0 : index
    %c0_58 = arith.constant 0 : index
    %80 = vector.load %arg3[%c8, %c0_57, %c0_58] : memref<9x4x32xbf16, #tpu.memory_space<vmem>>, vector<1x4x32xbf16>
    %81 = vector.shape_cast %80 : vector<1x4x32xbf16> to vector<4x32xbf16>
    %cst_59 = arith.constant dense<0.000000e+00> : vector<128x32xf32>
    %82 = tpu.matmul %79, %81, %cst_59 {dimension_numbers = #tpu.dot_dimension_numbers<[1], [0], [0], [1], [0, 0, 1, 1], [], []>} : vector<128x4xbf16>, vector<4x32xbf16>, vector<128x32xf32> -> vector<128x32xf32>
    %83 = arith.addf %74, %82 : vector<128x32xf32>
    %c0_60 = arith.constant 0 : index
    %c0_61 = arith.constant 0 : index
    %84 = vector.load %arg4[%c0_60, %c0_61] : memref<1x32xf32, #tpu.memory_space<vmem>>, vector<1x32xf32>
    %85 = vector.broadcast %84 : vector<1x32xf32> to vector<128x32xf32>
    %86 = arith.mulf %83, %85 : vector<128x32xf32>
    %c0_62 = arith.constant 0 : index
    %c0_63 = arith.constant 0 : index
    %87 = vector.load %arg5[%c0_62, %c0_63] : memref<1x32xf32, #tpu.memory_space<vmem>>, vector<1x32xf32>
    %88 = vector.broadcast %87 : vector<1x32xf32> to vector<128x32xf32>
    %89 = arith.addf %86, %88 : vector<128x32xf32>
    %cst_64 = arith.constant 0.000000e+00 : f32
    %90 = vector.broadcast %cst_64 : f32 to vector<128x32xf32>
    %91 = arith.maximumf %89, %90 : vector<128x32xf32>
    %92 = arith.truncf %91 : vector<128x32xf32> to vector<128x32xbf16>
    %c0_65 = arith.constant 0 : index
    %c0_66 = arith.constant 0 : index
    %c0_67 = arith.constant 0 : index
    %93 = vector.load %arg6[%c0_65, %c0_66, %c0_67] : memref<1x128x32xbf16, #tpu.memory_space<vmem>>, vector<1x128x32xbf16>
    %94 = vector.shape_cast %93 : vector<1x128x32xbf16> to vector<128x32xbf16>
    %95 = vector.shape_cast %92 : vector<128x32xbf16> to vector<1x128x32xbf16>
    tpu.vector_store %arg6[%c0_65, %c0_66, %c0_67], %95 {strides = array<i32>} : memref<1x128x32xbf16, #tpu.memory_space<vmem>>, vector<1x128x32xbf16>,
    return
  }
  func.func @transform_0(%arg0: i32, %arg1: i32) -> (i32, i32, i32, i32) {
    %c0_i32 = arith.constant 0 : i32
    %c0_i32_0 = arith.constant 0 : i32
    %c0_i32_1 = arith.constant 0 : i32
    %c0_i32_2 = arith.constant 0 : i32
    return %arg0, %c0_i32, %c0_i32_0, %c0_i32_1 : i32, i32, i32, i32
  }
  func.func @transform_1(%arg0: i32, %arg1: i32) -> (i32, i32, i32) {
    %c0_i32 = arith.constant 0 : i32
    %c0_i32_0 = arith.constant 0 : i32
    %c0_i32_1 = arith.constant 0 : i32
    %c0_i32_2 = arith.constant 0 : i32
    return %c0_i32, %c0_i32_0, %c0_i32_1 : i32, i32, i32
  }
  func.func @transform_2(%arg0: i32, %arg1: i32) -> (i32, i32) {
    %c0_i32 = arith.constant 0 : i32
    %c0_i32_0 = arith.constant 0 : i32
    %c0_i32_1 = arith.constant 0 : i32
    return %c0_i32, %c0_i32_0 : i32, i32
  }
  func.func @transform_3(%arg0: i32, %arg1: i32) -> (i32, i32) {
    %c0_i32 = arith.constant 0 : i32
    %c0_i32_0 = arith.constant 0 : i32
    %c0_i32_1 = arith.constant 0 : i32
    return %c0_i32, %c0_i32_0 : i32, i32
  }
  func.func @transform_4(%arg0: i32, %arg1: i32) -> (i32, i32, i32) {
    %c0_i32 = arith.constant 0 : i32
    %c0_i32_0 = arith.constant 0 : i32
    return %arg0, %arg1, %c0_i32 : i32, i32, i32
  }
}

module attributes {stable_mosaic.version = 11 : i64} {
  func.func @_conv3x3_bn_relu_kernel(%arg0: i32, %arg1: i32, %arg2: memref<1x18x18x32xbf16, #tpu.memory_space<vmem>>, %arg3: memref<9x32x32xbf16, #tpu.memory_space<vmem>>, %arg4: memref<1x32xf32, #tpu.memory_space<vmem>>, %arg5: memref<1x32xf32, #tpu.memory_space<vmem>>, %arg6: memref<1x128x32xf32, #tpu.memory_space<vmem>>) attributes {dimension_semantics = [#tpu.dimension_semantics<parallel>, #tpu.dimension_semantics<parallel>], iteration_bounds = array<i64: 2, 2>, scalar_prefetch = 0 : i64, scratch_operands = 0 : i64, tpu.core_type = #tpu.core_type<tc>, window_params = [{transform_indices = @transform_0, window_bounds = array<i64: 1, 18, 18, 32>}, {pipeline_mode = #tpu.pipeline_mode<synchronous>, transform_indices = @transform_1, window_bounds = array<i64: 9, 32, 32>}, {pipeline_mode = #tpu.pipeline_mode<synchronous>, transform_indices = @transform_2, window_bounds = array<i64: 1, 32>}, {pipeline_mode = #tpu.pipeline_mode<synchronous>, transform_indices = @transform_3, window_bounds = array<i64: 1, 32>}, {transform_indices = @transform_4, window_bounds = array<i64: 1, 128, 32>}]} {
    %c8_i32 = arith.constant 8 : i32
    %0 = arith.muli %arg1, %c8_i32 : i32
    %1 = tpu.assume_multiple %0, 8 : i32
    %cst = arith.constant 0.000000e+00 : f32
    %2 = vector.broadcast %cst : f32 to vector<128x32xf32>
    %c0_i32 = arith.constant 0 : i32
    %3 = arith.addi %1, %c0_i32 : i32
    %c0 = arith.constant 0 : index
    %4 = arith.index_cast %3 : i32 to index
    %c0_0 = arith.constant 0 : index
    %c0_1 = arith.constant 0 : index
    %5 = vector.load %arg2[%c0, %4, %c0_0, %c0_1] : memref<1x18x18x32xbf16, #tpu.memory_space<vmem>>, vector<1x8x16x32xbf16>
    %6 = vector.shape_cast %5 : vector<1x8x16x32xbf16> to vector<8x16x32xbf16>
    %7 = vector.shape_cast %6 : vector<8x16x32xbf16> to vector<128x32xbf16>
    %c0_2 = arith.constant 0 : index
    %c0_3 = arith.constant 0 : index
    %c0_4 = arith.constant 0 : index
    %8 = vector.load %arg3[%c0_2, %c0_3, %c0_4] : memref<9x32x32xbf16, #tpu.memory_space<vmem>>, vector<1x32x32xbf16>
    %9 = vector.shape_cast %8 : vector<1x32x32xbf16> to vector<32x32xbf16>
    %cst_5 = arith.constant dense<0.000000e+00> : vector<128x32xf32>
    %10 = tpu.matmul %7, %9, %cst_5 {dimension_numbers = #tpu.dot_dimension_numbers<[1], [0], [0], [1], [0, 0, 1, 1], [], []>} : vector<128x32xbf16>, vector<32x32xbf16>, vector<128x32xf32> -> vector<128x32xf32>
    %11 = arith.addf %2, %10 : vector<128x32xf32>
    %c0_i32_6 = arith.constant 0 : i32
    %12 = arith.addi %1, %c0_i32_6 : i32
    %c0_7 = arith.constant 0 : index
    %13 = arith.index_cast %12 : i32 to index
    %c1 = arith.constant 1 : index
    %c0_8 = arith.constant 0 : index
    %14 = vector.load %arg2[%c0_7, %13, %c1, %c0_8] : memref<1x18x18x32xbf16, #tpu.memory_space<vmem>>, vector<1x8x16x32xbf16>
    %15 = vector.shape_cast %14 : vector<1x8x16x32xbf16> to vector<8x16x32xbf16>
    %16 = vector.shape_cast %15 : vector<8x16x32xbf16> to vector<128x32xbf16>
    %c1_9 = arith.constant 1 : index
    %c0_10 = arith.constant 0 : index
    %c0_11 = arith.constant 0 : index
    %17 = vector.load %arg3[%c1_9, %c0_10, %c0_11] : memref<9x32x32xbf16, #tpu.memory_space<vmem>>, vector<1x32x32xbf16>
    %18 = vector.shape_cast %17 : vector<1x32x32xbf16> to vector<32x32xbf16>
    %cst_12 = arith.constant dense<0.000000e+00> : vector<128x32xf32>
    %19 = tpu.matmul %16, %18, %cst_12 {dimension_numbers = #tpu.dot_dimension_numbers<[1], [0], [0], [1], [0, 0, 1, 1], [], []>} : vector<128x32xbf16>, vector<32x32xbf16>, vector<128x32xf32> -> vector<128x32xf32>
    %20 = arith.addf %11, %19 : vector<128x32xf32>
    %c0_i32_13 = arith.constant 0 : i32
    %21 = arith.addi %1, %c0_i32_13 : i32
    %c0_14 = arith.constant 0 : index
    %22 = arith.index_cast %21 : i32 to index
    %c2 = arith.constant 2 : index
    %c0_15 = arith.constant 0 : index
    %23 = vector.load %arg2[%c0_14, %22, %c2, %c0_15] : memref<1x18x18x32xbf16, #tpu.memory_space<vmem>>, vector<1x8x16x32xbf16>
    %24 = vector.shape_cast %23 : vector<1x8x16x32xbf16> to vector<8x16x32xbf16>
    %25 = vector.shape_cast %24 : vector<8x16x32xbf16> to vector<128x32xbf16>
    %c2_16 = arith.constant 2 : index
    %c0_17 = arith.constant 0 : index
    %c0_18 = arith.constant 0 : index
    %26 = vector.load %arg3[%c2_16, %c0_17, %c0_18] : memref<9x32x32xbf16, #tpu.memory_space<vmem>>, vector<1x32x32xbf16>
    %27 = vector.shape_cast %26 : vector<1x32x32xbf16> to vector<32x32xbf16>
    %cst_19 = arith.constant dense<0.000000e+00> : vector<128x32xf32>
    %28 = tpu.matmul %25, %27, %cst_19 {dimension_numbers = #tpu.dot_dimension_numbers<[1], [0], [0], [1], [0, 0, 1, 1], [], []>} : vector<128x32xbf16>, vector<32x32xbf16>, vector<128x32xf32> -> vector<128x32xf32>
    %29 = arith.addf %20, %28 : vector<128x32xf32>
    %c1_i32 = arith.constant 1 : i32
    %30 = arith.addi %1, %c1_i32 : i32
    %c0_20 = arith.constant 0 : index
    %31 = arith.index_cast %30 : i32 to index
    %c0_21 = arith.constant 0 : index
    %c0_22 = arith.constant 0 : index
    %32 = vector.load %arg2[%c0_20, %31, %c0_21, %c0_22] : memref<1x18x18x32xbf16, #tpu.memory_space<vmem>>, vector<1x8x16x32xbf16>
    %33 = vector.shape_cast %32 : vector<1x8x16x32xbf16> to vector<8x16x32xbf16>
    %34 = vector.shape_cast %33 : vector<8x16x32xbf16> to vector<128x32xbf16>
    %c3 = arith.constant 3 : index
    %c0_23 = arith.constant 0 : index
    %c0_24 = arith.constant 0 : index
    %35 = vector.load %arg3[%c3, %c0_23, %c0_24] : memref<9x32x32xbf16, #tpu.memory_space<vmem>>, vector<1x32x32xbf16>
    %36 = vector.shape_cast %35 : vector<1x32x32xbf16> to vector<32x32xbf16>
    %cst_25 = arith.constant dense<0.000000e+00> : vector<128x32xf32>
    %37 = tpu.matmul %34, %36, %cst_25 {dimension_numbers = #tpu.dot_dimension_numbers<[1], [0], [0], [1], [0, 0, 1, 1], [], []>} : vector<128x32xbf16>, vector<32x32xbf16>, vector<128x32xf32> -> vector<128x32xf32>
    %38 = arith.addf %29, %37 : vector<128x32xf32>
    %c1_i32_26 = arith.constant 1 : i32
    %39 = arith.addi %1, %c1_i32_26 : i32
    %c0_27 = arith.constant 0 : index
    %40 = arith.index_cast %39 : i32 to index
    %c1_28 = arith.constant 1 : index
    %c0_29 = arith.constant 0 : index
    %41 = vector.load %arg2[%c0_27, %40, %c1_28, %c0_29] : memref<1x18x18x32xbf16, #tpu.memory_space<vmem>>, vector<1x8x16x32xbf16>
    %42 = vector.shape_cast %41 : vector<1x8x16x32xbf16> to vector<8x16x32xbf16>
    %43 = vector.shape_cast %42 : vector<8x16x32xbf16> to vector<128x32xbf16>
    %c4 = arith.constant 4 : index
    %c0_30 = arith.constant 0 : index
    %c0_31 = arith.constant 0 : index
    %44 = vector.load %arg3[%c4, %c0_30, %c0_31] : memref<9x32x32xbf16, #tpu.memory_space<vmem>>, vector<1x32x32xbf16>
    %45 = vector.shape_cast %44 : vector<1x32x32xbf16> to vector<32x32xbf16>
    %cst_32 = arith.constant dense<0.000000e+00> : vector<128x32xf32>
    %46 = tpu.matmul %43, %45, %cst_32 {dimension_numbers = #tpu.dot_dimension_numbers<[1], [0], [0], [1], [0, 0, 1, 1], [], []>} : vector<128x32xbf16>, vector<32x32xbf16>, vector<128x32xf32> -> vector<128x32xf32>
    %47 = arith.addf %38, %46 : vector<128x32xf32>
    %c1_i32_33 = arith.constant 1 : i32
    %48 = arith.addi %1, %c1_i32_33 : i32
    %c0_34 = arith.constant 0 : index
    %49 = arith.index_cast %48 : i32 to index
    %c2_35 = arith.constant 2 : index
    %c0_36 = arith.constant 0 : index
    %50 = vector.load %arg2[%c0_34, %49, %c2_35, %c0_36] : memref<1x18x18x32xbf16, #tpu.memory_space<vmem>>, vector<1x8x16x32xbf16>
    %51 = vector.shape_cast %50 : vector<1x8x16x32xbf16> to vector<8x16x32xbf16>
    %52 = vector.shape_cast %51 : vector<8x16x32xbf16> to vector<128x32xbf16>
    %c5 = arith.constant 5 : index
    %c0_37 = arith.constant 0 : index
    %c0_38 = arith.constant 0 : index
    %53 = vector.load %arg3[%c5, %c0_37, %c0_38] : memref<9x32x32xbf16, #tpu.memory_space<vmem>>, vector<1x32x32xbf16>
    %54 = vector.shape_cast %53 : vector<1x32x32xbf16> to vector<32x32xbf16>
    %cst_39 = arith.constant dense<0.000000e+00> : vector<128x32xf32>
    %55 = tpu.matmul %52, %54, %cst_39 {dimension_numbers = #tpu.dot_dimension_numbers<[1], [0], [0], [1], [0, 0, 1, 1], [], []>} : vector<128x32xbf16>, vector<32x32xbf16>, vector<128x32xf32> -> vector<128x32xf32>
    %56 = arith.addf %47, %55 : vector<128x32xf32>
    %c2_i32 = arith.constant 2 : i32
    %57 = arith.addi %1, %c2_i32 : i32
    %c0_40 = arith.constant 0 : index
    %58 = arith.index_cast %57 : i32 to index
    %c0_41 = arith.constant 0 : index
    %c0_42 = arith.constant 0 : index
    %59 = vector.load %arg2[%c0_40, %58, %c0_41, %c0_42] : memref<1x18x18x32xbf16, #tpu.memory_space<vmem>>, vector<1x8x16x32xbf16>
    %60 = vector.shape_cast %59 : vector<1x8x16x32xbf16> to vector<8x16x32xbf16>
    %61 = vector.shape_cast %60 : vector<8x16x32xbf16> to vector<128x32xbf16>
    %c6 = arith.constant 6 : index
    %c0_43 = arith.constant 0 : index
    %c0_44 = arith.constant 0 : index
    %62 = vector.load %arg3[%c6, %c0_43, %c0_44] : memref<9x32x32xbf16, #tpu.memory_space<vmem>>, vector<1x32x32xbf16>
    %63 = vector.shape_cast %62 : vector<1x32x32xbf16> to vector<32x32xbf16>
    %cst_45 = arith.constant dense<0.000000e+00> : vector<128x32xf32>
    %64 = tpu.matmul %61, %63, %cst_45 {dimension_numbers = #tpu.dot_dimension_numbers<[1], [0], [0], [1], [0, 0, 1, 1], [], []>} : vector<128x32xbf16>, vector<32x32xbf16>, vector<128x32xf32> -> vector<128x32xf32>
    %65 = arith.addf %56, %64 : vector<128x32xf32>
    %c2_i32_46 = arith.constant 2 : i32
    %66 = arith.addi %1, %c2_i32_46 : i32
    %c0_47 = arith.constant 0 : index
    %67 = arith.index_cast %66 : i32 to index
    %c1_48 = arith.constant 1 : index
    %c0_49 = arith.constant 0 : index
    %68 = vector.load %arg2[%c0_47, %67, %c1_48, %c0_49] : memref<1x18x18x32xbf16, #tpu.memory_space<vmem>>, vector<1x8x16x32xbf16>
    %69 = vector.shape_cast %68 : vector<1x8x16x32xbf16> to vector<8x16x32xbf16>
    %70 = vector.shape_cast %69 : vector<8x16x32xbf16> to vector<128x32xbf16>
    %c7 = arith.constant 7 : index
    %c0_50 = arith.constant 0 : index
    %c0_51 = arith.constant 0 : index
    %71 = vector.load %arg3[%c7, %c0_50, %c0_51] : memref<9x32x32xbf16, #tpu.memory_space<vmem>>, vector<1x32x32xbf16>
    %72 = vector.shape_cast %71 : vector<1x32x32xbf16> to vector<32x32xbf16>
    %cst_52 = arith.constant dense<0.000000e+00> : vector<128x32xf32>
    %73 = tpu.matmul %70, %72, %cst_52 {dimension_numbers = #tpu.dot_dimension_numbers<[1], [0], [0], [1], [0, 0, 1, 1], [], []>} : vector<128x32xbf16>, vector<32x32xbf16>, vector<128x32xf32> -> vector<128x32xf32>
    %74 = arith.addf %65, %73 : vector<128x32xf32>
    %c2_i32_53 = arith.constant 2 : i32
    %75 = arith.addi %1, %c2_i32_53 : i32
    %c0_54 = arith.constant 0 : index
    %76 = arith.index_cast %75 : i32 to index
    %c2_55 = arith.constant 2 : index
    %c0_56 = arith.constant 0 : index
    %77 = vector.load %arg2[%c0_54, %76, %c2_55, %c0_56] : memref<1x18x18x32xbf16, #tpu.memory_space<vmem>>, vector<1x8x16x32xbf16>
    %78 = vector.shape_cast %77 : vector<1x8x16x32xbf16> to vector<8x16x32xbf16>
    %79 = vector.shape_cast %78 : vector<8x16x32xbf16> to vector<128x32xbf16>
    %c8 = arith.constant 8 : index
    %c0_57 = arith.constant 0 : index
    %c0_58 = arith.constant 0 : index
    %80 = vector.load %arg3[%c8, %c0_57, %c0_58] : memref<9x32x32xbf16, #tpu.memory_space<vmem>>, vector<1x32x32xbf16>
    %81 = vector.shape_cast %80 : vector<1x32x32xbf16> to vector<32x32xbf16>
    %cst_59 = arith.constant dense<0.000000e+00> : vector<128x32xf32>
    %82 = tpu.matmul %79, %81, %cst_59 {dimension_numbers = #tpu.dot_dimension_numbers<[1], [0], [0], [1], [0, 0, 1, 1], [], []>} : vector<128x32xbf16>, vector<32x32xbf16>, vector<128x32xf32> -> vector<128x32xf32>
    %83 = arith.addf %74, %82 : vector<128x32xf32>
    %c0_60 = arith.constant 0 : index
    %c0_61 = arith.constant 0 : index
    %84 = vector.load %arg4[%c0_60, %c0_61] : memref<1x32xf32, #tpu.memory_space<vmem>>, vector<1x32xf32>
    %85 = vector.broadcast %84 : vector<1x32xf32> to vector<128x32xf32>
    %86 = arith.mulf %83, %85 : vector<128x32xf32>
    %c0_62 = arith.constant 0 : index
    %c0_63 = arith.constant 0 : index
    %87 = vector.load %arg5[%c0_62, %c0_63] : memref<1x32xf32, #tpu.memory_space<vmem>>, vector<1x32xf32>
    %88 = vector.broadcast %87 : vector<1x32xf32> to vector<128x32xf32>
    %89 = arith.addf %86, %88 : vector<128x32xf32>
    %cst_64 = arith.constant 0.000000e+00 : f32
    %90 = vector.broadcast %cst_64 : f32 to vector<128x32xf32>
    %91 = arith.maximumf %89, %90 : vector<128x32xf32>
    %c0_65 = arith.constant 0 : index
    %c0_66 = arith.constant 0 : index
    %c0_67 = arith.constant 0 : index
    %92 = vector.load %arg6[%c0_65, %c0_66, %c0_67] : memref<1x128x32xf32, #tpu.memory_space<vmem>>, vector<1x128x32xf32>
    %93 = vector.shape_cast %92 : vector<1x128x32xf32> to vector<128x32xf32>
    %94 = vector.shape_cast %91 : vector<128x32xf32> to vector<1x128x32xf32>
    tpu.vector_store %arg6[%c0_65, %c0_66, %c0_67], %94 {strides = array<i32>} : memref<1x128x32xf32, #tpu.memory_space<vmem>>, vector<1x128x32xf32>,
    return
  }
  func.func @transform_0(%arg0: i32, %arg1: i32) -> (i32, i32, i32, i32) {
    %c0_i32 = arith.constant 0 : i32
    %c0_i32_0 = arith.constant 0 : i32
    %c0_i32_1 = arith.constant 0 : i32
    %c0_i32_2 = arith.constant 0 : i32
    return %arg0, %c0_i32, %c0_i32_0, %c0_i32_1 : i32, i32, i32, i32
  }
  func.func @transform_1(%arg0: i32, %arg1: i32) -> (i32, i32, i32) {
    %c0_i32 = arith.constant 0 : i32
    %c0_i32_0 = arith.constant 0 : i32
    %c0_i32_1 = arith.constant 0 : i32
    %c0_i32_2 = arith.constant 0 : i32
    return %c0_i32, %c0_i32_0, %c0_i32_1 : i32, i32, i32
  }
  func.func @transform_2(%arg0: i32, %arg1: i32) -> (i32, i32) {
    %c0_i32 = arith.constant 0 : i32
    %c0_i32_0 = arith.constant 0 : i32
    %c0_i32_1 = arith.constant 0 : i32
    return %c0_i32, %c0_i32_0 : i32, i32
  }
  func.func @transform_3(%arg0: i32, %arg1: i32) -> (i32, i32) {
    %c0_i32 = arith.constant 0 : i32
    %c0_i32_0 = arith.constant 0 : i32
    %c0_i32_1 = arith.constant 0 : i32
    return %c0_i32, %c0_i32_0 : i32, i32
  }
  func.func @transform_4(%arg0: i32, %arg1: i32) -> (i32, i32, i32) {
    %c0_i32 = arith.constant 0 : i32
    %c0_i32_0 = arith.constant 0 : i32
    return %arg0, %arg1, %c0_i32 : i32, i32, i32
  }
}

</mosaic_0001>

<bundles_post_ra>
// kernel: convolution_block_forward.2
= control target key start
LH: loop header
LB: loop body
LE: loop exit
PB: predicated region body
PF: predicated region fallthrough
CT: control target
= control target key end

     0   :  { %s3763_s15 = smov 0   ;;  %s3765_s16 = smov 0   ;;  %s4755_s0 = inlined_call_operand.vmem [shape: bf16[2,18,18,4], index: 0, kind: input, shape index: {}]   ;;  %s4756_s1 = inlined_call_operand.vmem [shape: bf16[9,4,32], index: 1, kind: input, shape index: {}]   ;;  %s4757_s2 = inlined_call_operand.vmem [shape: f32[1,32], index: 2, kind: input, shape index: {}]   ;;  %s4758_s3 = inlined_call_operand.vmem [shape: f32[1,32], index: 3, kind: input, shape index: {}]   ;;  %s4759_s4 = inlined_call_operand.vmem [shape: bf16[2,256,32], index: 4, kind: output, shape index: {}]  }
   0x1   :  { %s3767_s17 = smov 0   ;;  %s3769_s18 = smov 0  }
   0x2   :  { %s3771_s19 = smov 0  }
   0x3 LB: > { %s23_s20 = sadd.s32 1, %s3728_s17  ;;  %s26_s21 = sadd.s32 1, %s3732_s18  ;;  %s3736_s19 = sphi %s3771_s19, %s14_s19   ;;  %s3732_s18 = sphi %s3769_s18, %s4785_s18   ;;  %s3728_s17 = sphi %s3767_s17, %s4784_s17   ;;  %s3724_s16 = sphi %s3765_s16, %s4783_s16   ;;  %s3720_s15 = sphi %s3763_s15, %s4782_s15  }
   0x4   : > { %p24_p0 = scmp.ge.s32.totalorder %s23_s20, 2  ;;  %p2928_p1 = scmp.ge.s32.totalorder %s3736_s19, 1 }
   0x5   : > { %p176_p2 = scmp.lt.s32.totalorder %s3736_s19, 5 }
   0x6   : > { %s4787_s20 = smov (%p24_p0, %s23_s20), 0  ;;  %s4789_s21 = smov (!%p24_p0, %s26_s21), %s3732_s18 }
   0x7   : > { %p177_p3 = pnand %p2928_p1, %p176_p2  ;;  %p28_p4 = scmp.ge.s32.totalorder %s4789_s21, 2 }
   0x9   : > { %s4791_s21 = smov (%p28_p4, %s4789_s21), 0  ;;  %180 = sbr.rel (%p177_p3) target bundleno = 425 (0x1a9), region = 36 }
  0x10   : > { %v2936_v0 = vld [vmem:[%s4756_s1 + $0x2] sm:$0x3]  ;;  %vm497_vm0 = vcmask 1041408   ;;  %v3053_v1 = vld [vmem:[%s4756_s1 + $0x8] sm:$0x3]  ;;  %p206_p5 = scmp.lt.s32.totalorder %s3724_s16, 1 }
  0x11   : > { %3622 = vmatprep.subr.msk.bf16.mxu1 %vm497_vm0, %v2936_v0  ;;  %3626 = vmatprep.subr.msk.bf16.mxu0 %vm497_vm0, %v3053_v1  ;;  %v499_v2 = vsel %vm497_vm0, %v2936_v0, 0  ;;  %v3805_v3 = vsel %vm497_vm0, %v3053_v1, 0  ;;  %v242_v4 = vld [vmem:[%s4756_s1] sm:$0x3]  ;;  %s3232_s28 = smul.u32 96, %s3720_s15  ;;  %vm472_vm3 = vcmask 31744  }
  0x12   : > { %3331 = vmatpush3.bf16.msra.mxu1 %v499_v2  ;;  %3403 = vmatpush3.bf16.msra.mxu0 %v3805_v3  ;;  %s4793_s16 = smov (!%p206_p5, %s3724_s16), 1  ;;  %v3086_v5 = vld [vmem:[%s4756_s1 + $0xa] sm:$0x3]  ;;  %vm251_vm1 = vsmask.f32 3328  ;;  %v3847_v17 = vsel %vm497_vm0, %v242_v4, 0 }
  0x13   : > { %3623 = vmatprep.subr.msk.bf16.mxu1 %vm497_vm0, %v242_v4  ;;  %s3632_s5 = smul.u32 216, %s4793_s16  ;;  %3628 = vmatprep.subr.msk.bf16.mxu0 %vm497_vm0, %v3086_v5  ;;  %vm252_vm2 = vsmask.f32 7440  ;;  %v3853_v26 = vld [vmem:[%s4756_s1 + $0xc] sm:$0x3]  ;;  %v3870_v37 = vsel %vm497_vm0, %v3086_v5, 0 }
  0x14   : > { %vm3862_vm4 = vmor %vm251_vm1, %vm252_vm2  ;;  %v3874_v41 = vsel %vm497_vm0, %v3853_v26, 0  ;;  %vm786_vm5 = vcmask 1042432   ;;  %vm787_vm6 = vcmask 1046532   ;;  %s2930_s29 = sshll.u32 %s3720_s15, 4  ;;  %s2931_s30 = sshll.u32 %s4793_s16, 5  ;;  %vm2813_vm8 = vcmask 257024  }
  0x15   : > { %s210_s8 = scalar_lea.vmem %s4755_s0, %s3632_s5  ;;  %vm4017_vm7 = vmor %vm786_vm5, %vm787_vm6  ;;  %p214_p6 = scmp.lt.s32.totalorder %s2930_s29, 31 }
  0x16   : > { %s3823_s9 = scalar_lea.vmem %s210_s8, %s3232_s28 }
  0x17   : > { %v3826_v6 = vld [vmem:[%s3823_s9] sm:$0xf]  ;;  %v3829_v7 = vld [vmem:[%s3823_s9 + $0x4] sm:$0xf]  ;;  %v3832_v8 = vld [vmem:[%s3823_s9 + $0x8] sm:$0x1] }
  0x18   : > { %v255_v9 = vshrl.u32 %v3826_v6, 16  ;;  %v258_v10 = vshll.u32 %v3826_v6, 16  ;;  %v264_v11 = vshll.u32 %v3829_v7, 16  ;;  %v268_v12 = vshrl.u32 %v3829_v7, 16  ;;  %v3029_v13 = vld [vmem:[%s3823_s9 + $0xc] sm:$0xf] }
  0x19   : > { %v274_v14 = vshll.u32 %v3832_v8, 16  ;;  %v3841_v15 = vld [vmem:[%s3823_s9 + $0x10] sm:$0xf]  ;;  %v3844_v16 = vld [vmem:[%s3823_s9 + $0x14] sm:$0x1]  ;;  %v1238_v23 = vshrl.u32 %v3029_v13, 16 }
  0x1a   : > { %v257_v18 = vrot.slane %v255_v9, 4  ;;  %v260_v19 = vrot.slane %v258_v10, 5  ;;  %v266_v20 = vrot.slane %v264_v11, 5  ;;  %v270_v21 = vrot.slane %v268_v12, 4  ;;  %v3858_v31 = vld [vmem:[%s3823_s9 + $0xc] sm:$0xf] }
  0x1b   : > { %v276_v22 = vrot.slane %v274_v14, 5  ;;  %v1241_v24 = vshll.u32 %v3029_v13, 16  ;;  %v1247_v25 = vshll.u32 %v3841_v15, 16  ;;  %v1251_v29 = vshrl.u32 %v3841_v15, 16  ;;  %v3867_v36 = vld [vmem:[%s3823_s9 + $0x10] sm:$0xf] }
  0x1c   : > { %v261_v27 = vor.u32 %v260_v19, %v257_v18  ;;  %v271_v28 = vor.u32 %v270_v21, %v266_v20  ;;  %v1257_v30 = vshll.u32 %v3844_v16, 16  ;;  %v1240_v33 = vrot.slane %v1238_v23, 4  ;;  %v3877_v44 = vld [vmem:[%s3823_s9 + $0x14] sm:$0x1]  ;;  %v3032_v55 = vld [vmem:[%s3823_s9 + $0x18] sm:$0xf] }
  0x1d   : > { %v1243_v34 = vrot.slane %v1241_v24, 5  ;;  %v1249_v35 = vrot.slane %v1247_v25, 5  ;;  %v1253_v40 = vrot.slane %v1251_v29, 4  ;;  %v279_v45 = vshrl.u32 %v3858_v31, 16  ;;  %v3890_v60 = vld [vmem:[%s3823_s9 + $0x1c] sm:$0xf] }
  0x1e   : > { %v262_v38 = vrot.slane %v261_v27, 4  ;;  %v272_v39 = vrot.slane %v271_v28, 4  ;;  %v1259_v43 = vrot.slane %v1257_v30, 5  ;;  %v282_v46 = vshll.u32 %v3858_v31, 16  ;;  %v3898_v1 = vld [vmem:[%s3823_s9 + $0x20] sm:$0x1] }
  0x1f   : > { %v1244_v42 = vor.u32 %v1243_v34, %v1240_v33  ;;  %v1254_v49 = vor.u32 %v1253_v40, %v1249_v35  ;;  %v288_v50 = vshll.u32 %v3867_v36, 16  ;;  %v281_v53 = vrot.slane %v279_v45, 4  ;;  %v3906_v21 = vld [vmem:[%s3823_s9 + $0x18] sm:$0xf]  ;;  %v3913_v27 = vld [vmem:[%s3823_s9 + $0x1c] sm:$0xf] }
  0x20   : > { %v267_v47 = vsel %vm3862_vm4, %v262_v38, %v266_v20  ;;  %v277_v48 = vsel %vm3862_vm4, %v272_v39, %v276_v22  ;;  %v284_v54 = vrot.slane %v282_v46, 5  ;;  %v292_v58 = vshrl.u32 %v3867_v36, 16  ;;  %v3921_v38 = vld [vmem:[%s3823_s9 + $0x20] sm:$0x1]  ;;  %s4795_s29 = smov (!%p214_p6, %s2930_s29), 31 }
  0x21   : > { %v2937_v51 = vcombine.low %v267_v47, %v277_v48  ;;  %v1245_v52 = vrot.slane %v1244_v42, 4  ;;  %v1255_v56 = vrot.slane %v1254_v49, 4  ;;  %v290_v57 = vrot.slane %v288_v50, 5  ;;  %v3035_v47 = vld [vmem:[%s3823_s9 + $0x24] sm:$0xf]  ;;  %s217_s7 = sadd.s32 %s2931_s30, %s4795_s29 }
  0x22   : > { %v298_v59 = vshll.u32 %v3877_v44, 16  ;;  %v1629_v62 = vrot.slane %v3841_v15, 5  ;;  %v1632_v63 = vrot.slane %v3844_v16, 5  ;;  %v285_v0 = vor.u32 %v284_v54, %v281_v53  ;;  %s2932_s15 = sshll.u32 %s217_s7, 2 }
  0x23   : > { %3332 = vmatprep.mubr.msk.bf16.mxu1 %vm472_vm3, %v2937_v51  ;;  %v1250_v61 = vsel %vm3862_vm4, %v1245_v52, %v1249_v35  ;;  %v1260_v2 = vsel %vm3862_vm4, %v1255_v56, %v1259_v43  ;;  %v294_v4 = vrot.slane %v292_v58, 4  ;;  %v1262_v9 = vshrl.u32 %v3032_v55, 16  ;;  %v3931_v52 = vld [vmem:[%s3823_s9 + $0x28] sm:$0xf]  ;;  %s4681_s11 = scalar_lea.vmem %s4759_s4, %s2932_s15 }
  0x24   : > { %v300_v5 = vrot.slane %v298_v59, 5  ;;  %v3054_v10 = vcombine.low %v1250_v61, %v1260_v2  ;;  %v286_v11 = vrot.slane %v285_v0, 4  ;;  %v1265_v12 = vshll.u32 %v3032_v55, 16  ;;  %v3943_v61 = vld [vmem:[%s3823_s9 + $0x2c] sm:$0x1] }
  0x25   : > { %v1271_v13 = vshll.u32 %v3890_v60, 16  ;;  %v295_v14 = vor.u32 %v294_v4, %v290_v57  ;;  %v1264_v18 = vrot.slane %v1262_v9, 4  ;;  %v1275_v19 = vshrl.u32 %v3890_v60, 16 }
  0x26   : > { %v1281_v20 = vshll.u32 %v3898_v1, 16  ;;  %3404 = vmatprep.mubr.msk.bf16.mxu0 %vm472_vm3, %v3054_v10  ;;  %v291_v22 = vsel %vm3862_vm4, %v286_v11, %v290_v57  ;;  %v1267_v23 = vrot.slane %v1265_v12, 5  ;;  %v1636_v25 = vrot.slane %v3890_v60, 5  ;;  %v3937_v57 = vld [vmem:[%s4756_s1 + $0x4] sm:$0x3] }
  0x27   : > { %v1273_v24 = vrot.slane %v1271_v13, 5  ;;  %v296_v28 = vrot.slane %v295_v14, 4  ;;  %v1277_v29 = vrot.slane %v1275_v19, 4  ;;  %v1639_v33 = vrot.slane %v3898_v1, 5  ;;  %v3950_v11 = vld [vmem:[%s3823_s9 + $0x24] sm:$0xf] }
  0x28   : > { %v1283_v30 = vrot.slane %v1281_v20, 5  ;;  %v1268_v34 = vor.u32 %v1267_v23, %v1264_v18  ;;  %v3918_v35 = vrot.slane %v1636_v25, 4  ;;  %v303_v39 = vshrl.u32 %v3906_v21, 16  ;;  %v3953_v19 = vld [vmem:[%s3823_s9 + $0x28] sm:$0xf] }
  0x29   : > { %v306_v40 = vshll.u32 %v3906_v21, 16  ;;  %v301_v42 = vsel %vm3862_vm4, %v296_v28, %v300_v5  ;;  %v1278_v43 = vor.u32 %v1277_v29, %v1273_v24  ;;  %v312_v45 = vshll.u32 %v3913_v27, 16  ;;  %v3963_v29 = vld [vmem:[%s3823_s9 + $0x2c] sm:$0x1] }
  0x2a   : > { %v316_v46 = vshrl.u32 %v3913_v27, 16  ;;  %v2938_v48 = vcombine.low %v291_v22, %v301_v42  ;;  %v1269_v49 = vrot.slane %v1268_v34, 4  ;;  %v305_v50 = vrot.slane %v303_v39, 4 }
  0x2b   : > { %v308_v51 = vrot.slane %v306_v40, 5  ;;  %v1279_v53 = vrot.slane %v1278_v43, 4  ;;  %v314_v54 = vrot.slane %v312_v45, 5  ;;  %v322_v56 = vshll.u32 %v3921_v38, 16  ;;  %v3038_v45 = vld [vmem:[%s3823_s9 + $0x30] sm:$0xf] }
  0x2c   : > { %v318_v55 = vrot.slane %v316_v46, 4  ;;  %3333 = vmatmul.mubr.msk.bf16.vlgmr.msra.gmra.mrb[0].mxu1 %vm472_vm3, %v2938_v48  ;;  %v1274_v58 = vsel %vm3862_vm4, %v1269_v49, %v1273_v24  ;;  %v1286_v0 = vshrl.u32 %v3035_v47, 16  ;;  %v1289_v2 = vshll.u32 %v3035_v47, 16 }
  0x2d   : > { %v309_v59 = vor.u32 %v308_v51, %v305_v50  ;;  %3349 = vmatpush3.bf16.msra.mxu1 %v3847_v17  ;;  %v1284_v4 = vsel %vm3862_vm4, %v1279_v53, %v1283_v30  ;;  %v324_v9 = vrot.slane %v322_v56, 5  ;;  %v1295_v10 = vshll.u32 %v3931_v52, 16  ;;  %v3973_v50 = vld [vmem:[%s3823_s9 + $0x34] sm:$0xf] }
  0x2e   : > { %v319_v5 = vor.u32 %v318_v55, %v314_v54  ;;  %v3055_v12 = vcombine.low %v1274_v58, %v1284_v4  ;;  %v1288_v14 = vrot.slane %v1286_v0, 4  ;;  %v1291_v18 = vrot.slane %v1289_v2, 5  ;;  %3624 = vmatprep.subr.msk.bf16.mxu1 %vm497_vm0, %v3937_v57  ;;  %v3983_v58 = vld [vmem:[%s3823_s9 + $0x38] sm:$0x1] }
  0x2f   : > { %v310_v13 = vrot.slane %v309_v59, 4  ;;  %v1297_v20 = vrot.slane %v1295_v10, 5  ;;  %v1299_v22 = vshrl.u32 %v3931_v52, 16  ;;  %v1305_v23 = vshll.u32 %v3943_v61, 16 }
  0x30   : > { %v320_v17 = vrot.slane %v319_v5, 4  ;;  %3405 = vmatmul.mubr.msk.bf16.vlgmr.msra.gmra.mrb[0].mxu0 %vm472_vm3, %v3055_v12  ;;  %v1292_v28 = vor.u32 %v1291_v18, %v1288_v14  ;;  %v327_v30 = vshrl.u32 %v3950_v11, 16  ;;  %v330_v34 = vshll.u32 %v3950_v11, 16  ;;  %v3988_v14 = vld [vmem:[%s3823_s9 + $0x30] sm:$0xf] }
  0x31   : > { %v315_v24 = vsel %vm3862_vm4, %v310_v13, %v314_v54  ;;  %3421 = vmatpush3.bf16.msra.mxu0 %v3870_v37  ;;  %v1301_v40 = vrot.slane %v1299_v22, 4  ;;  %v1307_v42 = vrot.slane %v1305_v23, 5  ;;  %v336_v43 = vshll.u32 %v3953_v19, 16  ;;  %v3994_v23 = vld [vmem:[%s3823_s9 + $0x34] sm:$0xf] }
  0x32   : > { %v325_v39 = vsel %vm3862_vm4, %v320_v17, %v324_v9  ;;  %v1293_v47 = vrot.slane %v1292_v28, 4  ;;  %v329_v48 = vrot.slane %v327_v30, 4  ;;  %v332_v49 = vrot.slane %v330_v34, 5  ;;  %3629 = vmatprep.subr.msk.bf16.mxu0 %vm497_vm0, %v3853_v26 }
  0x33   : > { %v2939_v46 = vcombine.low %v315_v24, %v325_v39  ;;  %v1302_v37 = vor.u32 %v1301_v40, %v1297_v20  ;;  %v338_v51 = vrot.slane %v336_v43, 5  ;;  %v340_v53 = vshrl.u32 %v3953_v19, 16  ;;  %v3999_v39 = vld [vmem:[%s3823_s9 + $0x38] sm:$0x1] }
  0x34   : > { %v346_v54 = vshll.u32 %v3963_v29, 16  ;;  %v1298_v55 = vsel %vm3862_vm4, %v1293_v47, %v1297_v20  ;;  %v333_v56 = vor.u32 %v332_v49, %v329_v48  ;;  %v1310_v59 = vshrl.u32 %v3038_v45, 16 }
  0x35   : > { %3336 = vmatprep.mubr.msk.bf16.mxu1 %vm472_vm3, %v2939_v46  ;;  %v1313_v0 = vshll.u32 %v3038_v45, 16  ;;  %v1303_v2 = vrot.slane %v1302_v37, 4  ;;  %v342_v26 = vrot.slane %v340_v53, 4  ;;  %v1319_v5 = vshll.u32 %v3973_v50, 16  ;;  %v3070_v37 = vld [vmem:[%s3823_s9 + $0xc] sm:$0xe] }
  0x36   : > { %v348_v4 = vrot.slane %v346_v54, 5  ;;  %v334_v9 = vrot.slane %v333_v56, 4  ;;  %v1312_v10 = vrot.slane %v1310_v59, 4  ;;  %v1323_v13 = vshrl.u32 %v3973_v50, 16  ;;  %v4011_v56 = vld [vmem:[%s3823_s9 + $0x3c] sm:$0xf] }
  0x37   : > { %v1315_v12 = vrot.slane %v1313_v0, 5  ;;  %v1308_v18 = vsel %vm3862_vm4, %v1303_v2, %v1307_v42  ;;  %v343_v17 = vor.u32 %v342_v26, %v338_v51  ;;  %v1321_v20 = vrot.slane %v1319_v5, 5 }
  0x38   : > { %v1329_v22 = vshll.u32 %v3983_v58, 16  ;;  %v3056_v24 = vcombine.low %v1298_v55, %v1308_v18  ;;  %v339_v28 = vsel %vm3862_vm4, %v334_v9, %v338_v51  ;;  %v1325_v34 = vrot.slane %v1323_v13, 4  ;;  %v4025_v18 = vld [vmem:[%s3823_s9 + $0x44] sm:$0x1] }
  0x39   : > { %v1316_v30 = vor.u32 %v1315_v12, %v1312_v10  ;;  %v344_v40 = vrot.slane %v343_v17, 4  ;;  %v351_v42 = vshrl.u32 %v3988_v14, 16  ;;  %v354_v45 = vshll.u32 %v3988_v14, 16  ;;  %v3071_v17 = vld [vmem:[%s3823_s9 + $0x18] sm:$0xe] }
  0x3a   : > { %v1331_v43 = vrot.slane %v1329_v22, 5  ;;  %3408 = vmatprep.mubr.msk.bf16.mxu0 %vm472_vm3, %v3056_v24  ;;  %v1326_v47 = vor.u32 %v1325_v34, %v1321_v20  ;;  %v360_v48 = vshll.u32 %v3994_v23, 16  ;;  %v364_v49 = vshrl.u32 %v3994_v23, 16 }
  0x3b   : > { %v1317_v46 = vrot.slane %v1316_v30, 4  ;;  %v349_v51 = vsel %vm3862_vm4, %v344_v40, %v348_v4  ;;  %v353_v53 = vrot.slane %v351_v42, 4  ;;  %v356_v54 = vrot.slane %v354_v45, 5  ;;  %v4022_v4 = vld [vmem:[%s3823_s9 + $0x40] sm:$0xf] }
  0x3c   : > { %v370_v55 = vshll.u32 %v3999_v39, 16  ;;  %v2940_v59 = vcombine.low %v339_v28, %v349_v51  ;;  %v1327_v2 = vrot.slane %v1326_v47, 4  ;;  %v362_v26 = vrot.slane %v360_v48, 5  ;;  %v4036_v30 = vld [vmem:[%s3823_s9 + $0x48] sm:$0xf] }
  0x3d   : > { %v1322_v0 = vsel %vm3862_vm4, %v1317_v46, %v1321_v20  ;;  %v357_v9 = vor.u32 %v356_v54, %v353_v53  ;;  %v366_v10 = vrot.slane %v364_v49, 4  ;;  %v3078_v13 = vrot.slane %v3070_v37, 9 }
  0x3e   : > { %v372_v12 = vrot.slane %v370_v55, 5  ;;  %3337 = vmatmul.mubr.msk.bf16.gmra.mrb[4].mxu1 %vm472_vm3, %v2940_v59  ;;  %v1332_v20 = vsel %vm3862_vm4, %v1327_v2, %v1331_v43  ;;  %v1631_v22 = vrot.slane %v1629_v62, 4  ;;  %v375_v24 = vshrl.u32 %v4011_v56, 16  ;;  %v4056_v55 = vld [vmem:[%s3823_s9 + $0x50] sm:$0x1] }
  0x3f   : > { %v378_v28 = vshll.u32 %v4011_v56, 16  ;;  %v3057_v34 = vcombine.low %v1322_v0, %v1332_v20  ;;  %v358_v40 = vrot.slane %v357_v9, 4  ;;  %v367_v42 = vor.u32 %v366_v10, %v362_v26 }
  0x40   : > { %v1630_v45 = vsel %vm4017_vm7, %v3078_v13, %v1629_v62  ;;  %v1633_v43 = vsel %vm4017_vm7, %v1631_v22, %v1632_v63  ;;  %v377_v46 = vrot.slane %v375_v24, 4  ;;  %v384_v48 = vshll.u32 %v4022_v4, 16  ;;  %v4052_v62 = vld [vmem:[%s3823_s9 + $0x4c] sm:$0xf] }
  0x41   : > { %v380_v47 = vrot.slane %v378_v28, 5  ;;  %3409 = vmatmul.mubr.msk.bf16.gmra.mrb[4].mxu0 %vm472_vm3, %v3057_v34  ;;  %v363_v49 = vsel %vm3862_vm4, %v358_v40, %v362_v26  ;;  %v368_v37 = vrot.slane %v367_v42, 4  ;;  %v3087_v15 = vcombine.low %v1630_v45, %v1633_v43  ;;  %v4074_v28 = vld [vmem:[%s3823_s9 + $0x54] sm:$0xf]  ;;  %v4085_v34 = vld [vmem:[%s4756_s1 + $0xe] sm:$0x3] }
  0x42   : > { %v388_v51 = vshrl.u32 %v4022_v4, 16  ;;  %v386_v53 = vrot.slane %v384_v48, 5  ;;  %v394_v63 = vshll.u32 %v4025_v18, 16  ;;  %v3079_v54 = vrot.slane %v3071_v17, 9 }
  0x43   : > { %v381_v16 = vor.u32 %v380_v47, %v377_v46  ;;  %v373_v59 = vsel %vm3862_vm4, %v368_v37, %v372_v12  ;;  %3422 = vmatprep.mubr.msk.bf16.mxu0 %vm472_vm3, %v3087_v15  ;;  %v1640_v2 = vsel %vm4017_vm7, %v3918_v35, %v1639_v33  ;;  %v399_v26 = vshrl.u32 %v4036_v30, 16  ;;  %v3072_v12 = vld [vmem:[%s3823_s9 + $0x24] sm:$0xe]  ;;  %v4090_v37 = vld [vmem:[%s3823_s9 + $0x58] sm:$0xf] }
  0x44   : > { %v390_v0 = vrot.slane %v388_v51, 4  ;;  %v2941_v9 = vcombine.low %v363_v49, %v373_v59  ;;  %v396_v13 = vrot.slane %v394_v63, 5  ;;  %v1637_v17 = vsel %vm4017_vm7, %v3079_v54, %v1636_v25  ;;  %v4099_v54 = vld [vmem:[%s3823_s9 + $0x5c] sm:$0x1] }
  0x45   : > { %v382_v10 = vrot.slane %v381_v16, 4  ;;  %v3088_v22 = vcombine.low %v1637_v17, %v1640_v2  ;;  %v401_v24 = vrot.slane %v399_v26, 4  ;;  %v402_v1 = vshll.u32 %v4036_v30, 16 }
  0x46   : > { %v391_v20 = vor.u32 %v390_v0, %v386_v53  ;;  %3340 = vmatprep.mubr.msk.bf16.mxu1 %vm472_vm3, %v2941_v9  ;;  %v408_v35 = vshll.u32 %v4052_v62, 16  ;;  %v412_v60 = vshrl.u32 %v4052_v62, 16  ;;  %v418_v25 = vshll.u32 %v4056_v55, 16 }
  0x47   : > { %v387_v33 = vsel %vm3862_vm4, %v382_v10, %v386_v53  ;;  %v404_v42 = vrot.slane %v402_v1, 5  ;;  %v3080_v45 = vrot.slane %v3072_v12, 9  ;;  %v1643_v43 = vrot.slane %v3931_v52, 5  ;;  %v3073_v10 = vld [vmem:[%s3823_s9 + $0x30] sm:$0xe] }
  0x48   : > { %v392_v40 = vrot.slane %v391_v20, 4  ;;  %v410_v46 = vrot.slane %v408_v35, 5  ;;  %v414_v47 = vrot.slane %v412_v60, 4  ;;  %v420_v48 = vrot.slane %v418_v25, 5 }
  0x49   : > { %v1646_v49 = vrot.slane %v3943_v61, 5  ;;  %3423 = vmatmul.mubr.msk.bf16.vlgmr.msra.gmra.mrb[0].mxu0 %vm472_vm3, %v3088_v22  ;;  %v405_v51 = vor.u32 %v404_v42, %v401_v24  ;;  %v1644_v16 = vsel %vm4017_vm7, %v3080_v45, %v1643_v43  ;;  %v1645_v53 = vrot.slane %v1643_v43, 4  ;;  %v4120_v42 = vld [vmem:[%s3823_s9 + $0x40] sm:$0xf]  ;;  %v4123_v45 = vld [vmem:[%s3823_s9 + $0x44] sm:$0x1] }
  0x4a   : > { %v397_v15 = vsel %vm3862_vm4, %v392_v40, %v396_v13  ;;  %3439 = vmatpush3.bf16.msra.mxu0 %v3874_v41  ;;  %v415_v52 = vor.u32 %v414_v47, %v410_v46  ;;  %v423_v61 = vshrl.u32 %v4074_v28, 16  ;;  %v426_v59 = vshll.u32 %v4074_v28, 16 }
  0x4b   : > { %v2942_v63 = vcombine.low %v387_v33, %v397_v15  ;;  %v406_v0 = vrot.slane %v405_v51, 4  ;;  %v1647_v2 = vsel %vm4017_vm7, %v1645_v53, %v1646_v49  ;;  %v432_v26 = vshll.u32 %v4090_v37, 16  ;;  %3630 = vmatprep.subr.msk.bf16.mxu0 %vm497_vm0, %v4085_v34  ;;  %v3074_v33 = vld [vmem:[%s3823_s9 + $0x3c] sm:$0xe] }
  0x4c   : > { %v436_v9 = vshrl.u32 %v4090_v37, 16  ;;  %v416_v41 = vrot.slane %v415_v52, 4  ;;  %v3089_v13 = vcombine.low %v1644_v16, %v1647_v2  ;;  %v425_v17 = vrot.slane %v423_v61, 4  ;;  %v3075_v2 = vld [vmem:[%s3823_s9 + $0x48] sm:$0xe] }
  0x4d   : > { %3341 = vmatmul.mubr.msk.bf16.gmra.mrb[8].mxu1 %vm472_vm3, %v2942_v63  ;;  %v428_v12 = vrot.slane %v426_v59, 5  ;;  %v411_v20 = vsel %vm3862_vm4, %v406_v0, %v410_v46  ;;  %v434_v22 = vrot.slane %v432_v26, 5  ;;  %v442_v1 = vshll.u32 %v4099_v54, 16  ;;  %v4138_v59 = vld [vmem:[%s3823_s9 + $0x4c] sm:$0xf] }
  0x4e   : > { %v438_v24 = vrot.slane %v436_v9, 4  ;;  %v421_v35 = vsel %vm3862_vm4, %v416_v41, %v420_v48  ;;  %3426 = vmatprep.mubr.msk.bf16.mxu0 %vm472_vm3, %v3089_v13  ;;  %v3081_v25 = vrot.slane %v3073_v10, 9  ;;  %v1650_v40 = vrot.slane %v3973_v50, 5  ;;  %v4141_v0 = vld [vmem:[%s3823_s9 + $0x50] sm:$0x1] }
  0x4f   : > { %v429_v60 = vor.u32 %v428_v12, %v425_v17  ;;  %v2943_v43 = vcombine.low %v411_v20, %v421_v35  ;;  %v444_v47 = vrot.slane %v442_v1, 5  ;;  %v1653_v49 = vrot.slane %v3983_v58, 5  ;;  %v4149_v17 = vld [vmem:[%s3823_s9 + $0x58] sm:$0xf]  ;;  %v4152_v12 = vld [vmem:[%s3823_s9 + $0x5c] sm:$0x1] }
  0x50   : > { %v439_v46 = vor.u32 %v438_v24, %v434_v22  ;;  %v1651_v48 = vsel %vm4017_vm7, %v3081_v25, %v1650_v40  ;;  %v1652_v51 = vrot.slane %v1650_v40, 4  ;;  %v3082_v16 = vrot.slane %v3074_v33, 9  ;;  %4769 = vst [vmem:[#allocation2_spill] sm:$0xff] %v4152_v12  ;;  %v4162_v35 = vld [vmem:[%s3823_s9 + $0x64] sm:$0xf] }
  0x51   : > { %v430_v15 = vrot.slane %v429_v60, 4  ;;  %3344 = vmatprep.mubr.msk.bf16.mxu1 %vm472_vm3, %v2943_v43  ;;  %v1657_v53 = vrot.slane %v4120_v42, 5  ;;  %v1660_v63 = vrot.slane %v4123_v45, 5  ;;  %v2953_v61 = vcombine.low %v3826_v6, %v3829_v7  ;;  %v3076_v6 = vld [vmem:[%s3823_s9 + $0x54] sm:$0xe]  ;;  %4770 = vst [vmem:[#allocation3_spill] sm:$0xff] %v4162_v35 }
  0x52   : > { %v440_v50 = vrot.slane %v439_v46, 4  ;;  %v1654_v58 = vsel %vm4017_vm7, %v1652_v51, %v1653_v49  ;;  %v1664_v24 = vrot.slane %v4138_v59, 5  ;;  %v1667_v1 = vrot.slane %v4141_v0, 5  ;;  %v4165_v60 = vld [vmem:[%s3823_s9 + $0x68] sm:$0x1] }
  0x53   : > { %v435_v52 = vsel %vm3862_vm4, %v430_v15, %v434_v22  ;;  %v3090_v9 = vcombine.low %v1651_v48, %v1654_v58  ;;  %v1658_v10 = vsel %vm4017_vm7, %v3082_v16, %v1657_v53  ;;  %v1659_v41 = vrot.slane %v1657_v53, 4  ;;  %4771 = vst [vmem:[#allocation4_spill] sm:$0xff] %v4165_v60 }
  0x54   : > { %v445_v26 = vsel %vm3862_vm4, %v440_v50, %v444_v47  ;;  %v3083_v22 = vrot.slane %v3075_v2, 9  ;;  %v1666_v40 = vrot.slane %v1664_v24, 4  ;;  %v3084_v43 = vrot.slane %v3076_v6, 9  ;;  %v3077_v47 = vld [vmem:[%s3823_s9 + $0x60] sm:$0xe] }
  0x55   : > { %v2944_v13 = vcombine.low %v435_v52, %v445_v26  ;;  %3427 = vmatmul.mubr.msk.bf16.gmra.mrb[4].mxu0 %vm472_vm3, %v3090_v9  ;;  %v1661_v20 = vsel %vm4017_vm7, %v1659_v41, %v1660_v63  ;;  %v1671_v46 = vrot.slane %v4149_v17, 5  ;;  %v798_v49 = vrot.slane %v3867_v36, 5  ;;  %v764_v2 = vld [vmem:[%s3823_s9 + $0x18] sm:$0xe]  ;;  %v4197_v6 = vld [vmem:[%s4756_s1 + $0x6] sm:$0x3] }
  0x56   : > { %v3091_v33 = vcombine.low %v1658_v10, %v1661_v20  ;;  %v1665_v25 = vsel %vm4017_vm7, %v3083_v22, %v1664_v24  ;;  %v1674_v15 = vrot.slane %v4152_v12, 5  ;;  %v1668_v48 = vsel %vm4017_vm7, %v1666_v40, %v1667_v1  ;;  %v766_v1 = vld [vmem:[%s3823_s9 + $0x30] sm:$0xe] }
  0x57   : > { %3345 = vmatmul.mubr.msk.bf16.gmra.mrb[12].mxu1 %vm472_vm3, %v2944_v13  ;;  %v1672_v51 = vsel %vm4017_vm7, %v3084_v43, %v1671_v46  ;;  %v1673_v16 = vrot.slane %v1671_v46, 4  ;;  %v1678_v50 = vrot.slane %v4162_v35, 5  ;;  %v2954_v53 = vcombine.low %v3858_v31, %v3867_v36  ;;  %v765_v36 = vld [vmem:[%s3823_s9 + $0x24] sm:$0xe]  ;;  %v4471_v12 = vld [vmem:[%s3823_s9 + $0x70] sm:$0xf] }
  0x58   : > { %3350 = vmatprep.mubr.msk.bf16.mxu1 %vm472_vm3, %v2953_v61  ;;  %3430 = vmatprep.mubr.msk.bf16.mxu0 %vm472_vm3, %v3091_v33  ;;  %v3092_v63 = vcombine.low %v1665_v25, %v1668_v48  ;;  %v3085_v52 = vrot.slane %v3077_v47, 9  ;;  %v1681_v58 = vrot.slane %v4165_v60, 5  ;;  %v763_v61 = vld [vmem:[%s3823_s9 + $0xc] sm:$0xe]  ;;  %v801_v26 = vrot.slane %v3877_v44, 5 }
  0x59   : > { %v2955_v9 = vcombine.low %v3906_v21, %v3913_v27  ;;  %v1675_v10 = vsel %vm4017_vm7, %v1673_v16, %v1674_v15  ;;  %v1680_v41 = vrot.slane %v1678_v50, 4  ;;  %v896_v13 = vsel %vm497_vm0, %v3937_v57, 0  ;;  %v3678_v16 = vld [vmem:[%s3823_s9 + $0x18] sm:$0xff]   ;;  %v4443_v60 = vld [vmem:[%s3823_s9 + $0x64] sm:$0xf] }
  0x5a   : > { %v3093_v31 = vcombine.low %v1672_v51, %v1675_v10  ;;  %v2970_v44 = vrot.slane %v763_v61, 9  ;;  %v800_v20 = vrot.slane %v798_v49, 4  ;;  %v2971_v21 = vrot.slane %v764_v2, 9  ;;  %4772 = vst [vmem:[#allocation5_spill] sm:$0xff] %v4443_v60 }
  0x5b   : > { %v1679_v22 = vsel %vm4017_vm7, %v3085_v52, %v1678_v50  ;;  %v1682_v57 = vsel %vm4017_vm7, %v1680_v41, %v1681_v58  ;;  %v805_v24 = vrot.slane %v3913_v27, 5  ;;  %v808_v40 = vrot.slane %v3921_v38, 5 }
  0x5c   : > { %v4210_v33 = vsel %vm4017_vm7, %v2970_v44, %v798_v49  ;;  %v4214_v25 = vsel %vm4017_vm7, %v800_v20, %v801_v26  ;;  %v2972_v43 = vrot.slane %v765_v36, 9  ;;  %v3094_v49 = vcombine.low %v1679_v22, %v1682_v57  ;;  %v3138_v26 = vld [vmem:[%s3823_s9 + $0x18] sm:$0xf]  ;;  %v3680_v57 = vld [vmem:[%s3823_s9 + $0x24] sm:$0xff]  }
  0x5d   : > { %3431 = vmatmul.mubr.msk.bf16.gmra.mrb[8].mxu0 %vm472_vm3, %v3092_v63  ;;  %v2979_v27 = vcombine.low %v4210_v33, %v4214_v25  ;;  %v4223_v46 = vsel %vm4017_vm7, %v2971_v21, %v805_v24  ;;  %v807_v47 = vrot.slane %v805_v24, 4  ;;  %v812_v15 = vrot.slane %v3953_v19, 5 }
  0x5e   : > { %3434 = vmatprep.mubr.msk.bf16.mxu0 %vm472_vm3, %v3093_v31  ;;  %v815_v48 = vrot.slane %v3963_v29, 5  ;;  %v2973_v38 = vrot.slane %v766_v1, 9  ;;  %v2956_v51 = vcombine.low %v3950_v11, %v3953_v19  ;;  %v822_v63 = vrot.slane %v3999_v39, 5  ;;  %v767_v19 = vld [vmem:[%s3823_s9 + $0x3c] sm:$0xe] }
  0x5f   : > { %3351 = vmatmul.mubr.msk.bf16.vlgmr.msra.gmra.mrb[0].mxu1 %vm472_vm3, %v2954_v53  ;;  %v4232_v50 = vsel %vm4017_vm7, %v807_v47, %v808_v40  ;;  %v819_v53 = vrot.slane %v3994_v23, 5  ;;  %v2957_v52 = vcombine.low %v3988_v14, %v3994_v23  ;;  %v4242_v58 = vsel %vm4017_vm7, %v2972_v43, %v812_v15  ;;  %v762_v14 = vld [vmem:[%s3823_s9] sm:$0xe]  ;;  %v4270_v31 = vld [vmem:[%s3823_s9 + $0x1c] sm:$0xf] }
  0x60   : > { %3367 = vmatpush3.bf16.msra.mxu1 %v896_v13  ;;  %3354 = vmatprep.mubr.msk.bf16.mxu1 %vm472_vm3, %v2955_v9  ;;  %v2980_v29 = vcombine.low %v4223_v46, %v4232_v50  ;;  %v814_v11 = vrot.slane %v812_v15, 4  ;;  %v791_v61 = vrot.slane %v3829_v7, 5  ;;  %v2974_v10 = vrot.slane %v767_v19, 9  ;;  %v768_v1 = vld [vmem:[%s3823_s9 + $0x48] sm:$0xe] }
  0x61   : > { %3625 = vmatprep.subr.msk.bf16.mxu1 %vm497_vm0, %v4197_v6  ;;  %v4248_v2 = vsel %vm4017_vm7, %v2973_v38, %v819_v53  ;;  %v821_v39 = vrot.slane %v819_v53, 4  ;;  %v794_v41 = vrot.slane %v3832_v8, 5  ;;  %v2969_v36 = vrot.slane %v762_v14, 9  ;;  %v4296_v38 = vld [vmem:[%s4756_s1 + $0x10] sm:$0x3] }
  0x62   : > { %v4254_v23 = vsel %vm4017_vm7, %v814_v11, %v815_v48  ;;  %v793_v44 = vrot.slane %v791_v61, 4  ;;  %v826_v20 = vrot.slane %v4022_v4, 5  ;;  %v829_v21 = vrot.slane %v4025_v18, 5  ;;  %v4317_v14 = vld [vmem:[%s3823_s9 + $0x28] sm:$0xf] }
  0x63   : > { %v4263_v9 = vsel %vm4017_vm7, %v821_v39, %v822_v63  ;;  %v2958_v22 = vcombine.low %v4011_v56, %v4022_v4  ;;  %v2076_v24 = vshrl.u32 %v3138_v26, 16  ;;  %v2079_v8 = vshll.u32 %v3138_v26, 16  ;;  %v3682_v4 = vld [vmem:[%s3823_s9 + $0x30] sm:$0xff]   ;;  %v4419_v46 = vld [vmem:[%s3823_s9 + $0x44] sm:$0x1] }
  0x64   : > { %v2085_v40 = vshll.u32 %v4270_v31, 16  ;;  %v2089_v43 = vshrl.u32 %v4270_v31, 16  ;;  %v4282_v47 = vsel %vm4017_vm7, %v2974_v10, %v826_v20  ;;  %v2318_v18 = vsel %vm497_vm0, %v4085_v34, 0  ;;  %v3156_v7 = vld [vmem:[%s3823_s9 + $0x60] sm:$0xf] }
  0x65   : > { %3435 = vmatmul.mubr.msk.bf16.gmra.mrb[12].mxu0 %vm472_vm3, %v3094_v49  ;;  %v828_v49 = vrot.slane %v826_v20, 4  ;;  %v2959_v56 = vcombine.low %v4036_v30, %v4052_v62  ;;  %v792_v15 = vsel %vm4017_vm7, %v2969_v36, %v791_v61  ;;  %v795_v48 = vsel %vm4017_vm7, %v793_v44, %v794_v41  ;;  %v4304_v30 = vld [vmem:[%s3823_s9 + $0x20] sm:$0x1]  ;;  %v3141_v61 = vld [vmem:[%s3823_s9 + $0x24] sm:$0xf] }
  0x66   : > { %3440 = vmatprep.mubr.msk.bf16.mxu0 %vm472_vm3, %v3678_v16  ;;  %v2975_v34 = vrot.slane %v768_v1, 9  ;;  %v2078_v16 = vrot.slane %v2076_v24, 4  ;;  %v2081_v53 = vrot.slane %v2079_v8, 5  ;;  %v4310_v11 = vrot.slane %v2085_v40, 5  ;;  %v769_v44 = vld [vmem:[%s3823_s9 + $0x54] sm:$0xe] }
  0x67   : > { %3355 = vmatmul.mubr.msk.bf16.gmra.mrb[4].mxu1 %vm472_vm3, %v2956_v51  ;;  %v4300_v51 = vsel %vm4017_vm7, %v828_v49, %v829_v21  ;;  %v2091_v19 = vrot.slane %v2089_v43, 4  ;;  %v836_v39 = vrot.slane %v4056_v55, 5  ;;  %v2960_v10 = vcombine.low %v4074_v28, %v4090_v37  ;;  %v3144_v55 = vld [vmem:[%s3823_s9 + $0x30] sm:$0xf]  ;;  %v3684_v20 = vld [vmem:[%s3823_s9 + $0x3c] sm:$0xff]   ;;  %v3685_v1 = vld [vmem:[%s3823_s9 + $0x48] sm:$0xff]  }
  0x68   : > { %3358 = vmatprep.mubr.msk.bf16.mxu1 %vm472_vm3, %v2957_v52  ;;  %v833_v52 = vrot.slane %v4052_v62, 5  ;;  %v2978_v41 = vcombine.low %v792_v15, %v795_v48  ;;  %v2095_v36 = vshll.u32 %v4304_v30, 16  ;;  %v2082_v21 = vor.u32 %v2081_v53, %v2078_v16  ;;  %v4336_v8 = vld [vmem:[%s3823_s9 + $0x34] sm:$0xf] }
  0x69   : > { %v2092_v28 = vor.u32 %v2091_v19, %v4310_v11  ;;  %v2109_v40 = vshll.u32 %v4317_v14, 16  ;;  %v2113_v43 = vshrl.u32 %v4317_v14, 16  ;;  %v840_v15 = vrot.slane %v4090_v37, 5 }
  0x6a   : > { %v4321_v62 = vsel %vm4017_vm7, %v2975_v34, %v833_v52  ;;  %v835_v26 = vrot.slane %v833_v52, 4  ;;  %v2133_v48 = vshll.u32 %v4336_v8, 16  ;;  %v2137_v34 = vshrl.u32 %v4336_v8, 16 }
  0x6b   : > { %v843_v16 = vrot.slane %v4099_v54, 5  ;;  %v2083_v53 = vrot.slane %v2082_v21, 4  ;;  %v2097_v52 = vrot.slane %v2095_v36, 5  ;;  %v2093_v37 = vrot.slane %v2092_v28, 4  ;;  %v4359_v36 = vld [vmem:[%s3823_s9 + $0x2c] sm:$0x1] }
  0x6c   : > { %v4333_v24 = vsel %vm4017_vm7, %v835_v26, %v836_v39  ;;  %v4355_v26 = vrot.slane %v2109_v40, 5  ;;  %v4366_v21 = vld [vmem:[%s3823_s9 + $0x38] sm:$0x1]  ;;  %v1098_v28 = vsel %vm497_vm0, %v4197_v6, 0 }
  0x6d   : > { %3441 = vmatmul.mubr.msk.bf16.vlgmr.msra.gmra.mrb[0].mxu0 %vm472_vm3, %v3680_v57  ;;  %v2103_v57 = vshll.u32 %v3141_v61, 16  ;;  %v3686_v40 = vld [vmem:[%s3823_s9 + $0x54] sm:$0xff]  }
  0x6e   : > { %3457 = vmatpush3.bf16.msra.mxu0 %v2318_v18  ;;  %3444 = vmatprep.mubr.msk.bf16.mxu0 %vm472_vm3, %v3682_v4  ;;  %v2124_v18 = vshrl.u32 %v3144_v55, 16  ;;  %v2976_v4 = vrot.slane %v769_v44, 9 }
  0x6f   : > { %3359 = vmatmul.mubr.msk.bf16.gmra.mrb[8].mxu1 %vm472_vm3, %v2958_v22  ;;  %3631 = vmatprep.subr.msk.bf16.mxu0 %vm497_vm0, %v4296_v38  ;;  %v2100_v22 = vshrl.u32 %v3141_v61, 16  ;;  %v842_v61 = vrot.slane %v840_v15, 4  ;;  %v2105_v54 = vrot.slane %v2103_v57, 5  ;;  %v2139_v57 = vrot.slane %v2137_v34, 4  ;;  %v3150_v34 = vld [vmem:[%s3823_s9 + $0x48] sm:$0xf] }
  0x70   : > { %3362 = vmatprep.mubr.msk.bf16.mxu1 %vm472_vm3, %v2959_v56  ;;  %v2127_v56 = vshll.u32 %v3144_v55, 16  ;;  %v4351_v19 = vsel %vm4017_vm7, %v2976_v4, %v840_v15  ;;  %v2115_v55 = vrot.slane %v2113_v43, 4  ;;  %v2126_v44 = vrot.slane %v2124_v18, 4  ;;  %v4377_v43 = vld [vmem:[%s3823_s9 + $0x40] sm:$0xf] }
  0x71   : > { %v2102_v39 = vrot.slane %v2100_v22, 4  ;;  %v4368_v22 = vrot.slane %v2133_v48, 5  ;;  %v3687_v18 = vld [vmem:[%s3823_s9 + $0x60] sm:$0xff]   ;;  %v2098_v4 = vsel %vm3862_vm4, %v2093_v37, %v2097_v52  ;;  %v2119_v48 = vshll.u32 %v4359_v36, 16 }
  0x72   : > { %v2172_v52 = vshrl.u32 %v3150_v34, 16  ;;  %v2175_v37 = vshll.u32 %v3150_v34, 16 }
  0x73   : > { %v2106_v15 = vor.u32 %v2105_v54, %v2102_v39  ;;  %v2140_v63 = vor.u32 %v2139_v57, %v4368_v22  ;;  %v3153_v57 = vld [vmem:[%s3823_s9 + $0x54] sm:$0xf] }
  0x74   : > { %v2174_v50 = vrot.slane %v2172_v52, 4  ;;  %v2199_v34 = vshll.u32 %v3153_v57, 16 }
  0x75   : > { %3445 = vmatmul.mubr.msk.bf16.gmra.mrb[4].mxu0 %vm472_vm3, %v3684_v20  ;;  %v2129_v20 = vrot.slane %v2127_v56, 5  ;;  %v2088_v56 = vsel %vm3862_vm4, %v2083_v53, %v4310_v11  ;;  %v2157_v11 = vshll.u32 %v4377_v43, 16  ;;  %v2161_v53 = vshrl.u32 %v4377_v43, 16 }
  0x76   : > { %3448 = vmatprep.mubr.msk.bf16.mxu0 %vm472_vm3, %v3685_v1  ;;  %v2143_v1 = vshll.u32 %v4366_v21, 16  ;;  %v3163_v54 = vcombine.low %v2088_v56, %v2098_v4  ;;  %v2141_v56 = vrot.slane %v2140_v63, 4  ;;  %v4424_v63 = vld [vmem:[%s3823_s9 + $0x50] sm:$0x1] }
  0x77   : > { %3363 = vmatmul.mubr.msk.bf16.gmra.mrb[12].mxu1 %vm472_vm3, %v2960_v10  ;;  %v4363_v10 = vsel %vm4017_vm7, %v842_v61, %v843_v16  ;;  %v4388_v16 = vld [vmem:[%s3823_s9 + $0x4c] sm:$0xf]  ;;  %v2116_v61 = vor.u32 %v2115_v55, %v4355_v26  ;;  %v2130_v6 = vor.u32 %v2129_v20, %v2126_v44  ;;  %v2107_v55 = vrot.slane %v2106_v15, 4 }
  0x78   : > { %3368 = vmatprep.mubr.msk.bf16.mxu1 %vm472_vm3, %v2978_v41  ;;  %v3147_v41 = vld [vmem:[%s3823_s9 + $0x3c] sm:$0xf]  ;;  %v2181_v39 = vshll.u32 %v4388_v16, 16  ;;  %v2121_v44 = vrot.slane %v2119_v48, 5  ;;  %v2185_v20 = vshrl.u32 %v4388_v16, 16  ;;  %v2145_v33 = vrot.slane %v2143_v1, 5 }
  0x79   : > { %v2148_v49 = vshrl.u32 %v3147_v41, 16  ;;  %v2151_v13 = vshll.u32 %v3147_v41, 16  ;;  %v2117_v41 = vrot.slane %v2116_v61, 4  ;;  %v4412_v15 = vrot.slane %v2157_v11, 5 }
  0x7a   : > { %v2163_v48 = vrot.slane %v2161_v53, 4  ;;  %v2196_v1 = vshrl.u32 %v3153_v57, 16  ;;  %v1367_v11 = vshll.u32 %v4138_v59, 16  ;;  %v2112_v53 = vsel %vm3862_vm4, %v2107_v55, %v4355_v26 }
  0x7b   : > { %v2150_v25 = vrot.slane %v2148_v49, 4  ;;  %v2153_v4 = vrot.slane %v2151_v13, 5  ;;  %v4421_v49 = vrot.slane %v2181_v39, 5  ;;  %v2187_v13 = vrot.slane %v2185_v20, 4 }
  0x7c   : > { %v2122_v52 = vsel %vm3862_vm4, %v2117_v41, %v2121_v44  ;;  %v2164_v57 = vor.u32 %v2163_v48, %v4412_v15  ;;  %v2146_v26 = vsel %vm3862_vm4, %v2141_v56, %v2145_v33  ;;  %v2198_v44 = vrot.slane %v2196_v1, 4  ;;  %v4462_v56 = vld [vmem:[%s3823_s9 + $0x5c] sm:$0x1] }
  0x7d   : > { %3449 = vmatmul.mubr.msk.bf16.gmra.mrb[8].mxu0 %vm472_vm3, %v3686_v40  ;;  %v2131_v40 = vrot.slane %v2130_v6, 4  ;;  %v2154_v20 = vor.u32 %v2153_v4, %v2150_v25  ;;  %v2188_v41 = vor.u32 %v2187_v13, %v4421_v49  ;;  %v4774_v33 = vcombine.low %v4248_v2, %v4263_v9 }
  0x7e   : > { %3452 = vmatprep.mubr.msk.bf16.mxu0 %vm472_vm3, %v3687_v18  ;;  %v3688_v18 = vld [vmem:[%s3823_s9 + $0x6c] sm:$0xff]   ;;  %v2220_v4 = vshrl.u32 %v3156_v7, 16  ;;  %v1371_v48 = vshrl.u32 %v4138_v59, 16  ;;  %v3164_v13 = vcombine.low %v2112_v53, %v2122_v52 }
  0x7f   : > { %3369 = vmatmul.mubr.msk.bf16.vlgmr.msra.gmra.mrb[0].mxu1 %vm472_vm3, %v2979_v27  ;;  %v4409_v27 = vld [vmem:[%s3823_s9 + $0x58] sm:$0xf]  ;;  %v2136_v39 = vsel %vm3862_vm4, %v2131_v40, %v4368_v22  ;;  %v4773_v22 = vcombine.low %v4242_v58, %v4254_v23  ;;  %v2201_v40 = vrot.slane %v2199_v34, 5  ;;  %v2223_v58 = vshll.u32 %v3156_v7, 16 }
  0x80   : > { %3385 = vmatpush3.bf16.msra.mxu1 %v1098_v28  ;;  %3372 = vmatprep.mubr.msk.bf16.mxu1 %vm472_vm3, %v2980_v29  ;;  %v3697_v28 = vld [vmem:[%s4756_s1 + $0x8] sm:$0x3]  ;;  %v2177_v29 = vrot.slane %v2175_v37, 5  ;;  %v2205_v61 = vshll.u32 %v4409_v27, 16  ;;  %v2209_v6 = vshrl.u32 %v4409_v27, 16  ;;  %v2572_v37 = vsel %vm497_vm0, %v4296_v38, 0 }
  0x81   : > { %3627 = vmatprep.subr.msk.bf16.mxu1 %vm497_vm0, %v3697_v28  ;;  %v2167_v28 = vshll.u32 %v4419_v46, 16  ;;  %v2191_v38 = vshll.u32 %v4424_v63, 16  ;;  %v2229_v23 = vshll.u32 %v4443_v60, 16  ;;  %v3165_v34 = vcombine.low %v2136_v39, %v2146_v26 }
  0x82   : > { %v2178_v55 = vor.u32 %v2177_v29, %v2174_v50  ;;  %v4455_v25 = vrot.slane %v2205_v61, 5  ;;  %v2155_v50 = vrot.slane %v2154_v20, 4  ;;  %v2165_v29 = vrot.slane %v2164_v57, 4 }
  0x83   : > { %v2169_v1 = vrot.slane %v2167_v28, 5  ;;  %v2193_v9 = vrot.slane %v2191_v38, 5  ;;  %v2189_v61 = vrot.slane %v2188_v41, 4  ;;  %v2215_v7 = vshll.u32 %v4462_v56, 16  ;;  %v4483_v28 = vld [vmem:[%s3823_s9 + $0x68] sm:$0x1] }
  0x84   : > { %v2179_v2 = vrot.slane %v2178_v55, 4  ;;  %v2222_v35 = vrot.slane %v2220_v4, 4  ;;  %v4473_v59 = vrot.slane %v2229_v23, 5  ;;  %v4475_v57 = vrot.slane %v1367_v11, 5 }
  0x85   : > { %3453 = vmatmul.mubr.msk.bf16.gmra.mrb[12].mxu0 %vm472_vm3, %v3688_v18  ;;  %v2211_v18 = vrot.slane %v2209_v6, 4  ;;  %v2202_v6 = vor.u32 %v2201_v40, %v2198_v44  ;;  %v1373_v53 = vrot.slane %v1371_v48, 4  ;;  %v2160_v52 = vsel %vm3862_vm4, %v2155_v50, %v4412_v15 }
  0x86   : > { %3458 = vmatprep.mubr.msk.bf16.mxu0 %vm472_vm3, %v3163_v54  ;;  %v2233_v54 = vshrl.u32 %v4443_v60, 16  ;;  %v2225_v60 = vrot.slane %v2223_v58, 5  ;;  %v2170_v39 = vsel %vm3862_vm4, %v2165_v29, %v2169_v1  ;;  %v2253_v38 = vshll.u32 %v4471_v12, 16  ;;  %v3689_v1 = vld [vmem:[%s3823_s9 + $0xc] sm:$0xff]  }
  0x87   : > { %3373 = vmatmul.mubr.msk.bf16.gmra.mrb[4].mxu1 %vm472_vm3, %v4773_v22  ;;  %v2212_v22 = vor.u32 %v2211_v18, %v4455_v25  ;;  %v2257_v44 = vshrl.u32 %v4471_v12, 16  ;;  %v4775_v11 = vcombine.low %v4282_v47, %v4300_v51  ;;  %v2184_v15 = vsel %vm3862_vm4, %v2179_v2, %v4421_v49 }
  0x88   : > { %3376 = vmatprep.mubr.msk.bf16.mxu1 %vm472_vm3, %v4774_v33  ;;  %v3159_v33 = vld [vmem:[%s3823_s9 + $0x6c] sm:$0xf]  ;;  %v2235_v20 = vrot.slane %v2233_v54, 4  ;;  %v2194_v41 = vsel %vm3862_vm4, %v2189_v61, %v2193_v9  ;;  %v2203_v40 = vrot.slane %v2202_v6, 4  ;;  %v2217_v18 = vrot.slane %v2215_v7, 5 }
  0x89   : > { %v2244_v26 = vshrl.u32 %v3159_v33, 16  ;;  %v2247_v55 = vshll.u32 %v3159_v33, 16  ;;  %v4776_v4 = vcombine.low %v4321_v62, %v4333_v24  ;;  %v2213_v47 = vrot.slane %v2212_v22, 4  ;;  %v3044_v22 = vld [vmem:[%s3823_s9 + $0x48] sm:$0xf] }
  0x8a   : > { %v2226_v51 = vor.u32 %v2225_v60, %v2222_v35  ;;  %v2239_v49 = vshll.u32 %v4483_v28, 16  ;;  %v1374_v58 = vor.u32 %v1373_v53, %v4475_v57  ;;  %v1377_v23 = vshll.u32 %v4141_v0, 16  ;;  %v4512_v60 = vld [vmem:[%s3823_s9 + $0x74] sm:$0x1] }
  0x8b   : > { %v3166_v54 = vcombine.low %v2160_v52, %v2170_v39  ;;  %v2246_v48 = vrot.slane %v2244_v26, 4  ;;  %v2249_v62 = vrot.slane %v2247_v55, 5  ;;  %v4506_v24 = vrot.slane %v2253_v38, 5 }
  0x8c   : > { %v2259_v50 = vrot.slane %v2257_v44, 4  ;;  %v3167_v29 = vcombine.low %v2184_v15, %v2194_v41  ;;  %v2208_v35 = vsel %vm3862_vm4, %v2203_v40, %v4455_v25  ;;  %v2227_v0 = vrot.slane %v2226_v51, 4  ;;  %v3691_v51 = vld [vmem:[%s3823_s9 + $0x24] sm:$0xff]  }
  0x8d   : > { %3459 = vmatmul.mubr.msk.bf16.vlgmr.msra.gmra.mrb[0].mxu0 %vm472_vm3, %v3164_v13  ;;  %v2218_v13 = vsel %vm3862_vm4, %v2213_v47, %v2217_v18  ;;  %v2241_v2 = vrot.slane %v2239_v49, 5  ;;  %v1375_v9 = vrot.slane %v1374_v58, 4  ;;  %v1379_v61 = vrot.slane %v1377_v23, 5 }
  0x8e   : > { %3475 = vmatpush3.bf16.msra.mxu0 %v2572_v37  ;;  %3462 = vmatprep.mubr.msk.bf16.mxu0 %vm472_vm3, %v3165_v34  ;;  %v2236_v37 = vor.u32 %v2235_v20, %v4473_v59  ;;  %v2467_v6 = vrot.slane %v4270_v31, 5  ;;  %v2250_v7 = vor.u32 %v2249_v62, %v2246_v48  ;;  %v2260_v33 = vor.u32 %v2259_v50, %v4506_v24  ;;  %v3179_v20 = vld [vmem:[%s3823_s9 + $0x18] sm:$0xe]  ;;  %v3181_v62 = vld [vmem:[%s3823_s9 + $0x30] sm:$0xe] }
  0x8f   : > { %3377 = vmatmul.mubr.msk.bf16.gmra.mrb[8].mxu1 %vm472_vm3, %v4775_v11  ;;  %v2263_v25 = vshll.u32 %v4512_v60, 16  ;;  %v4777_v53 = vcombine.low %v4351_v19, %v4363_v10  ;;  %v3168_v52 = vcombine.low %v2208_v35, %v2218_v13  ;;  %v2232_v31 = vsel %vm3862_vm4, %v2227_v0, %v4473_v59  ;;  %v3690_v59 = vld [vmem:[%s3823_s9 + $0x18] sm:$0xff]  }
  0x90   : > { %3380 = vmatprep.mubr.msk.bf16.mxu1 %vm472_vm3, %v4776_v4  ;;  %v2237_v34 = vrot.slane %v2236_v37, 4  ;;  %v1358_v26 = vshrl.u32 %v3044_v22, 16  ;;  %v1361_v55 = vshll.u32 %v3044_v22, 16  ;;  %v3187_v19 = vrot.slane %v3179_v20, 9  ;;  %v3041_v4 = vld [vmem:[%s3823_s9 + $0x3c] sm:$0xf] }
  0x91   : > { %v2469_v10 = vrot.slane %v2467_v6, 4  ;;  %v2470_v38 = vrot.slane %v4304_v30, 5  ;;  %v1380_v44 = vsel %vm3862_vm4, %v1375_v9, %v1379_v61  ;;  %v2251_v11 = vrot.slane %v2250_v7, 4  ;;  %v3180_v30 = vld [vmem:[%s3823_s9 + $0x24] sm:$0xe]  ;;  %v3692_v22 = vld [vmem:[%s3823_s9 + $0x30] sm:$0xff]  }
  0x92   : > { %v2242_v39 = vsel %vm3862_vm4, %v2237_v34, %v2241_v2  ;;  %v2261_v15 = vrot.slane %v2260_v33, 4  ;;  %v2265_v41 = vrot.slane %v2263_v25, 5  ;;  %v1360_v40 = vrot.slane %v1358_v26, 4  ;;  %v3693_v20 = vld [vmem:[%s3823_s9 + $0x3c] sm:$0xff]   ;;  %v3047_v26 = vld [vmem:[%s3823_s9 + $0x54] sm:$0xf] }
  0x93   : > { %v3169_v18 = vcombine.low %v2232_v31, %v2242_v39  ;;  %v1363_v47 = vrot.slane %v1361_v55, 5  ;;  %v2468_v37 = vsel %vm4017_vm7, %v3187_v19, %v2467_v6  ;;  %v2471_v49 = vsel %vm4017_vm7, %v2469_v10, %v2470_v38  ;;  %v3183_v38 = vld [vmem:[%s3823_s9 + $0x48] sm:$0xe] }
  0x94   : > { %v2474_v58 = vrot.slane %v4317_v14, 5  ;;  %v2266_v48 = vsel %vm3862_vm4, %v2261_v15, %v2265_v41  ;;  %v2481_v50 = vrot.slane %v4336_v8, 5  ;;  %v1337_v35 = vshll.u32 %v3041_v4, 16 }
  0x95   : > { %3463 = vmatmul.mubr.msk.bf16.gmra.mrb[4].mxu0 %vm472_vm3, %v3166_v54  ;;  %v1364_v23 = vor.u32 %v1363_v47, %v1360_v40  ;;  %v2256_v54 = vsel %vm3862_vm4, %v2251_v11, %v4506_v24  ;;  %v1343_v14 = vshll.u32 %v4120_v42, 16  ;;  %v3188_v24 = vrot.slane %v3180_v30, 9 }
  0x96   : > { %3466 = vmatprep.mubr.msk.bf16.mxu0 %vm472_vm3, %v3167_v29  ;;  %v1334_v29 = vshrl.u32 %v3041_v4, 16  ;;  %v2477_v8 = vrot.slane %v4359_v36, 5  ;;  %v3196_v0 = vcombine.low %v2468_v37, %v2471_v49  ;;  %v2476_v34 = vrot.slane %v2474_v58, 4  ;;  %v3694_v37 = vld [vmem:[%s3823_s9 + $0x48] sm:$0xff]  }
  0x97   : > { %3381 = vmatmul.mubr.msk.bf16.gmra.mrb[12].mxu1 %vm472_vm3, %v4777_v53  ;;  %v1365_v13 = vrot.slane %v1364_v23, 4  ;;  %v3189_v2 = vrot.slane %v3181_v62, 9  ;;  %v3170_v61 = vcombine.low %v2256_v54, %v2266_v48  ;;  %v2483_v6 = vrot.slane %v2481_v50, 4  ;;  %v3695_v23 = vld [vmem:[%s3823_s9 + $0x54] sm:$0xff]  }
  0x98   : > { %3386 = vmatprep.mubr.msk.bf16.mxu1 %vm472_vm3, %v3689_v1  ;;  %v1347_v1 = vshrl.u32 %v4120_v42, 16  ;;  %v2484_v42 = vrot.slane %v4366_v21, 5  ;;  %v1336_v7 = vrot.slane %v1334_v29, 4  ;;  %v1339_v33 = vrot.slane %v1337_v35, 5 }
  0x99   : > { %v1370_v9 = vsel %vm3862_vm4, %v1365_v13, %v4475_v57  ;;  %v4568_v25 = vrot.slane %v1343_v14, 5  ;;  %v2475_v53 = vsel %vm4017_vm7, %v3188_v24, %v2474_v58  ;;  %v2478_v57 = vsel %vm4017_vm7, %v2476_v34, %v2477_v8  ;;  %v3184_v24 = vld [vmem:[%s3823_s9 + $0x54] sm:$0xe]  ;;  %v4778_v8 = vld [vmem:[#allocation5_spill] sm:$0xff] }
  0x9a   : > { %v1349_v36 = vrot.slane %v1347_v1, 4  ;;  %v2482_v21 = vsel %vm4017_vm7, %v3189_v2, %v2481_v50  ;;  %v2488_v31 = vrot.slane %v4377_v43, 5  ;;  %v1353_v39 = vshll.u32 %v4123_v45, 16  ;;  %v3050_v50 = vld [vmem:[%s3823_s9 + $0x60] sm:$0xf] }
  0x9b   : > { %v2485_v55 = vsel %vm4017_vm7, %v2483_v6, %v2484_v42  ;;  %v1340_v19 = vor.u32 %v1339_v33, %v1336_v7  ;;  %v3197_v43 = vcombine.low %v2475_v53, %v2478_v57  ;;  %v2491_v11 = vrot.slane %v4419_v46, 5  ;;  %v4780_v33 = vld [vmem:[#allocation2_spill] sm:$0xff] }
  0x9c   : > { %v1350_v10 = vor.u32 %v1349_v36, %v4568_v25  ;;  %v1382_v15 = vshrl.u32 %v3047_v26, 16  ;;  %v1385_v41 = vshll.u32 %v3047_v26, 16  ;;  %v1391_v40 = vshll.u32 %v4149_v17, 16 }
  0x9d   : > { %3467 = vmatmul.mubr.msk.bf16.gmra.mrb[8].mxu0 %vm472_vm3, %v3168_v52  ;;  %v3182_v52 = vld [vmem:[%s3823_s9 + $0x3c] sm:$0xe]  ;;  %v2490_v4 = vrot.slane %v2488_v31, 4  ;;  %v1355_v47 = vrot.slane %v1353_v39, 5  ;;  %v2498_v58 = vrot.slane %v4424_v63, 5  ;;  %v2502_v63 = vrot.slane %v4409_v27, 5 }
  0x9e   : > { %3470 = vmatprep.mubr.msk.bf16.mxu0 %vm472_vm3, %v3169_v18  ;;  %v3190_v45 = vrot.slane %v3182_v52, 9  ;;  %v3198_v18 = vcombine.low %v2482_v21, %v2485_v55  ;;  %v1351_v49 = vrot.slane %v1350_v10, 4  ;;  %v1384_v46 = vrot.slane %v1382_v15, 4  ;;  %v3185_v27 = vld [vmem:[%s3823_s9 + $0x60] sm:$0xe] }
  0x9f   : > { %3387 = vmatmul.mubr.msk.bf16.vlgmr.msra.gmra.mrb[0].mxu1 %vm472_vm3, %v3690_v59  ;;  %v1395_v59 = vshrl.u32 %v4149_v17, 16  ;;  %v1387_v54 = vrot.slane %v1385_v41, 5  ;;  %v1393_v48 = vrot.slane %v1391_v40, 5  ;;  %v2492_v29 = vsel %vm4017_vm7, %v2490_v4, %v2491_v11  ;;  %v3696_v52 = vld [vmem:[%s3823_s9 + $0x60] sm:$0xff]  }
  0xa0   : > { %3493 = vmatpush3.bf16.msra.mxu1 %v3805_v3  ;;  %3390 = vmatprep.mubr.msk.bf16.mxu1 %vm472_vm3, %v3691_v51  ;;  %v4565_v3 = vcombine.low %v1370_v9, %v1380_v44  ;;  %v2495_v44 = vrot.slane %v4388_v16, 5  ;;  %v3191_v51 = vrot.slane %v3183_v38, 9  ;;  %v1341_v16 = vrot.slane %v1340_v19, 4  ;;  %v4779_v9 = vld [vmem:[#allocation3_spill] sm:$0xff] }
  0xa1   : > { %v1397_v62 = vrot.slane %v1395_v59, 4  ;;  %v2489_v17 = vsel %vm4017_vm7, %v3190_v45, %v2488_v31  ;;  %v1356_v1 = vsel %vm3862_vm4, %v1351_v49, %v1355_v47  ;;  %v1406_v34 = vshrl.u32 %v3050_v50, 16  ;;  %v3186_v47 = vld [vmem:[%s3823_s9 + $0x6c] sm:$0xe] }
  0xa2   : > { %v2497_v30 = vrot.slane %v2495_v44, 4  ;;  %v2496_v35 = vsel %vm4017_vm7, %v3191_v51, %v2495_v44  ;;  %v1346_v14 = vsel %vm3862_vm4, %v1341_v16, %v4568_v25  ;;  %v1409_v2 = vshll.u32 %v3050_v50, 16 }
  0xa3   : > { %v1419_v6 = vshrl.u32 %v4779_v9, 16  ;;  %v3199_v42 = vcombine.low %v2489_v17, %v2492_v29  ;;  %v1398_v7 = vor.u32 %v1397_v62, %v1393_v48  ;;  %v1401_v25 = vshll.u32 %v4780_v33, 16 }
  0xa4   : > { %v2499_v13 = vsel %vm4017_vm7, %v2497_v30, %v2498_v58  ;;  %v2504_v53 = vrot.slane %v2502_v63, 4  ;;  %v2505_v57 = vrot.slane %v4462_v56, 5  ;;  %v3058_v21 = vcombine.low %v1346_v14, %v1356_v1 }
  0xa5   : > { %3471 = vmatmul.mubr.msk.bf16.gmra.mrb[12].mxu0 %vm472_vm3, %v3170_v61  ;;  %v1415_v61 = vshll.u32 %v4779_v9, 16  ;;  %v3200_v36 = vcombine.low %v2496_v35, %v2499_v13  ;;  %v3193_v31 = vrot.slane %v3185_v27, 9  ;;  %v2512_v26 = vrot.slane %v4483_v28, 5 }
  0xa6   : > { %3476 = vmatprep.mubr.msk.bf16.mxu0 %vm472_vm3, %v3196_v0  ;;  %v2509_v0 = vrot.slane %v4778_v8, 5  ;;  %v1408_v55 = vrot.slane %v1406_v34, 4  ;;  %v1411_v19 = vrot.slane %v1409_v2, 5  ;;  %v1421_v38 = vrot.slane %v1419_v6, 4  ;;  %v4669_v2 = vld [vmem:[%s4758_s3] ss:$0 sm:$0xff] }
  0xa7   : > { %3391 = vmatmul.mubr.msk.bf16.gmra.mrb[4].mxu1 %vm472_vm3, %v3692_v22  ;;  %v1388_v22 = vor.u32 %v1387_v54, %v1384_v46  ;;  %v1417_v10 = vrot.slane %v1415_v61, 5  ;;  %v1403_v45 = vrot.slane %v1401_v25, 5  ;;  %v2506_v28 = vsel %vm4017_vm7, %v2504_v53, %v2505_v57 }
  0xa8   : > { %3394 = vmatprep.mubr.msk.bf16.mxu1 %vm472_vm3, %v3693_v20  ;;  %v3192_v20 = vrot.slane %v3184_v24, 9  ;;  %v2511_v39 = vrot.slane %v2509_v0, 4  ;;  %v2510_v11 = vsel %vm4017_vm7, %v3193_v31, %v2509_v0  ;;  %v2516_v15 = vrot.slane %v4471_v12, 5  ;;  %v4664_v0 = vld [vmem:[%s4757_s2] ss:$0 sm:$0xff] }
  0xa9   : > { %v1389_v44 = vrot.slane %v1388_v22, 4  ;;  %v1412_v40 = vor.u32 %v1411_v19, %v1408_v55  ;;  %v1422_v59 = vor.u32 %v1421_v38, %v1417_v10  ;;  %v3194_v30 = vrot.slane %v3186_v47, 9 }
  0xaa   : > { %v2503_v56 = vsel %vm4017_vm7, %v3192_v20, %v2502_v63  ;;  %v2513_v41 = vsel %vm4017_vm7, %v2511_v39, %v2512_v26  ;;  %v2518_v12 = vrot.slane %v2516_v15, 4  ;;  %v2519_v58 = vrot.slane %v4512_v60, 5 }
  0xab   : > { %v1394_v51 = vsel %vm3862_vm4, %v1389_v44, %v1393_v48  ;;  %v3201_v16 = vcombine.low %v2503_v56, %v2506_v28  ;;  %v3202_v49 = vcombine.low %v2510_v11, %v2513_v41  ;;  %v1413_v46 = vrot.slane %v1412_v40, 4 }
  0xac   : > { %v1423_v54 = vrot.slane %v1422_v59, 4  ;;  %v2517_v48 = vsel %vm4017_vm7, %v3194_v30, %v2516_v15  ;;  %v2520_v50 = vsel %vm4017_vm7, %v2518_v12, %v2519_v58 }
  0xad   : > { %3477 = vmatmul.mubr.msk.bf16.vlgmr.msra.gmra.mrb[0].mxu0 %vm472_vm3, %v3197_v43  ;;  %v1399_v43 = vrot.slane %v1398_v7, 4  ;;  %v1418_v60 = vsel %vm3862_vm4, %v1413_v46, %v1417_v10  ;;  %v3203_v29 = vcombine.low %v2517_v48, %v2520_v50 }
  0xae   : > { %3480 = vmatprep.mubr.msk.bf16.mxu0 %vm472_vm3, %v3198_v18  ;;  %v4781_v18 = vld [vmem:[#allocation4_spill] sm:$0xff] }
  0xaf   : > { %3395 = vmatmul.mubr.msk.bf16.gmra.mrb[8].mxu1 %vm472_vm3, %v3694_v37  ;;  %v1425_v4 = vshll.u32 %v4781_v18, 16  ;;  %v1404_v37 = vsel %vm3862_vm4, %v1399_v43, %v1403_v45 }
  0xb0   : > { %3398 = vmatprep.mubr.msk.bf16.mxu1 %vm472_vm3, %v3695_v23  ;;  %v3060_v23 = vcombine.low %v1394_v51, %v1404_v37 }
  0xb1   : > { %v1427_v62 = vrot.slane %v1425_v4, 5 }
  0xb3   : > { %v1428_v17 = vsel %vm3862_vm4, %v1423_v54, %v1427_v62 }
  0xb4   : > { %v3061_v35 = vcombine.low %v1418_v60, %v1428_v17 }
  0xb5   : > { %3481 = vmatmul.mubr.msk.bf16.gmra.mrb[4].mxu0 %vm472_vm3, %v3199_v42 }
  0xb6   : > { %3484 = vmatprep.mubr.msk.bf16.mxu0 %vm472_vm3, %v3200_v36 }
  0xb7   : > { %3399 = vmatmul.mubr.msk.bf16.gmra.mrb[12].mxu1 %vm472_vm3, %v3696_v52 }
  0xb8   : > { %3412 = vmatprep.mubr.msk.bf16.mxu1 %vm472_vm3, %v3058_v21 }
  0xbd   : > { %3485 = vmatmul.mubr.msk.bf16.gmra.mrb[8].mxu0 %vm472_vm3, %v3201_v16 }
  0xbe   : > { %3488 = vmatprep.mubr.msk.bf16.mxu0 %vm472_vm3, %v3202_v49 }
  0xbf   : > { %3413 = vmatmul.mubr.msk.bf16.vlgmr.msra.gmra.mrb[8].mxu1 %vm472_vm3, %v4565_v3 }
  0xc0   : > { %3416 = vmatprep.mubr.msk.bf16.mxu1 %vm472_vm3, %v3060_v23 }
  0xc5   : > { %3489 = vmatmul.mubr.msk.bf16.gmra.mrb[12].mxu0 %vm472_vm3, %v3203_v29 }
  0xc7   : > { %3417 = vmatmul.mubr.msk.bf16.gmra.mrb[12].mxu1 %vm472_vm3, %v3061_v35 }
 0x172   : > { %v3388_v3 = vpop.f32.mrb[0].mxu1 }
 0x173   : > { %v1134_v63 = vpop.f32.mrb[1].mxu1 }
 0x174   : > { %v3389_v14 = vpop.f32.mrb[2].mxu1 }
 0x175   : > { %v1137_v5 = vpop.f32.mrb[3].mxu1 }
 0x17a   : > { %v3392_v1 = vpop.f32.mrb[4].mxu1 }
 0x17b   : > { %v1150_v13 = vpop.f32.mrb[5].mxu1 }
 0x17c   : > { %v3393_v24 = vpop.f32.mrb[6].mxu1 }
 0x17d   : > { %v1153_v8 = vpop.f32.mrb[7].mxu1 }
 0x180   : > { %v3478_v32 = vpop.f32.mrb[0].mxu0 }
 0x181   : > { %v3494_v27 = vadd.f32 %v3478_v32, %v3388_v3  ;;  %v2608_v34 = vpop.f32.mrb[1].mxu0 }
 0x182   : > { %v3495_v9 = vadd.f32 %v2608_v34, %v1134_v63  ;;  %v3479_v61 = vpop.f32.mrb[2].mxu0 }
 0x183   : > { %v2696_v6 = vmul.f32 %v3494_v27, %v4664_v0  ;;  %v3496_v42 = vadd.f32 %v3479_v61, %v3389_v14  ;;  %v2611_v22 = vpop.f32.mrb[3].mxu0 }
 0x184   : > { %v2694_v7 = vmul.f32 %v3495_v9, %v4664_v0  ;;  %v3497_v33 = vadd.f32 %v2611_v22, %v1137_v5 }
 0x185   : > { %v2719_v25 = vadd.f32 %v4669_v2, %v2696_v6  ;;  %v2697_v36 = vmul.f32 %v3496_v42, %v4664_v0 }
 0x186   : > { %v2717_v20 = vadd.f32 %v4669_v2, %v2694_v7  ;;  %v2695_v53 = vmul.f32 %v3497_v33, %v4664_v0 }
 0x187   : > { %v2735_v57 = vmax.f32 %v2719_v25, 0.0  ;;  %v2720_v52 = vadd.f32 %v4669_v2, %v2697_v36 }
 0x188   : > { %v2733_v21 = vmax.f32 %v2717_v20, 0.0  ;;  %v2718_v31 = vadd.f32 %v4669_v2, %v2695_v53  ;;  %v3482_v39 = vpop.f32.mrb[4].mxu0 }
 0x189   : > { %v3235_v26 = vpack.c.bf16 %v2735_v57, %v2735_v57  ;;  %v2736_v55 = vmax.f32 %v2720_v52, 0.0  ;;  %v3498_v19 = vadd.f32 %v3482_v39, %v3392_v1  ;;  %v2624_v10 = vpop.f32.mrb[5].mxu0 }
 0x18a   : > { %v3233_v38 = vpack.c.bf16 %v2733_v21, %v2733_v21  ;;  %v2734_v44 = vmax.f32 %v2718_v31, 0.0  ;;  %v3499_v43 = vadd.f32 %v2624_v10, %v1150_v13  ;;  %v3483_v45 = vpop.f32.mrb[6].mxu0 }
 0x18b   : > { %2816 = vst.msk [vmem:[%s4681_s11 + $0x8] sm:$0xf] %vm2813_vm8, %v3235_v26  ;;  %v3236_v56 = vpack.c.bf16 %v2736_v55, %v2736_v55  ;;  %v2700_v28 = vmul.f32 %v3498_v19, %v4664_v0  ;;  %v3500_v11 = vadd.f32 %v3483_v45, %v3393_v24  ;;  %v2627_v15 = vpop.f32.mrb[7].mxu0 }
 0x18c   : > { %2814 = vst.msk [vmem:[%s4681_s11] sm:$0xf] %vm2813_vm8, %v3233_v38  ;;  %v3234_v41 = vpack.c.bf16 %v2734_v44, %v2734_v44  ;;  %v2698_v40 = vmul.f32 %v3499_v43, %v4664_v0  ;;  %v3501_v59 = vadd.f32 %v2627_v15, %v1153_v8 }
 0x18d   : > { %2817 = vst.msk [vmem:[%s4681_s11 + $0xc] sm:$0xf] %vm2813_vm8, %v3236_v56  ;;  %v2723_v18 = vadd.f32 %v4669_v2, %v2700_v28  ;;  %v2701_v4 = vmul.f32 %v3500_v11, %v4664_v0 }
 0x18e   : > { %2815 = vst.msk [vmem:[%s4681_s11 + $0x4] sm:$0xf] %vm2813_vm8, %v3234_v41  ;;  %v2721_v47 = vadd.f32 %v4669_v2, %v2698_v40  ;;  %v2699_v51 = vmul.f32 %v3501_v59, %v4664_v0 }
 0x18f   : > { %v2739_v37 = vmax.f32 %v2723_v18, 0.0  ;;  %v2724_v16 = vadd.f32 %v4669_v2, %v2701_v4 }
 0x190   : > { %v2737_v49 = vmax.f32 %v2721_v47, 0.0  ;;  %v2722_v30 = vadd.f32 %v4669_v2, %v2699_v51  ;;  %v3486_v12 = vpop.f32.mrb[8].mxu0 }
 0x191   : > { %v3239_v58 = vpack.c.bf16 %v2739_v37, %v2739_v37  ;;  %v2740_v23 = vmax.f32 %v2724_v16, 0.0  ;;  %v2640_v54 = vpop.f32.mrb[9].mxu0 }
 0x192   : > { %v3414_v46 = vpop.f32.mrb[8].mxu1  ;;  %v3237_v62 = vpack.c.bf16 %v2737_v49, %v2737_v49  ;;  %v2738_v48 = vmax.f32 %v2722_v30, 0.0  ;;  %v3487_v17 = vpop.f32.mrb[10].mxu0 }
 0x193   : > { %v3502_v50 = vadd.f32 %v3486_v12, %v3414_v46  ;;  %v1548_v60 = vpop.f32.mrb[9].mxu1  ;;  %2820 = vst.msk [vmem:[%s4681_s11 + $0x18] sm:$0xf] %vm2813_vm8, %v3239_v58  ;;  %v3240_v29 = vpack.c.bf16 %v2740_v23, %v2740_v23  ;;  %v2643_v63 = vpop.f32.mrb[11].mxu0 }
 0x194   : > { %v3503_v35 = vadd.f32 %v2640_v54, %v1548_v60  ;;  %v3415_v3 = vpop.f32.mrb[10].mxu1  ;;  %2818 = vst.msk [vmem:[%s4681_s11 + $0x10] sm:$0xf] %vm2813_vm8, %v3237_v62  ;;  %v3238_v14 = vpack.c.bf16 %v2738_v48, %v2738_v48 }
 0x195   : > { %v2704_v5 = vmul.f32 %v3502_v50, %v4664_v0  ;;  %v3504_v1 = vadd.f32 %v3487_v17, %v3415_v3  ;;  %v1551_v13 = vpop.f32.mrb[11].mxu1  ;;  %2821 = vst.msk [vmem:[%s4681_s11 + $0x1c] sm:$0xf] %vm2813_vm8, %v3240_v29 }
 0x196   : > { %v2702_v24 = vmul.f32 %v3503_v35, %v4664_v0  ;;  %v3505_v8 = vadd.f32 %v2643_v63, %v1551_v13  ;;  %2819 = vst.msk [vmem:[%s4681_s11 + $0x14] sm:$0xf] %vm2813_vm8, %v3238_v14 }
 0x197   : > { %v2727_v32 = vadd.f32 %v4669_v2, %v2704_v5  ;;  %v2705_v27 = vmul.f32 %v3504_v1, %v4664_v0 }
 0x198   : > { %v2725_v34 = vadd.f32 %v4669_v2, %v2702_v24  ;;  %v2703_v9 = vmul.f32 %v3505_v8, %v4664_v0  ;;  %v3490_v42 = vpop.f32.mrb[12].mxu0 }
 0x199   : > { %v2743_v61 = vmax.f32 %v2727_v32, 0.0  ;;  %v2728_v6 = vadd.f32 %v4669_v2, %v2705_v27  ;;  %v2656_v25 = vpop.f32.mrb[13].mxu0 }
 0x19a   : > { %v2741_v22 = vmax.f32 %v2725_v34, 0.0  ;;  %v2726_v7 = vadd.f32 %v4669_v2, %v2703_v9  ;;  %v3418_v33 = vpop.f32.mrb[12].mxu1  ;;  %v3491_v52 = vpop.f32.mrb[14].mxu0 }
 0x19b   : > { %v3243_v36 = vpack.c.bf16 %v2743_v61, %v2743_v61  ;;  %v2744_v20 = vmax.f32 %v2728_v6, 0.0  ;;  %v3506_v53 = vadd.f32 %v3490_v42, %v3418_v33  ;;  %v1564_v57 = vpop.f32.mrb[13].mxu1  ;;  %v2659_v55 = vpop.f32.mrb[15].mxu0 }
 0x19c   : > { %v3241_v21 = vpack.c.bf16 %v2741_v22, %v2741_v22  ;;  %v2742_v31 = vmax.f32 %v2726_v7, 0.0  ;;  %v3507_v39 = vadd.f32 %v2656_v25, %v1564_v57  ;;  %v3419_v26 = vpop.f32.mrb[14].mxu1 }
 0x19d   : > { %2824 = vst.msk [vmem:[%s4681_s11 + $0x28] sm:$0xf] %vm2813_vm8, %v3243_v36  ;;  %v3244_v19 = vpack.c.bf16 %v2744_v20, %v2744_v20  ;;  %v2708_v10 = vmul.f32 %v3506_v53, %v4664_v0  ;;  %v3508_v38 = vadd.f32 %v3491_v52, %v3419_v26  ;;  %v1567_v44 = vpop.f32.mrb[15].mxu1 }
 0x19e   : > { %2822 = vst.msk [vmem:[%s4681_s11 + $0x20] sm:$0xf] %vm2813_vm8, %v3241_v21  ;;  %v3242_v43 = vpack.c.bf16 %v2742_v31, %v2742_v31  ;;  %v2706_v45 = vmul.f32 %v3507_v39, %v4664_v0  ;;  %v3509_v56 = vadd.f32 %v2659_v55, %v1567_v44 }
 0x19f   : > { %2825 = vst.msk [vmem:[%s4681_s11 + $0x2c] sm:$0xf] %vm2813_vm8, %v3244_v19  ;;  %v2731_v28 = vadd.f32 %v4669_v2, %v2708_v10  ;;  %v2709_v11 = vmul.f32 %v3508_v38, %v4664_v0 }
 0x1a0   : > { %2823 = vst.msk [vmem:[%s4681_s11 + $0x24] sm:$0xf] %vm2813_vm8, %v3242_v43  ;;  %v2729_v15 = vadd.f32 %v4669_v2, %v2706_v45  ;;  %v2707_v41 = vmul.f32 %v3509_v56, %v4664_v0 }
 0x1a1   : > { %v2747_v40 = vmax.f32 %v2731_v28, 0.0  ;;  %v2732_v59 = vadd.f32 %v4669_v2, %v2709_v11 }
 0x1a2   : > { %v2745_v18 = vmax.f32 %v2729_v15, 0.0  ;;  %v2730_v4 = vadd.f32 %v4669_v2, %v2707_v41 }
 0x1a3   : > { %v3247_v47 = vpack.c.bf16 %v2747_v40, %v2747_v40  ;;  %v2748_v51 = vmax.f32 %v2732_v59, 0.0 }
 0x1a4   : > { %v3245_v37 = vpack.c.bf16 %v2745_v18, %v2745_v18  ;;  %v2746_v16 = vmax.f32 %v2730_v4, 0.0 }
 0x1a5   : > { %2828 = vst.msk [vmem:[%s4681_s11 + $0x38] sm:$0xf] %vm2813_vm8, %v3247_v47  ;;  %v3248_v49 = vpack.c.bf16 %v2748_v51, %v2748_v51 }
 0x1a6   : > { %2826 = vst.msk [vmem:[%s4681_s11 + $0x30] sm:$0xf] %vm2813_vm8, %v3245_v37  ;;  %v3246_v30 = vpack.c.bf16 %v2746_v16, %v2746_v16 }
 0x1a7   : > { %2829 = vst.msk [vmem:[%s4681_s11 + $0x3c] sm:$0xf] %vm2813_vm8, %v3248_v49 }
 0x1a8   : > { %2827 = vst.msk [vmem:[%s4681_s11 + $0x34] sm:$0xf] %vm2813_vm8, %v3246_v30 }
 0x1a9 PF: > { %s14_s19 = sadd.s32 1, %s3736_s19   ;;  %s4782_s15 = smov %s3728_s17 }
 0x1aa   : > { %p11_p7 = scmp.ge.s32.totalorder %s14_s19, 6   ;;  %s4783_s16 = smov %s3732_s18 }
 0x1ab   : > { %s4784_s17 = smov %s4787_s20  ;;  %s4785_s18 = smov %s4791_s21 }
 0x1ac   :  { %13 = sbr.rel (!%p11_p7) target bundleno = 3 (0x3), region = 77 }

// kernel: convolution_block_forward.3
= control target key start
LH: loop header
LB: loop body
LE: loop exit
PB: predicated region body
PF: predicated region fallthrough
CT: control target
= control target key end

     0   :  { %9 = vsyncpa [#allocation3], 0  ;;  %s5035_s0 = inlined_call_operand.vmem [shape: bf16[2,18,18,32], index: 0, kind: input, shape index: {}]   ;;  %s5036_s1 = inlined_call_operand.vmem [shape: bf16[9,32,32], index: 1, kind: input, shape index: {}]   ;;  %s5037_s2 = inlined_call_operand.vmem [shape: f32[1,32], index: 2, kind: input, shape index: {}]   ;;  %s5038_s3 = inlined_call_operand.vmem [shape: f32[1,32], index: 3, kind: input, shape index: {}]   ;;  %s5039_s4 = inlined_call_operand.hbm [shape: f32[2,256,32], index: 4, kind: output, shape index: {}]  }
   0x1   :  { %11 = vsyncpa [#allocation3 + $0x1], 0  ;;  %s3945_s15 = smov 0   ;;  %s3947_s16 = smov 0  }
   0x2   :  { %s3949_s17 = smov 0   ;;  %s3951_s18 = smov 0  }
   0x3   :  { %s3953_s19 = smov 0   ;;  %s3955_s20 = smov 0  }
   0x4   :  { %s3957_s21 = smov 0   ;;  %s3959_s22 = smov 0  }
   0x5 LB: > { %s2964_s23 = sadd.s32 4294967295, %s3915_s22   ;;  %s2965_s24 = sadd.s32 4294967294, %s3915_s22   ;;  %s3915_s22 = sphi %s3959_s22, %s17_s22   ;;  %s3911_s21 = sphi %s3957_s21, %s5069_s21   ;;  %s3907_s20 = sphi %s3955_s20, %s5068_s20   ;;  %s3903_s19 = sphi %s3953_s19, %s5067_s19   ;;  %s3899_s18 = sphi %s3951_s18, %s5066_s18   ;;  %s3895_s17 = sphi %s3949_s17, %s5065_s17   ;;  %s3891_s16 = sphi %s3947_s16, %s5064_s16   ;;  %s3887_s15 = sphi %s3945_s15, %s5063_s15  }
   0x6   : > { %s26_s25 = sadd.s32 1, %s3907_s20  ;;  %s29_s26 = sadd.s32 1, %s3911_s21 }
   0x7   : > { %p27_p0 = scmp.ge.s32.totalorder %s26_s25, 2  ;;  %p137_p1 = scmp.ne.s32.totalorder %s3895_s17, %s3891_s16 }
   0x8   : > { %p138_p2 = scmp.eq.s32.totalorder %s2964_s23, 3  ;;  %p143_p5 = scmp.ne.s32.totalorder %s3891_s16, %s3887_s15 }
   0x9   : > { %s5071_s25 = smov (%p27_p0, %s26_s25), 0  ;;  %s5073_s26 = smov (!%p27_p0, %s29_s26), %s3911_s21 }
   0xa   : > { %s123_s27 = ssub.s32 %s3907_s20, %s5071_s25  ;;  %p3996_p3 = por %p138_p2, %p137_p1 }
   0xb   : > { %p31_p4 = scmp.ge.s32.totalorder %s5073_s26, 2  ;;  %p144_p6 = scmp.eq.s32.totalorder %s2965_s24, 3 }
   0xc   : > { %p2968_p7 = scmp.ge.s32.totalorder %s3915_s22, 1  ;;  %p179_p9 = scmp.lt.s32.totalorder %s3915_s22, 5 }
   0xd   : > { %s5075_s26 = smov (%p31_p4, %s5073_s26), 0  ;;  %p4005_p8 = por %p144_p6, %p143_p5 }
   0xe   : > { %s122_s30 = ssub.s32 %s3911_s21, %s5075_s26  ;;  %s127_s5 = sadd.s32 1, %s3895_s17 }
   0xf   : > { %s124_s6 = sor.u32 %s123_s27, %s122_s30  ;;  %p180_p10 = pnand %p2968_p7, %p179_p9 }
  0x10   : > { %p125_p11 = scmp.eq.s32.totalorder %s124_s6, 0 }
  0x11   : > { %183 = sbr.rel (%p180_p10) target bundleno = 446 (0x1be), region = 36 }
  0x12   : > { %s4014_s7 = scalar_select %p125_p11, %s3895_s17, %s127_s5  }
  0x18   : > { %v3777_v0 = vld [vmem:[%s5036_s1 + $0x10] sm:$0xff]   ;;  %p205_p12 = scmp.lt.s32.totalorder %s3903_s19, 1  ;;  %v3778_v1 = vld [vmem:[%s5036_s1 + $0x40] sm:$0xff]   ;;  %v3779_v2 = vld [vmem:[%s5036_s1 + $0x18] sm:$0xff]   ;;  %s3300_s27 = smul.u32 96, %s3899_s18  ;;  %vm480_vm3 = vcmask 261120  }
  0x19   : > { %3391 = vmatprep.subr.bf16.mxu1 %v3777_v0  ;;  %3471 = vmatprep.subr.bf16.mxu0 %v3778_v1  ;;  %v3780_v3 = vld [vmem:[%s5036_s1 + $0x48] sm:$0xff]   ;;  %v4034_v4 = vld [vmem:[%s5036_s1] sm:$0xff]   ;;  %vm244_vm0 = vsmask.f32 3328  ;;  %v4042_v5 = vld [vmem:[%s5036_s1 + $0x50] sm:$0xff]   ;;  %vm799_vm4 = vcmask 1042432  }
  0x1a   : > { %s206_s14 = scalar_select %p205_p12, %s3903_s19, 1  ;;  %3392 = vmatpush3.bf16.msra.mxu1 %v3777_v0  ;;  %3472 = vmatpush3.bf16.msra.mxu0 %v3778_v1  ;;  %vm245_vm1 = vsmask.f32 7440  ;;  %vm800_vm5 = vcmask 1046532   ;;  %v4896_v30 = vld [vmem:[%s5037_s2] ss:$0 sm:$0xff] }
  0x1b   : > { %3393 = vmatprep.subr.bf16.mxu1 %v3779_v2  ;;  %3473 = vmatprep.subr.bf16.mxu0 %v3780_v3  ;;  %vm4077_vm2 = vmor %vm244_vm0, %vm245_vm1  ;;  %s3295_s11 = sshll.u32 %s3899_s18, 4  ;;  %s3296_s12 = sshll.u32 %s3903_s19, 5 }
  0x1c   : > { %s3703_s30 = smul.u32 216, %s206_s14  ;;  %vm4234_vm6 = vmor %vm799_vm4, %vm800_vm5  ;;  %s2875_s18 = sadd.s32 %s3296_s12, %s3295_s11 }
  0x1d   : > { %s3297_s19 = sshll.u32 %s2875_s18, 7  ;;  %s3917_s6 = smov [#allocation2]  }
  0x1e   : > { %s209_s10 = scalar_lea.vmem %s5035_s0, %s3703_s30  ;;  %3394 = vmatpush3.bf16.msra.mxu1 %v3779_v2  ;;  %3474 = vmatpush3.bf16.msra.mxu0 %v3780_v3  ;;  %s3825_s8 = sshll.u32 %s3917_s6, 4  ;;  %s3826_s8 = int_to_ptr.vmem [resolvable:$false] %s3825_s8 }
  0x1f   : > { %s4044_s13 = scalar_lea.vmem %s209_s10, %s3300_s27  ;;  %3411 = vmatprep.subr.bf16.mxu1 %v4034_v4  ;;  %3491 = vmatprep.subr.bf16.mxu0 %v4042_v5  ;;  %s4971_s27 = scalar_lea.hbm %s5039_s4, %s3297_s19 }
  0x20   : > { %v4047_v6 = vld [vmem:[%s4044_s13] sm:$0xf]  ;;  %v4050_v7 = vld [vmem:[%s4044_s13 + $0x4] sm:$0xf]  ;;  %v4053_v8 = vld [vmem:[%s4044_s13 + $0x8] sm:$0x1] }
  0x21   : > { %v248_v9 = vshrl.u32 %v4047_v6, 16  ;;  %v251_v10 = vshll.u32 %v4047_v6, 16  ;;  %v257_v11 = vshll.u32 %v4050_v7, 16  ;;  %v261_v12 = vshrl.u32 %v4050_v7, 16  ;;  %v3084_v13 = vld [vmem:[%s4044_s13 + $0xc] sm:$0xf] }
  0x22   : > { %v267_v14 = vshll.u32 %v4053_v8, 16  ;;  %v4064_v15 = vld [vmem:[%s4044_s13 + $0x10] sm:$0xf]  ;;  %v4067_v16 = vld [vmem:[%s4044_s13 + $0x14] sm:$0x1]  ;;  %v1275_v22 = vshrl.u32 %v3084_v13, 16 }
  0x23   : > { %v250_v17 = vrot.slane %v248_v9, 4  ;;  %v253_v18 = vrot.slane %v251_v10, 5  ;;  %v259_v19 = vrot.slane %v257_v11, 5  ;;  %v263_v20 = vrot.slane %v261_v12, 4  ;;  %v4073_v29 = vld [vmem:[%s4044_s13 + $0xc] sm:$0xf] }
  0x24   : > { %v269_v21 = vrot.slane %v267_v14, 5  ;;  %v1278_v23 = vshll.u32 %v3084_v13, 16  ;;  %v1284_v24 = vshll.u32 %v4064_v15, 16  ;;  %v1288_v27 = vshrl.u32 %v4064_v15, 16  ;;  %v4082_v34 = vld [vmem:[%s4044_s13 + $0x10] sm:$0xf] }
  0x25   : > { %v254_v25 = vor.u32 %v253_v18, %v250_v17  ;;  %v264_v26 = vor.u32 %v263_v20, %v259_v19  ;;  %v1294_v28 = vshll.u32 %v4067_v16, 16  ;;  %v1277_v31 = vrot.slane %v1275_v22, 4  ;;  %v4085_v40 = vld [vmem:[%s4044_s13 + $0x14] sm:$0x1]  ;;  %v3087_v51 = vld [vmem:[%s4044_s13 + $0x18] sm:$0xf] }
  0x26   : > { %v1280_v32 = vrot.slane %v1278_v23, 5  ;;  %v1286_v33 = vrot.slane %v1284_v24, 5  ;;  %v1290_v37 = vrot.slane %v1288_v27, 4  ;;  %v272_v41 = vshrl.u32 %v4073_v29, 16  ;;  %v4098_v56 = vld [vmem:[%s4044_s13 + $0x1c] sm:$0xf] }
  0x27   : > { %v255_v35 = vrot.slane %v254_v25, 4  ;;  %v265_v36 = vrot.slane %v264_v26, 4  ;;  %v1296_v39 = vrot.slane %v1294_v28, 5  ;;  %v275_v42 = vshll.u32 %v4073_v29, 16  ;;  %v4106_v61 = vld [vmem:[%s4044_s13 + $0x20] sm:$0x1] }
  0x28   : > { %v1281_v38 = vor.u32 %v1280_v32, %v1277_v31  ;;  %v1291_v45 = vor.u32 %v1290_v37, %v1286_v33  ;;  %v281_v46 = vshll.u32 %v4082_v34, 16  ;;  %v274_v49 = vrot.slane %v272_v41, 4  ;;  %v4114_v17 = vld [vmem:[%s4044_s13 + $0x18] sm:$0xf]  ;;  %v4121_v22 = vld [vmem:[%s4044_s13 + $0x1c] sm:$0xf] }
  0x29   : > { %v260_v43 = vsel %vm4077_vm2, %v255_v35, %v259_v19  ;;  %v270_v44 = vsel %vm4077_vm2, %v265_v36, %v269_v21  ;;  %v277_v50 = vrot.slane %v275_v42, 5  ;;  %v285_v54 = vshrl.u32 %v4082_v34, 16  ;;  %v4129_v31 = vld [vmem:[%s4044_s13 + $0x20] sm:$0x1]  ;;  %v4139_v41 = vld [vmem:[%s4044_s13 + $0x28] sm:$0xf] }
  0x2a   : > { %v2978_v47 = vcombine.low %v260_v43, %v270_v44  ;;  %v1282_v48 = vrot.slane %v1281_v38, 4  ;;  %v1292_v52 = vrot.slane %v1291_v45, 4  ;;  %v283_v53 = vrot.slane %v281_v46, 5  ;;  %v3784_v46 = vld [vmem:[%s5036_s1 + $0x8] sm:$0xff]  }
  0x2b   : > { %v291_v55 = vshll.u32 %v4085_v40, 16  ;;  %v1678_v58 = vrot.slane %v4064_v15, 5  ;;  %v1681_v59 = vrot.slane %v4067_v16, 5  ;;  %v278_v60 = vor.u32 %v277_v50, %v274_v49  ;;  %v4269_v16 = vld [vmem:[%s4044_s13 + $0x4c] sm:$0xf] }
  0x2c   : > { %3395 = vmatprep.mubr.msk.bf16.mxu1 %vm480_vm3, %v2978_v47  ;;  %v1287_v57 = vsel %vm4077_vm2, %v1282_v48, %v1286_v33  ;;  %v1297_v62 = vsel %vm4077_vm2, %v1292_v52, %v1296_v39  ;;  %v287_v63 = vrot.slane %v285_v54, 4  ;;  %v1299_v1 = vshrl.u32 %v3087_v51, 16  ;;  %v3090_v39 = vld [vmem:[%s4044_s13 + $0x24] sm:$0xf] }
  0x2d   : > { %v293_v0 = vrot.slane %v291_v55, 5  ;;  %v3112_v2 = vcombine.low %v1287_v57, %v1297_v62  ;;  %v279_v3 = vrot.slane %v278_v60, 4  ;;  %v1302_v9 = vshll.u32 %v3087_v51, 16  ;;  %v3783_v57 = vld [vmem:[%s5036_s1 + $0x58] sm:$0xff]  }
  0x2e   : > { %v1308_v10 = vshll.u32 %v4098_v56, 16  ;;  %v288_v11 = vor.u32 %v287_v63, %v283_v53  ;;  %v1301_v12 = vrot.slane %v1299_v1, 4  ;;  %v1312_v13 = vshrl.u32 %v4098_v56, 16  ;;  %v4159_v1 = vld [vmem:[%s4044_s13 + $0x24] sm:$0xf] }
  0x2f   : > { %v1318_v14 = vshll.u32 %v4106_v61, 16  ;;  %3475 = vmatprep.mubr.msk.bf16.mxu0 %vm480_vm3, %v3112_v2  ;;  %v284_v18 = vsel %vm4077_vm2, %v279_v3, %v283_v53  ;;  %v1304_v19 = vrot.slane %v1302_v9, 5  ;;  %v1685_v21 = vrot.slane %v4098_v56, 5  ;;  %v4149_v53 = vld [vmem:[%s4044_s13 + $0x2c] sm:$0x1] }
  0x30   : > { %v1310_v20 = vrot.slane %v1308_v10, 5  ;;  %v289_v23 = vrot.slane %v288_v11, 4  ;;  %v1314_v24 = vrot.slane %v1312_v13, 4  ;;  %v1688_v26 = vrot.slane %v4106_v61, 5  ;;  %v4162_v11 = vld [vmem:[%s4044_s13 + $0x28] sm:$0xf] }
  0x31   : > { %v1320_v25 = vrot.slane %v1318_v14, 5  ;;  %v1305_v27 = vor.u32 %v1304_v19, %v1301_v12  ;;  %v4126_v28 = vrot.slane %v1685_v21, 4  ;;  %v296_v32 = vshrl.u32 %v4114_v17, 16 }
  0x32   : > { %v299_v33 = vshll.u32 %v4114_v17, 16  ;;  %v294_v35 = vsel %vm4077_vm2, %v289_v23, %v293_v0  ;;  %v1315_v36 = vor.u32 %v1314_v24, %v1310_v20  ;;  %v305_v37 = vshll.u32 %v4121_v22, 16  ;;  %v4175_v23 = vld [vmem:[%s4044_s13 + $0x2c] sm:$0x1] }
  0x33   : > { %v309_v38 = vshrl.u32 %v4121_v22, 16  ;;  %v2979_v42 = vcombine.low %v284_v18, %v294_v35  ;;  %v1306_v43 = vrot.slane %v1305_v27, 4  ;;  %v298_v44 = vrot.slane %v296_v32, 4 }
  0x34   : > { %v301_v45 = vrot.slane %v299_v33, 5  ;;  %v1316_v47 = vrot.slane %v1315_v36, 4  ;;  %v307_v48 = vrot.slane %v305_v37, 5  ;;  %v315_v50 = vshll.u32 %v4129_v31, 16  ;;  %v3093_v36 = vld [vmem:[%s4044_s13 + $0x30] sm:$0xf] }
  0x35   : > { %v311_v49 = vrot.slane %v309_v38, 4  ;;  %3396 = vmatmul.mubr.msk.bf16.vlgmr.msra.gmra.mrb[0].mxu1 %vm480_vm3, %v2979_v42  ;;  %v1311_v51 = vsel %vm4077_vm2, %v1306_v43, %v1310_v20  ;;  %v1323_v54 = vshrl.u32 %v3090_v39, 16  ;;  %v1326_v55 = vshll.u32 %v3090_v39, 16  ;;  %v4185_v43 = vld [vmem:[%s4044_s13 + $0x34] sm:$0xf] }
  0x36   : > { %v302_v52 = vor.u32 %v301_v45, %v298_v44  ;;  %3412 = vmatpush3.bf16.msra.mxu1 %v4034_v4  ;;  %v1321_v60 = vsel %vm4077_vm2, %v1316_v47, %v1320_v25  ;;  %v317_v63 = vrot.slane %v315_v50, 5  ;;  %v1332_v0 = vshll.u32 %v4139_v41, 16  ;;  %v4167_v4 = vld [vmem:[%s5036_s1 + $0x20] sm:$0xff]   ;;  %v4199_v50 = vld [vmem:[%s4044_s13 + $0x38] sm:$0x1] }
  0x37   : > { %v312_v62 = vor.u32 %v311_v49, %v307_v48  ;;  %v3113_v2 = vcombine.low %v1311_v51, %v1321_v60  ;;  %v1325_v9 = vrot.slane %v1323_v54, 4  ;;  %v1328_v10 = vrot.slane %v1326_v55, 5  ;;  %3413 = vmatprep.subr.bf16.mxu1 %v3784_v46 }
  0x38   : > { %v303_v3 = vrot.slane %v302_v52, 4  ;;  %v1334_v13 = vrot.slane %v1332_v0, 5  ;;  %v1336_v14 = vshrl.u32 %v4139_v41, 16  ;;  %v1342_v18 = vshll.u32 %v4149_v53, 16 }
  0x39   : > { %v313_v12 = vrot.slane %v312_v62, 4  ;;  %3476 = vmatmul.mubr.msk.bf16.vlgmr.msra.gmra.mrb[0].mxu0 %vm480_vm3, %v3113_v2  ;;  %v1329_v20 = vor.u32 %v1328_v10, %v1325_v9  ;;  %v320_v24 = vshrl.u32 %v4159_v1, 16  ;;  %v323_v25 = vshll.u32 %v4159_v1, 16  ;;  %v4207_v10 = vld [vmem:[%s4044_s13 + $0x34] sm:$0xf] }
  0x3a   : > { %v308_v19 = vsel %vm4077_vm2, %v303_v3, %v307_v48  ;;  %3492 = vmatpush3.bf16.msra.mxu0 %v4042_v5  ;;  %v1338_v32 = vrot.slane %v1336_v14, 4  ;;  %v1344_v33 = vrot.slane %v1342_v18, 5  ;;  %v329_v35 = vshll.u32 %v4162_v11, 16  ;;  %3414 = vmatpush3.bf16.msra.mxu1 %v3784_v46  ;;  %v4190_v5 = vld [vmem:[%s5036_s1 + $0x60] sm:$0xff]  }
  0x3b   : > { %v318_v27 = vsel %vm4077_vm2, %v313_v12, %v317_v63  ;;  %v1330_v38 = vrot.slane %v1329_v20, 4  ;;  %3493 = vmatprep.subr.bf16.mxu0 %v3783_v57  ;;  %v322_v39 = vrot.slane %v320_v24, 4  ;;  %v325_v42 = vrot.slane %v323_v25, 5  ;;  %3431 = vmatprep.subr.bf16.mxu1 %v4167_v4  ;;  %v4203_v63 = vld [vmem:[%s4044_s13 + $0x30] sm:$0xf] }
  0x3c   : > { %v2980_v37 = vcombine.low %v308_v19, %v318_v27  ;;  %v1339_v44 = vor.u32 %v1338_v32, %v1334_v13  ;;  %v331_v45 = vrot.slane %v329_v35, 5  ;;  %v333_v46 = vshrl.u32 %v4162_v11, 16  ;;  %v4216_v25 = vld [vmem:[%s4044_s13 + $0x38] sm:$0x1]  ;;  %v3130_v27 = vld [vmem:[%s4044_s13 + $0xc] sm:$0xe] }
  0x3d   : > { %v339_v47 = vshll.u32 %v4175_v23, 16  ;;  %v1335_v48 = vsel %vm4077_vm2, %v1330_v38, %v1334_v13  ;;  %v326_v49 = vor.u32 %v325_v42, %v322_v39  ;;  %v1347_v51 = vshrl.u32 %v3093_v36, 16 }
  0x3e   : > { %3399 = vmatprep.mubr.msk.bf16.mxu1 %vm480_vm3, %v2980_v37  ;;  %v1350_v52 = vshll.u32 %v3093_v36, 16  ;;  %v1340_v54 = vrot.slane %v1339_v44, 4  ;;  %v335_v55 = vrot.slane %v333_v46, 4  ;;  %v1356_v62 = vshll.u32 %v4185_v43, 16  ;;  %3494 = vmatpush3.bf16.msra.mxu0 %v3783_v57 }
  0x3f   : > { %v341_v60 = vrot.slane %v339_v47, 5  ;;  %v327_v0 = vrot.slane %v326_v49, 4  ;;  %v1349_v2 = vrot.slane %v1347_v51, 4  ;;  %v1360_v9 = vshrl.u32 %v4185_v43, 16  ;;  %3511 = vmatprep.subr.bf16.mxu0 %v4190_v5 }
  0x40   : > { %v1352_v3 = vrot.slane %v1350_v52, 5  ;;  %v1345_v12 = vsel %vm4077_vm2, %v1340_v54, %v1344_v33  ;;  %v336_v13 = vor.u32 %v335_v55, %v331_v45  ;;  %v1358_v14 = vrot.slane %v1356_v62, 5  ;;  %v4222_v33 = vld [vmem:[%s4044_s13 + $0x3c] sm:$0xf] }
  0x41   : > { %v1366_v57 = vshll.u32 %v4199_v50, 16  ;;  %v3114_v18 = vcombine.low %v1335_v48, %v1345_v12  ;;  %v332_v19 = vsel %vm4077_vm2, %v327_v0, %v331_v45  ;;  %v1362_v24 = vrot.slane %v1360_v9, 4 }
  0x42   : > { %v1353_v20 = vor.u32 %v1352_v3, %v1349_v2  ;;  %v337_v32 = vrot.slane %v336_v13, 4  ;;  %v344_v36 = vshrl.u32 %v4203_v63, 16  ;;  %v347_v37 = vshll.u32 %v4203_v63, 16  ;;  %v4239_v3 = vld [vmem:[%s4044_s13 + $0x40] sm:$0xf] }
  0x43   : > { %v1368_v35 = vrot.slane %v1366_v57, 5  ;;  %3479 = vmatprep.mubr.msk.bf16.mxu0 %vm480_vm3, %v3114_v18  ;;  %v1363_v39 = vor.u32 %v1362_v24, %v1358_v14  ;;  %v353_v42 = vshll.u32 %v4207_v10, 16  ;;  %v357_v44 = vshrl.u32 %v4207_v10, 16  ;;  %v4253_v24 = vld [vmem:[%s4044_s13 + $0x44] sm:$0x1] }
  0x44   : > { %v1354_v38 = vrot.slane %v1353_v20, 4  ;;  %v342_v45 = vsel %vm4077_vm2, %v337_v32, %v341_v60  ;;  %v346_v46 = vrot.slane %v344_v36, 4  ;;  %v349_v47 = vrot.slane %v347_v37, 5 }
  0x45   : > { %v363_v48 = vshll.u32 %v4216_v25, 16  ;;  %v2981_v49 = vcombine.low %v332_v19, %v342_v45  ;;  %v1364_v52 = vrot.slane %v1363_v39, 4  ;;  %v355_v54 = vrot.slane %v353_v42, 5 }
  0x46   : > { %v1359_v51 = vsel %vm4077_vm2, %v1354_v38, %v1358_v14  ;;  %v350_v62 = vor.u32 %v349_v47, %v346_v46  ;;  %v359_v60 = vrot.slane %v357_v44, 4  ;;  %v3138_v2 = vrot.slane %v3130_v27, 9  ;;  %v3131_v27 = vld [vmem:[%s4044_s13 + $0x18] sm:$0xe]  ;;  %v4262_v38 = vld [vmem:[%s4044_s13 + $0x48] sm:$0xf] }
  0x47   : > { %v365_v0 = vrot.slane %v363_v48, 5  ;;  %3400 = vmatmul.mubr.msk.bf16.gmra.mrb[4].mxu1 %vm480_vm3, %v2981_v49  ;;  %v1369_v9 = vsel %vm4077_vm2, %v1364_v52, %v1368_v35  ;;  %v1680_v12 = vrot.slane %v1678_v58, 4  ;;  %v368_v13 = vshrl.u32 %v4222_v33, 16  ;;  %v4272_v44 = vld [vmem:[%s4044_s13 + $0x50] sm:$0x1] }
  0x48   : > { %v371_v14 = vshll.u32 %v4222_v33, 16  ;;  %v3115_v57 = vcombine.low %v1359_v51, %v1369_v9  ;;  %v351_v18 = vrot.slane %v350_v62, 4  ;;  %v360_v19 = vor.u32 %v359_v60, %v355_v54  ;;  %v3132_v48 = vld [vmem:[%s4044_s13 + $0x24] sm:$0xe] }
  0x49   : > { %v1679_v20 = vsel %vm4234_vm6, %v3138_v2, %v1678_v58  ;;  %v1682_v32 = vsel %vm4234_vm6, %v1680_v12, %v1681_v59  ;;  %v370_v35 = vrot.slane %v368_v13, 4  ;;  %v377_v37 = vshll.u32 %v4239_v3, 16 }
  0x4a   : > { %v373_v36 = vrot.slane %v371_v14, 5  ;;  %3480 = vmatmul.mubr.msk.bf16.gmra.mrb[4].mxu0 %vm480_vm3, %v3115_v57  ;;  %v356_v15 = vsel %vm4077_vm2, %v351_v18, %v355_v54  ;;  %v361_v58 = vrot.slane %v360_v19, 4  ;;  %v3150_v39 = vcombine.low %v1679_v20, %v1682_v32  ;;  %v4291_v14 = vld [vmem:[%s4044_s13 + $0x54] sm:$0xf]  ;;  %v3788_v18 = vld [vmem:[%s5036_s1 + $0x68] sm:$0xff]  }
  0x4b   : > { %v381_v42 = vshrl.u32 %v4239_v3, 16  ;;  %v379_v45 = vrot.slane %v377_v37, 5  ;;  %v387_v46 = vshll.u32 %v4253_v24, 16  ;;  %v3139_v47 = vrot.slane %v3131_v27, 9 }
  0x4c   : > { %v374_v59 = vor.u32 %v373_v36, %v370_v35  ;;  %v366_v49 = vsel %vm4077_vm2, %v361_v58, %v365_v0  ;;  %3495 = vmatprep.mubr.msk.bf16.mxu0 %vm480_vm3, %v3150_v39  ;;  %v1689_v52 = vsel %vm4234_vm6, %v4126_v28, %v1688_v26  ;;  %v392_v54 = vshrl.u32 %v4262_v38, 16  ;;  %v4308_v58 = vld [vmem:[%s4044_s13 + $0x5c] sm:$0x1] }
  0x4d   : > { %v383_v51 = vrot.slane %v381_v42, 4  ;;  %v2982_v62 = vcombine.low %v356_v15, %v366_v49  ;;  %v389_v2 = vrot.slane %v387_v46, 5  ;;  %v1686_v0 = vsel %vm4234_vm6, %v3139_v47, %v1685_v21  ;;  %v4300_v21 = vld [vmem:[%s4044_s13 + $0x58] sm:$0xf] }
  0x4e   : > { %v375_v60 = vrot.slane %v374_v59, 4  ;;  %v3151_v12 = vcombine.low %v1686_v0, %v1689_v52  ;;  %v394_v13 = vrot.slane %v392_v54, 4  ;;  %v395_v61 = vshll.u32 %v4262_v38, 16 }
  0x4f   : > { %v384_v9 = vor.u32 %v383_v51, %v379_v45  ;;  %3403 = vmatprep.mubr.msk.bf16.mxu1 %vm480_vm3, %v2982_v62  ;;  %v401_v28 = vshll.u32 %v4269_v16, 16  ;;  %v405_v56 = vshrl.u32 %v4269_v16, 16  ;;  %v411_v57 = vshll.u32 %v4272_v44, 16  ;;  %v3134_v62 = vld [vmem:[%s4044_s13 + $0x3c] sm:$0xe] }
  0x50   : > { %v380_v26 = vsel %vm4077_vm2, %v375_v60, %v379_v45  ;;  %v397_v20 = vrot.slane %v395_v61, 5  ;;  %v3140_v27 = vrot.slane %v3132_v48, 9  ;;  %v1692_v32 = vrot.slane %v4139_v41, 5  ;;  %v3133_v48 = vld [vmem:[%s4044_s13 + $0x30] sm:$0xe] }
  0x51   : > { %v385_v19 = vrot.slane %v384_v9, 4  ;;  %v403_v35 = vrot.slane %v401_v28, 5  ;;  %v407_v36 = vrot.slane %v405_v56, 4  ;;  %v413_v37 = vrot.slane %v411_v57, 5 }
  0x52   : > { %v1695_v15 = vrot.slane %v4149_v53, 5  ;;  %3496 = vmatmul.mubr.msk.bf16.vlgmr.msra.gmra.mrb[0].mxu0 %vm480_vm3, %v3151_v12  ;;  %v398_v42 = vor.u32 %v397_v20, %v394_v13  ;;  %v1693_v59 = vsel %vm4234_vm6, %v3140_v27, %v1692_v32  ;;  %v1694_v45 = vrot.slane %v1692_v32, 4  ;;  %v4331_v12 = vld [vmem:[%s4044_s13 + $0x40] sm:$0xf]  ;;  %v4334_v13 = vld [vmem:[%s4044_s13 + $0x44] sm:$0x1] }
  0x53   : > { %v390_v39 = vsel %vm4077_vm2, %v385_v19, %v389_v2  ;;  %3512 = vmatpush3.bf16.msra.mxu0 %v4190_v5  ;;  %v408_v46 = vor.u32 %v407_v36, %v403_v35  ;;  %v416_v53 = vshrl.u32 %v4291_v14, 16  ;;  %v419_v47 = vshll.u32 %v4291_v14, 16  ;;  %v4327_v5 = vld [vmem:[%s5036_s1 + $0x70] sm:$0xff]  }
  0x54   : > { %v2983_v41 = vcombine.low %v380_v26, %v390_v39  ;;  %v399_v49 = vrot.slane %v398_v42, 4  ;;  %v1696_v51 = vsel %vm4234_vm6, %v1694_v45, %v1695_v15  ;;  %v425_v52 = vshll.u32 %v4300_v21, 16  ;;  %3513 = vmatprep.subr.bf16.mxu0 %v3788_v18  ;;  %v4348_v45 = vld [vmem:[%s4044_s13 + $0x4c] sm:$0xf] }
  0x55   : > { %v429_v54 = vshrl.u32 %v4300_v21, 16  ;;  %v409_v60 = vrot.slane %v408_v46, 4  ;;  %v3152_v2 = vcombine.low %v1693_v59, %v1696_v51  ;;  %v418_v0 = vrot.slane %v416_v53, 4 }
  0x56   : > { %3404 = vmatmul.mubr.msk.bf16.gmra.mrb[8].mxu1 %vm480_vm3, %v2983_v41  ;;  %v421_v9 = vrot.slane %v419_v47, 5  ;;  %v404_v61 = vsel %vm4077_vm2, %v399_v49, %v403_v35  ;;  %v427_v26 = vrot.slane %v425_v52, 5  ;;  %v435_v56 = vshll.u32 %v4308_v58, 16  ;;  %v4354_v41 = vld [vmem:[%s4044_s13 + $0x50] sm:$0x1] }
  0x57   : > { %v431_v28 = vrot.slane %v429_v54, 4  ;;  %v414_v57 = vsel %vm4077_vm2, %v409_v60, %v413_v37  ;;  %3499 = vmatprep.mubr.msk.bf16.mxu0 %vm480_vm3, %v3152_v2  ;;  %v3141_v20 = vrot.slane %v3133_v48, 9  ;;  %v1699_v27 = vrot.slane %v4185_v43, 5  ;;  %3514 = vmatpush3.bf16.msra.mxu0 %v3788_v18  ;;  %v3135_v48 = vld [vmem:[%s4044_s13 + $0x48] sm:$0xe] }
  0x58   : > { %v422_v19 = vor.u32 %v421_v9, %v418_v0  ;;  %v2984_v32 = vcombine.low %v404_v61, %v414_v57  ;;  %v437_v15 = vrot.slane %v435_v56, 5  ;;  %v1702_v35 = vrot.slane %v4199_v50, 5  ;;  %3531 = vmatprep.subr.bf16.mxu0 %v4327_v5  ;;  %v4371_v2 = vld [vmem:[%s4044_s13 + $0x5c] sm:$0x1]  ;;  %v3136_v0 = vld [vmem:[%s4044_s13 + $0x54] sm:$0xe] }
  0x59   : > { %v432_v36 = vor.u32 %v431_v28, %v427_v26  ;;  %v1700_v37 = vsel %vm4234_vm6, %v3141_v20, %v1699_v27  ;;  %v1701_v42 = vrot.slane %v1699_v27, 4  ;;  %v3142_v59 = vrot.slane %v3134_v62, 9  ;;  %v4368_v62 = vld [vmem:[%s4044_s13 + $0x58] sm:$0xf]  ;;  %5051 = vst [vmem:[#allocation5_spill] sm:$0xff] %v4371_v2 }
  0x5a   : > { %v423_v39 = vrot.slane %v422_v19, 4  ;;  %3407 = vmatprep.mubr.msk.bf16.mxu1 %vm480_vm3, %v2984_v32  ;;  %v1706_v18 = vrot.slane %v4331_v12, 5  ;;  %v1709_v50 = vrot.slane %v4334_v13, 5  ;;  %v2996_v47 = vcombine.low %v4047_v6, %v4050_v7  ;;  %v4380_v28 = vld [vmem:[%s4044_s13 + $0x64] sm:$0xf] }
  0x5b   : > { %v433_v43 = vrot.slane %v432_v36, 4  ;;  %v1703_v53 = vsel %vm4234_vm6, %v1701_v42, %v1702_v35  ;;  %v3143_v9 = vrot.slane %v3135_v48, 9  ;;  %v1713_v61 = vrot.slane %v4348_v45, 5  ;;  %5052 = vst [vmem:[#allocation6_spill] sm:$0xff] %v4380_v28  ;;  %v4384_v57 = vld [vmem:[%s4044_s13 + $0x68] sm:$0x1] }
  0x5c   : > { %v428_v46 = vsel %vm4077_vm2, %v423_v39, %v427_v26  ;;  %v3153_v51 = vcombine.low %v1700_v37, %v1703_v53  ;;  %v1707_v52 = vsel %vm4234_vm6, %v3142_v59, %v1706_v18  ;;  %v1708_v54 = vrot.slane %v1706_v18, 4  ;;  %5053 = vst [vmem:[#allocation7_spill] sm:$0xff] %v4384_v57  ;;  %v3137_v36 = vld [vmem:[%s4044_s13 + $0x60] sm:$0xe] }
  0x5d   : > { %v438_v49 = vsel %vm4077_vm2, %v433_v43, %v437_v15  ;;  %v1716_v26 = vrot.slane %v4354_v41, 5  ;;  %v1714_v19 = vsel %vm4234_vm6, %v3143_v9, %v1713_v61  ;;  %v1715_v20 = vrot.slane %v1713_v61, 4  ;;  %v776_v43 = vld [vmem:[%s4044_s13 + $0xc] sm:$0xe]  ;;  %v779_v61 = vld [vmem:[%s4044_s13 + $0x30] sm:$0xe] }
  0x5e   : > { %v2985_v60 = vcombine.low %v428_v46, %v438_v49  ;;  %3500 = vmatmul.mubr.msk.bf16.gmra.mrb[4].mxu0 %vm480_vm3, %v3153_v51  ;;  %v1710_v6 = vsel %vm4234_vm6, %v1708_v54, %v1709_v50  ;;  %v3144_v27 = vrot.slane %v3136_v0, 9  ;;  %v1720_v32 = vrot.slane %v4368_v62, 5 }
  0x5f   : > { %v3154_v56 = vcombine.low %v1707_v52, %v1710_v6  ;;  %v811_v15 = vrot.slane %v4082_v34, 5  ;;  %v1723_v35 = vrot.slane %v4371_v2, 5  ;;  %v1717_v39 = vsel %vm4234_vm6, %v1715_v20, %v1716_v26  ;;  %v4697_v2 = vld [vmem:[%s4044_s13 + $0x70] sm:$0xf] }
  0x60   : > { %3408 = vmatmul.mubr.msk.bf16.gmra.mrb[12].mxu1 %vm480_vm3, %v2985_v60  ;;  %v1721_v37 = vsel %vm4234_vm6, %v3144_v27, %v1720_v32  ;;  %v1722_v42 = vrot.slane %v1720_v32, 4  ;;  %v1727_v59 = vrot.slane %v4380_v28, 5  ;;  %v2997_v18 = vcombine.low %v4073_v29, %v4082_v34  ;;  %v3793_v29 = vld [vmem:[%s5036_s1 + $0x28] sm:$0xff]   ;;  %v778_v34 = vld [vmem:[%s4044_s13 + $0x24] sm:$0xe] }
  0x61   : > { %3415 = vmatprep.mubr.msk.bf16.mxu1 %vm480_vm3, %v2996_v47  ;;  %3503 = vmatprep.mubr.msk.bf16.mxu0 %vm480_vm3, %v3154_v56  ;;  %v3155_v50 = vcombine.low %v1714_v19, %v1717_v39  ;;  %v3145_v46 = vrot.slane %v3137_v36, 9  ;;  %v1730_v53 = vrot.slane %v4384_v57, 5  ;;  %v777_v47 = vld [vmem:[%s4044_s13 + $0x18] sm:$0xe]  ;;  %v814_v48 = vrot.slane %v4085_v40, 5 }
  0x62   : > { %v2998_v49 = vcombine.low %v4114_v17, %v4121_v22  ;;  %v1724_v51 = vsel %vm4234_vm6, %v1722_v42, %v1723_v35  ;;  %v1729_v52 = vrot.slane %v1727_v59, 4  ;;  %v3015_v60 = vrot.slane %v776_v43, 9  ;;  %v3229_v57 = vld [vmem:[%s4044_s13 + $0x6c] sm:$0xf] }
  0x63   : > { %v3156_v54 = vcombine.low %v1721_v37, %v1724_v51  ;;  %v813_v0 = vrot.slane %v811_v15, 4  ;;  %v3016_v6 = vrot.slane %v777_v47, 9  ;;  %v1728_v40 = vsel %vm4234_vm6, %v3145_v46, %v1727_v59  ;;  %v3794_v37 = vld [vmem:[%s4044_s13 + $0x18] sm:$0xff]  }
  0x64   : > { %v1731_v17 = vsel %vm4234_vm6, %v1729_v52, %v1730_v53  ;;  %v818_v9 = vrot.slane %v4121_v22, 5  ;;  %v4426_v26 = vsel %vm4234_vm6, %v3015_v60, %v811_v15  ;;  %v821_v19 = vrot.slane %v4129_v31, 5  ;;  %v4436_v22 = vld [vmem:[%s5036_s1 + $0x30] sm:$0xff]   ;;  %v3208_v47 = vld [vmem:[%s4044_s13 + $0x18] sm:$0xf] }
  0x65   : > { %v4430_v56 = vsel %vm4234_vm6, %v813_v0, %v814_v48  ;;  %v3017_v20 = vrot.slane %v778_v34, 9  ;;  %v3157_v36 = vcombine.low %v1728_v40, %v1731_v17  ;;  %v825_v15 = vrot.slane %v4162_v11, 5 }
  0x66   : > { %3504 = vmatmul.mubr.msk.bf16.gmra.mrb[8].mxu0 %vm480_vm3, %v3155_v50  ;;  %v4442_v27 = vsel %vm4234_vm6, %v3016_v6, %v818_v9  ;;  %v820_v32 = vrot.slane %v818_v9, 4  ;;  %v828_v31 = vrot.slane %v4175_v23, 5  ;;  %v3018_v35 = vrot.slane %v779_v61, 9  ;;  %v780_v50 = vld [vmem:[%s4044_s13 + $0x3c] sm:$0xe] }
  0x67   : > { %3507 = vmatprep.mubr.msk.bf16.mxu0 %vm480_vm3, %v3156_v54  ;;  %v2999_v39 = vcombine.low %v4159_v1, %v4162_v11  ;;  %v832_v59 = vrot.slane %v4207_v10, 5  ;;  %v835_v43 = vrot.slane %v4216_v25, 5  ;;  %v4461_v1 = vsel %vm4234_vm6, %v3017_v20, %v825_v15  ;;  %v4490_v54 = vld [vmem:[%s4044_s13 + $0x1c] sm:$0xf]  ;;  %v781_v9 = vld [vmem:[%s4044_s13 + $0x48] sm:$0xe] }
  0x68   : > { %3416 = vmatmul.mubr.msk.bf16.vlgmr.msra.gmra.mrb[0].mxu1 %vm480_vm3, %v2997_v18  ;;  %v4451_v42 = vsel %vm4234_vm6, %v820_v32, %v821_v19  ;;  %v3000_v18 = vcombine.low %v4203_v63, %v4207_v10  ;;  %v827_v11 = vrot.slane %v825_v15, 4  ;;  %v804_v46 = vrot.slane %v4050_v7, 5  ;;  %v775_v10 = vld [vmem:[%s4044_s13] sm:$0xe]  ;;  %v3804_v15 = vld [vmem:[%s5036_s1 + $0x78] sm:$0xff]  }
  0x69   : > { %3432 = vmatpush3.bf16.msra.mxu1 %v4167_v4  ;;  %3419 = vmatprep.mubr.msk.bf16.mxu1 %vm480_vm3, %v2998_v49  ;;  %v3027_v4 = vcombine.low %v4426_v26, %v4430_v56  ;;  %v3028_v23 = vcombine.low %v4442_v27, %v4451_v42  ;;  %v4468_v25 = vsel %vm4234_vm6, %v3018_v35, %v832_v59  ;;  %v834_v63 = vrot.slane %v832_v59, 4 }
  0x6a   : > { %3433 = vmatprep.subr.bf16.mxu1 %v3793_v29  ;;  %v4474_v53 = vsel %vm4234_vm6, %v827_v11, %v828_v31  ;;  %v3019_v49 = vrot.slane %v780_v50, 9  ;;  %v807_v51 = vrot.slane %v4053_v8, 5  ;;  %v806_v34 = vrot.slane %v804_v46, 4  ;;  %v3797_v8 = vld [vmem:[%s4044_s13 + $0x24] sm:$0xff]   ;;  %v4517_v31 = vld [vmem:[%s4044_s13 + $0x20] sm:$0x1] }
  0x6b   : > { %v3029_v7 = vcombine.low %v4461_v1, %v4474_v53  ;;  %v4483_v48 = vsel %vm4234_vm6, %v834_v63, %v835_v43  ;;  %v839_v60 = vrot.slane %v4239_v3, 5  ;;  %v842_v0 = vrot.slane %v4253_v24, 5  ;;  %v4541_v63 = vld [vmem:[%s4044_s13 + $0x28] sm:$0xf] }
  0x6c   : > { %v3001_v6 = vcombine.low %v4222_v33, %v4239_v3  ;;  %v2149_v40 = vshrl.u32 %v3208_v47, 16  ;;  %v2152_v17 = vshll.u32 %v3208_v47, 16  ;;  %v2158_v61 = vshll.u32 %v4490_v54, 16  ;;  %v3801_v47 = vld [vmem:[%s4044_s13 + $0x3c] sm:$0xff]  }
  0x6d   : > { %3434 = vmatpush3.bf16.msra.mxu1 %v3793_v29  ;;  %v3014_v29 = vrot.slane %v775_v10, 9  ;;  %v2162_v19 = vshrl.u32 %v4490_v54, 16  ;;  %v4502_v20 = vsel %vm4234_vm6, %v3019_v49, %v839_v60  ;;  %v841_v32 = vrot.slane %v839_v60, 4 }
  0x6e   : > { %3451 = vmatprep.subr.bf16.mxu1 %v4436_v22  ;;  %3508 = vmatmul.mubr.msk.bf16.gmra.mrb[12].mxu0 %vm480_vm3, %v3157_v36  ;;  %v3002_v24 = vcombine.low %v4262_v38, %v4269_v16  ;;  %v3799_v36 = vld [vmem:[%s4044_s13 + $0x30] sm:$0xff]   ;;  %v808_v3 = vsel %vm4234_vm6, %v806_v34, %v807_v51  ;;  %v3211_v38 = vld [vmem:[%s4044_s13 + $0x24] sm:$0xf]  ;;  %v2154_v59 = vrot.slane %v2152_v17, 5  ;;  %v4530_v11 = vrot.slane %v2158_v61, 5  ;;  %v3803_v17 = vld [vmem:[%s4044_s13 + $0x48] sm:$0xff]  }
  0x6f   : > { %3515 = vmatprep.mubr.msk.bf16.mxu0 %vm480_vm3, %v3794_v37  ;;  %v4509_v33 = vsel %vm4234_vm6, %v3014_v29, %v804_v46  ;;  %v4521_v35 = vsel %vm4234_vm6, %v841_v32, %v842_v0  ;;  %v2151_v37 = vrot.slane %v2149_v40, 4  ;;  %v2164_v50 = vrot.slane %v2162_v19, 4  ;;  %v3214_v29 = vld [vmem:[%s4044_s13 + $0x30] sm:$0xf]  ;;  %v782_v34 = vld [vmem:[%s4044_s13 + $0x54] sm:$0xe] }
  0x70   : > { %3420 = vmatmul.mubr.msk.bf16.gmra.mrb[4].mxu1 %vm480_vm3, %v2999_v39  ;;  %v3020_v39 = vrot.slane %v781_v9, 9  ;;  %v849_v46 = vrot.slane %v4272_v44, 5  ;;  %v3003_v44 = vcombine.low %v4291_v14, %v4300_v21  ;;  %v3026_v49 = vcombine.low %v4509_v33, %v808_v3  ;;  %v4559_v40 = vld [vmem:[%s4044_s13 + $0x34] sm:$0xf] }
  0x71   : > { %3423 = vmatprep.mubr.msk.bf16.mxu1 %vm480_vm3, %v3000_v18  ;;  %v846_v18 = vrot.slane %v4269_v16, 5  ;;  %v4538_v16 = vld [vmem:[%s5036_s1 + $0x80] sm:$0xff]   ;;  %v2168_v51 = vshll.u32 %v4517_v31, 16  ;;  %v2155_v60 = vor.u32 %v2154_v59, %v2151_v37  ;;  %v2173_v0 = vshrl.u32 %v3211_v38, 16  ;;  %v4574_v59 = vld [vmem:[%s4044_s13 + $0x2c] sm:$0x1] }
  0x72   : > { %v2165_v14 = vor.u32 %v2164_v50, %v4530_v11  ;;  %v2182_v9 = vshll.u32 %v4541_v63, 16  ;;  %v2186_v61 = vshrl.u32 %v4541_v63, 16  ;;  %v2197_v32 = vshrl.u32 %v3214_v29, 16 }
  0x73   : > { %v848_v10 = vrot.slane %v846_v18, 4  ;;  %v853_v33 = vrot.slane %v4300_v21, 5  ;;  %v2206_v3 = vshll.u32 %v4559_v40, 16  ;;  %v2170_v37 = vrot.slane %v2168_v51, 5 }
  0x74   : > { %v2166_v21 = vrot.slane %v2165_v14, 4  ;;  %v2188_v51 = vrot.slane %v2186_v61, 4  ;;  %v3805_v14 = vld [vmem:[%s4044_s13 + $0x54] sm:$0xff]  }
  0x75   : > { %v855_v50 = vrot.slane %v853_v33, 4 }
  0x76   : > { %3516 = vmatmul.mubr.msk.bf16.vlgmr.msra.gmra.mrb[0].mxu0 %vm480_vm3, %v3797_v8  ;;  %v4556_v8 = vsel %vm4234_vm6, %v848_v10, %v849_v46  ;;  %v4582_v10 = vrot.slane %v2182_v9, 5  ;;  %v4599_v9 = vld [vmem:[%s4044_s13 + $0x40] sm:$0xf] }
  0x77   : > { %3532 = vmatpush3.bf16.msra.mxu0 %v4327_v5  ;;  %3519 = vmatprep.mubr.msk.bf16.mxu0 %vm480_vm3, %v3799_v36  ;;  %v4545_v5 = vsel %vm4234_vm6, %v3020_v39, %v846_v18  ;;  %v3021_v36 = vrot.slane %v782_v34, 9  ;;  %v2156_v39 = vrot.slane %v2155_v60, 4  ;;  %v3217_v60 = vld [vmem:[%s4044_s13 + $0x3c] sm:$0xf] }
  0x78   : > { %3424 = vmatmul.mubr.msk.bf16.gmra.mrb[8].mxu1 %vm480_vm3, %v3001_v6  ;;  %3533 = vmatprep.subr.bf16.mxu0 %v3804_v15  ;;  %v2176_v6 = vshll.u32 %v3211_v38, 16  ;;  %v856_v38 = vrot.slane %v4308_v58, 5  ;;  %v2175_v58 = vrot.slane %v2173_v0, 4 }
  0x79   : > { %3427 = vmatprep.mubr.msk.bf16.mxu1 %vm480_vm3, %v3002_v24  ;;  %v2200_v24 = vshll.u32 %v3214_v29, 16  ;;  %v4578_v18 = vsel %vm4234_vm6, %v3021_v36, %v853_v33  ;;  %v2199_v29 = vrot.slane %v2197_v32, 4  ;;  %v2161_v61 = vsel %vm4077_vm2, %v2156_v39, %v4530_v11  ;;  %v3220_v33 = vld [vmem:[%s4044_s13 + $0x48] sm:$0xf]  ;;  %v3808_v11 = vld [vmem:[%s5036_s1 + $0x38] sm:$0xff]  }
  0x7a   : > { %v2178_v46 = vrot.slane %v2176_v6, 5  ;;  %v2171_v32 = vsel %vm4077_vm2, %v2166_v21, %v2170_v37  ;;  %v2192_v36 = vshll.u32 %v4574_v59, 16  ;;  %v2221_v6 = vshrl.u32 %v3217_v60, 16 }
  0x7b   : > { %3534 = vmatpush3.bf16.msra.mxu0 %v3804_v15  ;;  %v2210_v15 = vshrl.u32 %v4559_v40, 16  ;;  %v2202_v34 = vrot.slane %v2200_v24, 5  ;;  %v2224_v37 = vshll.u32 %v3217_v60, 16  ;;  %v2230_v21 = vshll.u32 %v4599_v9, 16 }
  0x7c   : > { %3551 = vmatprep.subr.bf16.mxu0 %v4538_v16  ;;  %v2179_v24 = vor.u32 %v2178_v46, %v2175_v58  ;;  %v2234_v58 = vshrl.u32 %v4599_v9, 16  ;;  %v2245_v46 = vshrl.u32 %v3220_v33, 16 }
  0x7d   : > { %v2212_v0 = vrot.slane %v2210_v15, 4  ;;  %v2189_v15 = vor.u32 %v2188_v51, %v4582_v10  ;;  %v2248_v51 = vshll.u32 %v3220_v33, 16 }
  0x7e   : > { %3520 = vmatmul.mubr.msk.bf16.gmra.mrb[4].mxu0 %vm480_vm3, %v3801_v47  ;;  %v4585_v47 = vld [vmem:[%s4044_s13 + $0x38] sm:$0x1]  ;;  %v2180_v60 = vrot.slane %v2179_v24, 4  ;;  %v2226_v24 = vrot.slane %v2224_v37, 5  ;;  %v2236_v43 = vrot.slane %v2234_v58, 4  ;;  %v2247_v52 = vrot.slane %v2245_v46, 4 }
  0x7f   : > { %3523 = vmatprep.mubr.msk.bf16.mxu0 %vm480_vm3, %v3803_v17  ;;  %v4593_v17 = vrot.slane %v2206_v3, 5  ;;  %v4610_v3 = vld [vmem:[%s4044_s13 + $0x4c] sm:$0xf]  ;;  %v2190_v33 = vrot.slane %v2189_v15, 4  ;;  %v2250_v27 = vrot.slane %v2248_v51, 5  ;;  %v1404_v37 = vshll.u32 %v4348_v45, 16 }
  0x80   : > { %3428 = vmatmul.mubr.msk.bf16.gmra.mrb[12].mxu1 %vm480_vm3, %v3003_v44  ;;  %v4590_v44 = vsel %vm4234_vm6, %v855_v50, %v856_v38  ;;  %v2203_v38 = vor.u32 %v2202_v34, %v2199_v29  ;;  %v2216_v50 = vshll.u32 %v4585_v47, 16  ;;  %v2254_v29 = vshll.u32 %v4610_v3, 16  ;;  %v4646_v15 = vld [vmem:[%s4044_s13 + $0x50] sm:$0x1] }
  0x81   : > { %3435 = vmatprep.mubr.msk.bf16.mxu1 %vm480_vm3, %v3026_v49  ;;  %v3806_v49 = vld [vmem:[%s4044_s13 + $0x60] sm:$0xff]   ;;  %v2213_v39 = vor.u32 %v2212_v0, %v4593_v17  ;;  %v3236_v34 = vcombine.low %v2161_v61, %v2171_v32  ;;  %v2194_v0 = vrot.slane %v2192_v36, 5  ;;  %v2258_v19 = vshrl.u32 %v4610_v3, 16  ;;  %v3807_v61 = vld [vmem:[%s4044_s13 + $0x6c] sm:$0xff]  }
  0x82   : > { %v2204_v26 = vrot.slane %v2203_v38, 4  ;;  %v2218_v56 = vrot.slane %v2216_v50, 5  ;;  %v4638_v36 = vrot.slane %v2230_v21, 5  ;;  %v4643_v42 = vrot.slane %v2254_v29, 5 }
  0x83   : > { %v2214_v32 = vrot.slane %v2213_v39, 4  ;;  %v2185_v21 = vsel %vm4077_vm2, %v2180_v60, %v4582_v10  ;;  %v2195_v58 = vsel %vm4077_vm2, %v2190_v33, %v2194_v0  ;;  %v3226_v10 = vld [vmem:[%s4044_s13 + $0x60] sm:$0xf]  ;;  %v4669_v60 = vld [vmem:[%s4044_s13 + $0x64] sm:$0xf]  ;;  %v2251_v0 = vor.u32 %v2250_v27, %v2247_v52 }
  0x84   : > { %v2209_v46 = vsel %vm4077_vm2, %v2204_v26, %v4593_v17  ;;  %v2237_v51 = vor.u32 %v2236_v43, %v4638_v36  ;;  %5054 = vst [vmem:[#allocation8_spill] sm:$0xff] %v4669_v60  ;;  %v2264_v43 = vshll.u32 %v4646_v15, 16  ;;  %v4688_v52 = vld [vmem:[%s4044_s13 + $0x5c] sm:$0x1]  ;;  %v2296_v1 = vshll.u32 %v3226_v10, 16 }
  0x85   : > { %v2219_v17 = vsel %vm4077_vm2, %v2214_v32, %v2218_v56  ;;  %v5055_v56 = vcombine.low %v4468_v25, %v4483_v48  ;;  %v2293_v32 = vshrl.u32 %v3226_v10, 16  ;;  %v2302_v53 = vshll.u32 %v4669_v60, 16 }
  0x86   : > { %3524 = vmatmul.mubr.msk.bf16.gmra.mrb[8].mxu0 %vm480_vm3, %v3805_v14  ;;  %v3223_v14 = vld [vmem:[%s4044_s13 + $0x54] sm:$0xf]  ;;  %v2238_v27 = vrot.slane %v2237_v51, 4  ;;  %v2252_v25 = vrot.slane %v2251_v0, 4  ;;  %v2266_v48 = vrot.slane %v2264_v43, 5  ;;  %v2288_v10 = vshll.u32 %v4688_v52, 16 }
  0x87   : > { %3527 = vmatprep.mubr.msk.bf16.mxu0 %vm480_vm3, %v3806_v49  ;;  %v4635_v49 = vld [vmem:[%s4044_s13 + $0x58] sm:$0xf]  ;;  %v2272_v38 = vshll.u32 %v3223_v14, 16  ;;  %v2295_v28 = vrot.slane %v2293_v32, 4  ;;  %v4701_v51 = vrot.slane %v1404_v37, 5  ;;  %v2317_v0 = vshrl.u32 %v3229_v57, 16 }
  0x88   : > { %3436 = vmatmul.mubr.msk.bf16.vlgmr.msra.gmra.mrb[0].mxu1 %vm480_vm3, %v3027_v4  ;;  %v2223_v4 = vrot.slane %v2221_v6, 4  ;;  %v2260_v6 = vrot.slane %v2258_v19, 4  ;;  %v2278_v50 = vshll.u32 %v4635_v49, 16  ;;  %v2282_v39 = vshrl.u32 %v4635_v49, 16 }
  0x89   : > { %3452 = vmatpush3.bf16.msra.mxu1 %v4436_v22  ;;  %3439 = vmatprep.mubr.msk.bf16.mxu1 %vm480_vm3, %v3028_v23  ;;  %v4641_v22 = vld [vmem:[%s4044_s13 + $0x44] sm:$0x1]  ;;  %v2269_v23 = vshrl.u32 %v3223_v14, 16  ;;  %v2274_v26 = vrot.slane %v2272_v38, 5  ;;  %v3238_v38 = vcombine.low %v2209_v46, %v2219_v17  ;;  %v4712_v17 = vld [vmem:[%s4044_s13 + $0x68] sm:$0x1]  ;;  %v5057_v32 = vcombine.low %v4545_v5, %v4556_v8 }
  0x8a   : > { %3453 = vmatprep.subr.bf16.mxu1 %v3808_v11  ;;  %v2227_v19 = vor.u32 %v2226_v24, %v2223_v4  ;;  %v2240_v29 = vshll.u32 %v4641_v22, 16  ;;  %v2261_v33 = vor.u32 %v2260_v6, %v4643_v42  ;;  %v4681_v4 = vrot.slane %v2278_v50, 5 }
  0x8b   : > { %v2271_v14 = vrot.slane %v2269_v23, 4  ;;  %v3237_v6 = vcombine.low %v2185_v21, %v2195_v58  ;;  %v2320_v43 = vshll.u32 %v3229_v57, 16  ;;  %v2326_v37 = vshll.u32 %v4697_v2, 16 }
  0x8c   : > { %v2228_v24 = vrot.slane %v2227_v19, 4  ;;  %v2242_v23 = vrot.slane %v2240_v29, 5  ;;  %v2262_v50 = vrot.slane %v2261_v33, 4  ;;  %v3811_v29 = vld [vmem:[%s5036_s1 + $0x88] sm:$0xff]   ;;  %v2257_v33 = vsel %vm4077_vm2, %v2252_v25, %v4643_v42 }
  0x8d   : > { %3454 = vmatpush3.bf16.msra.mxu1 %v3808_v11  ;;  %v4664_v11 = vld [vmem:[%s5036_s1 + $0x40] sm:$0xff]   ;;  %v2290_v57 = vrot.slane %v2288_v10, 5  ;;  %v2312_v42 = vshll.u32 %v4712_v17, 16  ;;  %v2322_v5 = vrot.slane %v2320_v43, 5  ;;  %v4736_v8 = vrot.slane %v2326_v37, 5 }
  0x8e   : > { %3571 = vmatprep.subr.bf16.mxu1 %v4664_v11  ;;  %3528 = vmatmul.mubr.msk.bf16.gmra.mrb[12].mxu0 %vm480_vm3, %v3807_v61  ;;  %v2284_v61 = vrot.slane %v2282_v39, 4  ;;  %v2275_v39 = vor.u32 %v2274_v26, %v2271_v14  ;;  %v2233_v58 = vsel %vm4077_vm2, %v2228_v24, %v4638_v36  ;;  %v2243_v46 = vsel %vm4077_vm2, %v2238_v27, %v2242_v23  ;;  %v3810_v23 = vld [vmem:[%s4044_s13 + $0xc] sm:$0xff]  }
  0x8f   : > { %3535 = vmatprep.mubr.msk.bf16.mxu0 %vm480_vm3, %v3236_v34  ;;  %v1408_v34 = vshrl.u32 %v4348_v45, 16  ;;  %v4699_v45 = vrot.slane %v2302_v53, 5  ;;  %v2330_v14 = vshrl.u32 %v4697_v2, 16  ;;  %v5056_v36 = vcombine.low %v4502_v20, %v4521_v35 }
  0x90   : > { %3440 = vmatmul.mubr.msk.bf16.gmra.mrb[4].mxu1 %vm480_vm3, %v3029_v7  ;;  %v2306_v7 = vshrl.u32 %v4669_v60, 16  ;;  %v2298_v60 = vrot.slane %v2296_v1, 5  ;;  %v2267_v26 = vsel %vm4077_vm2, %v2262_v50, %v2266_v48  ;;  %v1414_v53 = vshll.u32 %v4354_v41, 16 }
  0x91   : > { %3443 = vmatprep.mubr.msk.bf16.mxu1 %vm480_vm3, %v5055_v56  ;;  %v2285_v56 = vor.u32 %v2284_v61, %v4681_v4  ;;  %v1410_v21 = vrot.slane %v1408_v34, 4  ;;  %v2276_v61 = vrot.slane %v2275_v39, 4  ;;  %v2319_v34 = vrot.slane %v2317_v0, 4 }
  0x92   : > { %v2308_v19 = vrot.slane %v2306_v7, 4  ;;  %v2299_v35 = vor.u32 %v2298_v60, %v2295_v28  ;;  %v3239_v7 = vcombine.low %v2233_v58, %v2243_v46  ;;  %v2332_v24 = vrot.slane %v2330_v14, 4  ;;  %v4742_v60 = vld [vmem:[%s4044_s13 + $0x74] sm:$0x1] }
  0x93   : > { %v2286_v20 = vrot.slane %v2285_v56, 4  ;;  %v1411_v1 = vor.u32 %v1410_v21, %v4701_v51  ;;  %v3240_v27 = vcombine.low %v2257_v33, %v2267_v26  ;;  %v2281_v28 = vsel %vm4077_vm2, %v2276_v61, %v4681_v4  ;;  %v3099_v56 = vld [vmem:[%s4044_s13 + $0x48] sm:$0xf]  ;;  %v3254_v21 = vld [vmem:[%s4044_s13 + $0x18] sm:$0xe] }
  0x94   : > { %v2314_v25 = vrot.slane %v2312_v42, 5  ;;  %v1416_v50 = vrot.slane %v1414_v53, 5  ;;  %v2552_v39 = vrot.slane %v4490_v54, 5  ;;  %v2323_v10 = vor.u32 %v2322_v5, %v2319_v34  ;;  %v3256_v5 = vld [vmem:[%s4044_s13 + $0x30] sm:$0xe] }
  0x95   : > { %v2291_v41 = vsel %vm4077_vm2, %v2286_v20, %v2290_v57  ;;  %v1412_v48 = vrot.slane %v1411_v1, 4  ;;  %v2333_v4 = vor.u32 %v2332_v24, %v4736_v8  ;;  %v5058_v58 = vcombine.low %v4578_v18, %v4590_v44 }
  0x96   : > { %3536 = vmatmul.mubr.msk.bf16.vlgmr.msra.gmra.mrb[0].mxu0 %vm480_vm3, %v3237_v6  ;;  %v2300_v6 = vrot.slane %v2299_v35, 4  ;;  %v3241_v46 = vcombine.low %v2281_v28, %v2291_v41  ;;  %v1395_v0 = vshrl.u32 %v3099_v56, 16  ;;  %v1398_v43 = vshll.u32 %v3099_v56, 16  ;;  %v3813_v35 = vld [vmem:[%s4044_s13 + $0x24] sm:$0xff]   ;;  %v3814_v56 = vld [vmem:[%s4044_s13 + $0x30] sm:$0xff]  }
  0x97   : > { %3552 = vmatpush3.bf16.msra.mxu0 %v4538_v16  ;;  %3539 = vmatprep.mubr.msk.bf16.mxu0 %vm480_vm3, %v3238_v38  ;;  %v2309_v16 = vor.u32 %v2308_v19, %v4699_v45  ;;  %v2336_v19 = vshll.u32 %v4742_v60, 16  ;;  %v3262_v18 = vrot.slane %v3254_v21, 9  ;;  %v2554_v44 = vrot.slane %v2552_v39, 4 }
  0x98   : > { %3444 = vmatmul.mubr.msk.bf16.gmra.mrb[8].mxu1 %vm480_vm3, %v5056_v36  ;;  %3553 = vmatprep.subr.bf16.mxu0 %v3811_v29  ;;  %v2305_v54 = vsel %vm4077_vm2, %v2300_v6, %v4699_v45  ;;  %v2555_v37 = vrot.slane %v4517_v31, 5  ;;  %v1417_v14 = vsel %vm4077_vm2, %v1412_v48, %v1416_v50  ;;  %v2324_v36 = vrot.slane %v2323_v10, 4  ;;  %v3812_v45 = vld [vmem:[%s4044_s13 + $0x18] sm:$0xff]   ;;  %v3255_v31 = vld [vmem:[%s4044_s13 + $0x24] sm:$0xe] }
  0x99   : > { %3447 = vmatprep.mubr.msk.bf16.mxu1 %vm480_vm3, %v5057_v32  ;;  %v2310_v38 = vrot.slane %v2309_v16, 4  ;;  %v2334_v33 = vrot.slane %v2333_v4, 4  ;;  %v2338_v26 = vrot.slane %v2336_v19, 5  ;;  %v1397_v61 = vrot.slane %v1395_v0, 4  ;;  %v3096_v32 = vld [vmem:[%s4044_s13 + $0x3c] sm:$0xf] }
  0x9a   : > { %v1400_v20 = vrot.slane %v1398_v43, 5  ;;  %v2553_v16 = vsel %vm4234_vm6, %v3262_v18, %v2552_v39  ;;  %v2556_v42 = vsel %vm4234_vm6, %v2554_v44, %v2555_v37  ;;  %v2559_v1 = vrot.slane %v4541_v63, 5  ;;  %v3102_v43 = vld [vmem:[%s4044_s13 + $0x54] sm:$0xf] }
  0x9b   : > { %3554 = vmatpush3.bf16.msra.mxu0 %v3811_v29  ;;  %v2315_v29 = vsel %vm4077_vm2, %v2310_v38, %v2314_v25  ;;  %v2339_v34 = vsel %vm4077_vm2, %v2334_v33, %v2338_v26  ;;  %v2566_v24 = vrot.slane %v4559_v40, 5  ;;  %v1374_v28 = vshll.u32 %v3096_v32, 16  ;;  %v3820_v40 = vld [vmem:[%s5036_s1 + $0x48] sm:$0xff]  }
  0x9c   : > { %v3242_v57 = vcombine.low %v2305_v54, %v2315_v29  ;;  %v1401_v53 = vor.u32 %v1400_v20, %v1397_v61  ;;  %v1380_v63 = vshll.u32 %v4331_v12, 16  ;;  %v2562_v6 = vrot.slane %v4574_v59, 5  ;;  %v3257_v54 = vld [vmem:[%s4044_s13 + $0x3c] sm:$0xe] }
  0x9d   : > { %v3274_v38 = vcombine.low %v2553_v16, %v2556_v42  ;;  %v2561_v25 = vrot.slane %v2559_v1, 4  ;;  %v3264_v48 = vrot.slane %v3256_v5, 9  ;;  %v2568_v50 = vrot.slane %v2566_v24, 4  ;;  %v3816_v42 = vld [vmem:[%s4044_s13 + $0x48] sm:$0xff]  }
  0x9e   : > { %3540 = vmatmul.mubr.msk.bf16.gmra.mrb[4].mxu0 %vm480_vm3, %v3239_v7  ;;  %v2329_v7 = vsel %vm4077_vm2, %v2324_v36, %v4736_v8  ;;  %v1402_v41 = vrot.slane %v1401_v53, 4  ;;  %v3263_v8 = vrot.slane %v3255_v31, 9  ;;  %v2569_v39 = vrot.slane %v4585_v47, 5 }
  0x9f   : > { %3543 = vmatprep.mubr.msk.bf16.mxu0 %vm480_vm3, %v3240_v27  ;;  %v1371_v27 = vshrl.u32 %v3096_v32, 16  ;;  %v1376_v4 = vrot.slane %v1374_v28, 5  ;;  %v4801_v19 = vrot.slane %v1380_v63, 5  ;;  %v2567_v47 = vsel %vm4234_vm6, %v3264_v48, %v2566_v24 }
  0xa0   : > { %3448 = vmatmul.mubr.msk.bf16.gmra.mrb[12].mxu1 %vm480_vm3, %v5058_v58  ;;  %v3815_v58 = vld [vmem:[%s4044_s13 + $0x3c] sm:$0xff]   ;;  %v2573_v29 = vrot.slane %v4599_v9, 5  ;;  %v1390_v0 = vshll.u32 %v4334_v13, 16  ;;  %v2570_v18 = vsel %vm4234_vm6, %v2568_v50, %v2569_v39  ;;  %v2580_v36 = vrot.slane %v4610_v3, 5 }
  0xa1   : > { %3455 = vmatprep.mubr.msk.bf16.mxu1 %vm480_vm3, %v3810_v23  ;;  %v1384_v23 = vshrl.u32 %v4331_v12, 16  ;;  %v1407_v12 = vsel %vm4077_vm2, %v1402_v41, %v4701_v51  ;;  %v1373_v10 = vrot.slane %v1371_v27, 4  ;;  %v2563_v51 = vsel %vm4234_vm6, %v2561_v25, %v2562_v6  ;;  %v3105_v27 = vld [vmem:[%s4044_s13 + $0x60] sm:$0xf]  ;;  %v3259_v6 = vld [vmem:[%s4044_s13 + $0x54] sm:$0xe] }
  0xa2   : > { %v4798_v59 = vcombine.low %v1407_v12, %v1417_v14  ;;  %v3258_v14 = vld [vmem:[%s4044_s13 + $0x48] sm:$0xe]  ;;  %v3265_v13 = vrot.slane %v3257_v54, 9  ;;  %v2576_v33 = vrot.slane %v4641_v22, 5  ;;  %v1419_v26 = vshrl.u32 %v3102_v43, 16  ;;  %v3818_v54 = vld [vmem:[%s4044_s13 + $0x60] sm:$0xff]  }
  0xa3   : > { %v1386_v21 = vrot.slane %v1384_v23, 4  ;;  %v1377_v44 = vor.u32 %v1376_v4, %v1373_v10  ;;  %v1422_v61 = vshll.u32 %v3102_v43, 16  ;;  %v3276_v32 = vcombine.low %v2567_v47, %v2570_v18  ;;  %v5060_v12 = vld [vmem:[#allocation6_spill] sm:$0xff]  ;;  %v5061_v4 = vld [vmem:[#allocation5_spill] sm:$0xff] }
  0xa4   : > { %v2575_v20 = vrot.slane %v2573_v29, 4  ;;  %v3266_v16 = vrot.slane %v3258_v14, 9  ;;  %v2583_v53 = vrot.slane %v4646_v15, 5  ;;  %v1421_v22 = vrot.slane %v1419_v26, 4 }
  0xa5   : > { %v1387_v37 = vor.u32 %v1386_v21, %v4801_v19  ;;  %v1378_v3 = vrot.slane %v1377_v44, 4  ;;  %v2587_v15 = vrot.slane %v4635_v49, 5  ;;  %v3260_v49 = vld [vmem:[%s4044_s13 + $0x60] sm:$0xe]  ;;  %v1443_v25 = vshrl.u32 %v3105_v27, 16 }
  0xa6   : > { %3544 = vmatmul.mubr.msk.bf16.gmra.mrb[8].mxu0 %vm480_vm3, %v3241_v46  ;;  %v2560_v46 = vsel %vm4234_vm6, %v3263_v8, %v2559_v1  ;;  %v2582_v1 = vrot.slane %v2580_v36, 4  ;;  %v2577_v28 = vsel %vm4234_vm6, %v2575_v20, %v2576_v33  ;;  %v2581_v63 = vsel %vm4234_vm6, %v3266_v16, %v2580_v36 }
  0xa7   : > { %3547 = vmatprep.mubr.msk.bf16.mxu0 %vm480_vm3, %v3242_v57  ;;  %v3275_v9 = vcombine.low %v2560_v46, %v2563_v51  ;;  %v1432_v57 = vshrl.u32 %v4368_v62, 16  ;;  %v1388_v31 = vrot.slane %v1387_v37, 4  ;;  %v1383_v23 = vsel %vm4077_vm2, %v1378_v3, %v4801_v19 }
  0xa8   : > { %3456 = vmatmul.mubr.msk.bf16.vlgmr.msra.gmra.mrb[0].mxu1 %vm480_vm3, %v3812_v45  ;;  %v1428_v45 = vshll.u32 %v4368_v62, 16  ;;  %v2574_v62 = vsel %vm4234_vm6, %v3265_v13, %v2573_v29  ;;  %v2584_v8 = vsel %vm4234_vm6, %v2582_v1, %v2583_v53  ;;  %v1446_v48 = vshll.u32 %v3105_v27, 16 }
  0xa9   : > { %3573 = vmatpush3.bf16.msra.mxu1 %v4664_v11  ;;  %3459 = vmatprep.mubr.msk.bf16.mxu1 %vm480_vm3, %v3813_v35  ;;  %v3243_v11 = vcombine.low %v2329_v7, %v2339_v34  ;;  %v1392_v35 = vrot.slane %v1390_v0, 5  ;;  %v3817_v7 = vld [vmem:[%s4044_s13 + $0x54] sm:$0xff]   ;;  %v1424_v34 = vrot.slane %v1422_v61, 5  ;;  %v1434_v24 = vrot.slane %v1432_v57, 4 }
  0xaa   : > { %3572 = vmatprep.subr.bf16.mxu1 %v3820_v40  ;;  %v1430_v5 = vrot.slane %v1428_v45, 5  ;;  %v1456_v50 = vshrl.u32 %v5060_v12, 16  ;;  %v3277_v39 = vcombine.low %v2574_v62, %v2577_v28  ;;  %v1438_v19 = vshll.u32 %v5061_v4, 16 }
  0xab   : > { %v1393_v41 = vsel %vm4077_vm2, %v1388_v31, %v1392_v35  ;;  %v3278_v21 = vcombine.low %v2581_v63, %v2584_v8  ;;  %v2589_v46 = vrot.slane %v2587_v15, 4  ;;  %v2590_v51 = vrot.slane %v4688_v52, 5  ;;  %v3261_v35 = vld [vmem:[%s4044_s13 + $0x6c] sm:$0xe]  ;;  %s202_s13 = sand.u32 1, %s3891_s16  }
  0xac   : > { %v1435_v10 = vor.u32 %v1434_v24, %v1430_v5  ;;  %v3116_v47 = vcombine.low %v1383_v23, %v1393_v41  ;;  %v3268_v29 = vrot.slane %v3260_v49, 9  ;;  %v2597_v43 = vrot.slane %v4712_v17, 5  ;;  %s2969_s9 = sshll.u32 %s202_s13, 7  ;;  %s4983_s30 = scalar_lea.sflag [#allocation3], %s202_s13 }
  0xad   : > { %3574 = vmatpush3.bf16.msra.mxu1 %v3820_v40  ;;  %v5059_v40 = vld [vmem:[#allocation8_spill] sm:$0xff]  ;;  %v1445_v18 = vrot.slane %v1443_v25, 4  ;;  %v1448_v44 = vrot.slane %v1446_v48, 5  ;;  %v1458_v14 = vrot.slane %v1456_v50, 4  ;;  %v1440_v13 = vrot.slane %v1438_v19, 5  ;;  %s4913_s10 = scalar_lea.vmem [#allocation2], %s2969_s9 }
  0xae   : > { %3548 = vmatmul.mubr.msk.bf16.gmra.mrb[12].mxu0 %vm480_vm3, %v3243_v11  ;;  %v1452_v11 = vshll.u32 %v5060_v12, 16  ;;  %v2591_v17 = vsel %vm4234_vm6, %v2589_v46, %v2590_v51  ;;  %v2601_v26 = vrot.slane %v4697_v2, 5  ;;  %v3269_v1 = vrot.slane %v3261_v35, 9  ;;  %v4901_v48 = vld [vmem:[%s5038_s3] ss:$0 sm:$0xff]  ;;  %s2878_s14 = sshll.u32 %s4913_s10, 4  ;;  %s4973_s14 = int_to_ptr.vmem [resolvable:$true] %s2878_s14 }
  0xaf   : > { %3555 = vmatprep.mubr.msk.bf16.mxu0 %vm480_vm3, %v3274_v38  ;;  %v2594_v38 = vrot.slane %v5059_v40, 5  ;;  %v1449_v45 = vor.u32 %v1448_v44, %v1445_v18  ;;  %v2604_v53 = vrot.slane %v4742_v60, 5  ;;  %s3821_s5 = scalar_lea.vmem %s4973_s14, 2048  ;;  %s3827_s9 = scalar_lea.vmem %s3826_s8, 4096 }
  0xb0   : > { %3460 = vmatmul.mubr.msk.bf16.gmra.mrb[4].mxu1 %vm480_vm3, %v3814_v56  ;;  %v1425_v56 = vor.u32 %v1424_v34, %v1421_v22  ;;  %v1454_v37 = vrot.slane %v1452_v11, 5  ;;  %v2603_v2 = vrot.slane %v2601_v26, 4  ;;  %p3822_p13 = scmp.ne.s32.totalorder %s4973_s14, %s3821_s5  ;;  %p3828_p2 = scmp.lt.s32.totalorder %s4973_s14, %s3826_s8 }
  0xb1   : > { %3463 = vmatprep.mubr.msk.bf16.mxu1 %vm480_vm3, %v3815_v58  ;;  %v3267_v58 = vrot.slane %v3259_v6, 9  ;;  %v2596_v0 = vrot.slane %v2594_v38, 4  ;;  %v2595_v33 = vsel %vm4234_vm6, %v3268_v29, %v2594_v38  ;;  %v1450_v22 = vrot.slane %v1449_v45, 4  ;;  %p3829_p4 = scmp.lt.s32.totalorder %s3827_s9, %s3821_s5 }
  0xb2   : > { %v1426_v36 = vrot.slane %v1425_v56, 4  ;;  %v1459_v57 = vor.u32 %v1458_v14, %v1454_v37  ;;  %v2605_v27 = vsel %vm4234_vm6, %v2603_v2, %v2604_v53  ;;  %p3823_p0 = pnand %p3822_p13, %p3996_p3 }
  0xb3   : > { %v2588_v52 = vsel %vm4234_vm6, %v3267_v58, %v2587_v15  ;;  %v2598_v61 = vsel %vm4234_vm6, %v2596_v0, %v2597_v43  ;;  %v1455_v60 = vsel %vm4077_vm2, %v1450_v22, %v1454_v37  ;;  %p3830_p5 = por %p3829_p4, %p3828_p2 }
  0xb4   : > { %v1431_v16 = vsel %vm4077_vm2, %v1426_v36, %v1430_v5  ;;  %v3279_v3 = vcombine.low %v2588_v52, %v2591_v17  ;;  %v3280_v31 = vcombine.low %v2595_v33, %v2598_v61  ;;  %v1460_v34 = vrot.slane %v1459_v57, 4  ;;  %p3824_p1 = pneg %p3823_p0 }
  0xb5   : > { %v2602_v5 = vsel %vm4234_vm6, %v3269_v1, %v2601_v26 }
  0xb6   : > { %3556 = vmatmul.mubr.msk.bf16.vlgmr.msra.gmra.mrb[0].mxu0 %vm480_vm3, %v3275_v9  ;;  %v1436_v9 = vrot.slane %v1435_v10, 4  ;;  %v3281_v28 = vcombine.low %v2602_v5, %v2605_v27  ;;  %p3831_p6 = pnand %p3830_p5, %p3824_p1 }
  0xb7   : > { %3559 = vmatprep.mubr.msk.bf16.mxu0 %vm480_vm3, %v3276_v32  ;;  %v5062_v32 = vld [vmem:[#allocation7_spill] sm:$0xff] }
  0xb8   : > { %3464 = vmatmul.mubr.msk.bf16.gmra.mrb[8].mxu1 %vm480_vm3, %v3816_v42  ;;  %v1462_v20 = vshll.u32 %v5062_v32, 16  ;;  %v1441_v42 = vsel %vm4077_vm2, %v1436_v9, %v1440_v13 }
  0xb9   : > { %3467 = vmatprep.mubr.msk.bf16.mxu1 %vm480_vm3, %v3817_v7  ;;  %v3118_v7 = vcombine.low %v1431_v16, %v1441_v42 }
  0xba   : > { %v1464_v24 = vrot.slane %v1462_v20, 5 }
  0xbc   : > { %v1465_v62 = vsel %vm4077_vm2, %v1460_v34, %v1464_v24 }
  0xbd   : > { %v3119_v63 = vcombine.low %v1455_v60, %v1465_v62 }
  0xbe   : > { %3560 = vmatmul.mubr.msk.bf16.gmra.mrb[4].mxu0 %vm480_vm3, %v3277_v39 }
  0xbf   : > { %3563 = vmatprep.mubr.msk.bf16.mxu0 %vm480_vm3, %v3278_v21 }
  0xc0   : > { %3468 = vmatmul.mubr.msk.bf16.gmra.mrb[12].mxu1 %vm480_vm3, %v3818_v54 }
  0xc1   : > { %3483 = vmatprep.mubr.msk.bf16.mxu1 %vm480_vm3, %v3116_v47 }
  0xc6   : > { %3564 = vmatmul.mubr.msk.bf16.gmra.mrb[8].mxu0 %vm480_vm3, %v3279_v3 }
  0xc7   : > { %3567 = vmatprep.mubr.msk.bf16.mxu0 %vm480_vm3, %v3280_v31 }
  0xc8   : > { %3484 = vmatmul.mubr.msk.bf16.vlgmr.msra.gmra.mrb[8].mxu1 %vm480_vm3, %v4798_v59 }
  0xc9   : > { %3487 = vmatprep.mubr.msk.bf16.mxu1 %vm480_vm3, %v3118_v7 }
  0xce   : > { %3568 = vmatmul.mubr.msk.bf16.gmra.mrb[12].mxu0 %vm480_vm3, %v3281_v28 }
  0xd0   : > { %3488 = vmatmul.mubr.msk.bf16.gmra.mrb[12].mxu1 %vm480_vm3, %v3119_v63 }
 0x17b   : > { %v3457_v59 = vpop.f32.mrb[0].mxu1 }
 0x17c   : > { %v1171_v15 = vpop.f32.mrb[1].mxu1 }
 0x17d   : > { %v3458_v55 = vpop.f32.mrb[2].mxu1 }
 0x17e   : > { %v1174_v23 = vpop.f32.mrb[3].mxu1 }
 0x183   : > { %v3461_v41 = vpop.f32.mrb[4].mxu1 }
 0x184   : > { %v1187_v8 = vpop.f32.mrb[5].mxu1 }
 0x185   : > { %v3462_v6 = vpop.f32.mrb[6].mxu1 }
 0x186   : > { %v1190_v40 = vpop.f32.mrb[7].mxu1 }
 0x189   : > { %v3557_v38 = vpop.f32.mrb[0].mxu0 }
 0x18a   : > { %v3575_v49 = vadd.f32 %v3557_v38, %v3457_v59  ;;  %v2705_v25 = vpop.f32.mrb[1].mxu0 }
 0x18b   : > { %v3576_v12 = vadd.f32 %v2705_v25, %v1171_v15  ;;  %v3558_v11 = vpop.f32.mrb[2].mxu0 }
 0x18c   : > { %v2793_v50 = vmul.f32 %v3575_v49, %v4896_v30  ;;  %v3577_v39 = vadd.f32 %v3558_v11, %v3458_v55  ;;  %v2708_v56 = vpop.f32.mrb[3].mxu0 }
 0x18d   : > { %v2791_v10 = vmul.f32 %v3576_v12, %v4896_v30  ;;  %v3578_v4 = vadd.f32 %v2708_v56, %v1174_v23 }
 0x18e   : > { %v2816_v19 = vadd.f32 %v4901_v48, %v2793_v50  ;;  %v2794_v21 = vmul.f32 %v3577_v39, %v4896_v30 }
 0x18f   : > { %v2814_v58 = vadd.f32 %v4901_v48, %v2791_v10  ;;  %v2792_v46 = vmul.f32 %v3578_v4, %v4896_v30 }
 0x190   : > { %v2832_v51 = vmax.f32 %v2816_v19, 0.0  ;;  %v2817_v54 = vadd.f32 %v4901_v48, %v2794_v21 }
 0x191   : > { %v2830_v47 = vmax.f32 %v2814_v58, 0.0  ;;  %v2815_v29 = vadd.f32 %v4901_v48, %v2792_v46  ;;  %v3561_v0 = vpop.f32.mrb[4].mxu0 }
 0x192   : > { %2848 = vst.msk [vmem:[%s4913_s10 + $0x10] sm:$0xff] %vm480_vm3, %v2832_v51  ;;  %v2833_v43 = vmax.f32 %v2817_v54, 0.0  ;;  %v3579_v18 = vadd.f32 %v3561_v0, %v3461_v41  ;;  %v2721_v44 = vpop.f32.mrb[5].mxu0 }
 0x193   : > { %2846 = vst.msk [vmem:[%s4913_s10] sm:$0xff] %vm480_vm3, %v2830_v47  ;;  %v2831_v37 = vmax.f32 %v2815_v29, 0.0  ;;  %v3580_v14 = vadd.f32 %v2721_v44, %v1187_v8  ;;  %v3562_v36 = vpop.f32.mrb[6].mxu0 }
 0x194   : > { %2849 = vst.msk [vmem:[%s4913_s10 + $0x18] sm:$0xff] %vm480_vm3, %v2833_v43  ;;  %v2797_v9 = vmul.f32 %v3579_v18, %v4896_v30  ;;  %v3581_v13 = vadd.f32 %v3562_v36, %v3462_v6  ;;  %v2724_v52 = vpop.f32.mrb[7].mxu0 }
 0x195   : > { %2847 = vst.msk [vmem:[%s4913_s10 + $0x8] sm:$0xff] %vm480_vm3, %v2831_v37  ;;  %v2795_v17 = vmul.f32 %v3580_v14, %v4896_v30  ;;  %v3582_v33 = vadd.f32 %v2724_v52, %v1190_v40 }
 0x196   : > { %v2820_v26 = vadd.f32 %v4901_v48, %v2797_v9  ;;  %v2798_v61 = vmul.f32 %v3581_v13, %v4896_v30 }
 0x197   : > { %v2818_v45 = vadd.f32 %v4901_v48, %v2795_v17  ;;  %v2796_v57 = vmul.f32 %v3582_v33, %v4896_v30 }
 0x198   : > { %v2836_v32 = vmax.f32 %v2820_v26, 0.0  ;;  %v2821_v20 = vadd.f32 %v4901_v48, %v2798_v61 }
 0x199   : > { %v2834_v35 = vmax.f32 %v2818_v45, 0.0  ;;  %v2819_v16 = vadd.f32 %v4901_v48, %v2796_v57  ;;  %v3565_v42 = vpop.f32.mrb[8].mxu0 }
 0x19a   : > { %2852 = vst.msk [vmem:[%s4913_s10 + $0x30] sm:$0xff] %vm480_vm3, %v2836_v32  ;;  %v2837_v3 = vmax.f32 %v2821_v20, 0.0  ;;  %v2737_v1 = vpop.f32.mrb[9].mxu0 }
 0x19b   : > { %v3485_v31 = vpop.f32.mrb[8].mxu1  ;;  %2850 = vst.msk [vmem:[%s4913_s10 + $0x20] sm:$0xff] %vm480_vm3, %v2834_v35  ;;  %v2835_v2 = vmax.f32 %v2819_v16, 0.0  ;;  %v3566_v22 = vpop.f32.mrb[10].mxu0 }
 0x19c   : > { %v3583_v53 = vadd.f32 %v3565_v42, %v3485_v31  ;;  %v1597_v7 = vpop.f32.mrb[9].mxu1  ;;  %2853 = vst.msk [vmem:[%s4913_s10 + $0x38] sm:$0xff] %vm480_vm3, %v2837_v3  ;;  %v2740_v5 = vpop.f32.mrb[11].mxu0 }
 0x19d   : > { %v3584_v34 = vadd.f32 %v2737_v1, %v1597_v7  ;;  %v3486_v24 = vpop.f32.mrb[10].mxu1  ;;  %2851 = vst.msk [vmem:[%s4913_s10 + $0x28] sm:$0xff] %vm480_vm3, %v2835_v2 }
 0x19e   : > { %v2801_v27 = vmul.f32 %v3583_v53, %v4896_v30  ;;  %v3585_v60 = vadd.f32 %v3566_v22, %v3486_v24  ;;  %v1600_v62 = vpop.f32.mrb[11].mxu1 }
 0x19f   : > { %v2799_v28 = vmul.f32 %v3584_v34, %v4896_v30  ;;  %v3586_v63 = vadd.f32 %v2740_v5, %v1600_v62 }
 0x1a0   : > { %v2824_v59 = vadd.f32 %v4901_v48, %v2801_v27  ;;  %v2802_v15 = vmul.f32 %v3585_v60, %v4896_v30 }
 0x1a1   : > { %v2822_v55 = vadd.f32 %v4901_v48, %v2799_v28  ;;  %v2800_v23 = vmul.f32 %v3586_v63, %v4896_v30  ;;  %v3569_v6 = vpop.f32.mrb[12].mxu0 }
 0x1a2   : > { %v2840_v41 = vmax.f32 %v2824_v59, 0.0  ;;  %v2825_v8 = vadd.f32 %v4901_v48, %v2802_v15  ;;  %v2753_v25 = vpop.f32.mrb[13].mxu0 }
 0x1a3   : > { %v2838_v40 = vmax.f32 %v2822_v55, 0.0  ;;  %v2823_v38 = vadd.f32 %v4901_v48, %v2800_v23  ;;  %v3489_v49 = vpop.f32.mrb[12].mxu1  ;;  %v3570_v39 = vpop.f32.mrb[14].mxu0 }
 0x1a4   : > { %2856 = vst.msk [vmem:[%s4913_s10 + $0x50] sm:$0xff] %vm480_vm3, %v2840_v41  ;;  %v2841_v12 = vmax.f32 %v2825_v8, 0.0  ;;  %v3587_v11 = vadd.f32 %v3569_v6, %v3489_v49  ;;  %v1613_v50 = vpop.f32.mrb[13].mxu1  ;;  %v2756_v19 = vpop.f32.mrb[15].mxu0 }
 0x1a5   : > { %2854 = vst.msk [vmem:[%s4913_s10 + $0x40] sm:$0xff] %vm480_vm3, %v2838_v40  ;;  %v2839_v56 = vmax.f32 %v2823_v38, 0.0  ;;  %v3588_v10 = vadd.f32 %v2753_v25, %v1613_v50  ;;  %v3490_v4 = vpop.f32.mrb[14].mxu1 }
 0x1a6   : > { %2857 = vst.msk [vmem:[%s4913_s10 + $0x58] sm:$0xff] %vm480_vm3, %v2841_v12  ;;  %v2805_v21 = vmul.f32 %v3587_v11, %v4896_v30  ;;  %v3589_v58 = vadd.f32 %v3570_v39, %v3490_v4  ;;  %v1616_v46 = vpop.f32.mrb[15].mxu1 }
 0x1a7   : > { %2855 = vst.msk [vmem:[%s4913_s10 + $0x48] sm:$0xff] %vm480_vm3, %v2839_v56  ;;  %v2803_v51 = vmul.f32 %v3588_v10, %v4896_v30  ;;  %v3590_v54 = vadd.f32 %v2756_v19, %v1616_v46 }
 0x1a8   : > { %v2828_v47 = vadd.f32 %v4901_v48, %v2805_v21  ;;  %v2806_v29 = vmul.f32 %v3589_v58, %v4896_v30 }
 0x1a9   : > { %v2826_v0 = vadd.f32 %v4901_v48, %v2803_v51  ;;  %v2804_v43 = vmul.f32 %v3590_v54, %v4896_v30 }
 0x1aa   : > { %v2844_v18 = vmax.f32 %v2828_v47, 0.0  ;;  %v2829_v44 = vadd.f32 %v4901_v48, %v2806_v29 }
 0x1ab   : > { %v2842_v37 = vmax.f32 %v2826_v0, 0.0  ;;  %v2827_v14 = vadd.f32 %v4901_v48, %v2804_v43 }
 0x1ac   : > { %2860 = vst.msk [vmem:[%s4913_s10 + $0x70] sm:$0xff] %vm480_vm3, %v2844_v18  ;;  %v2845_v36 = vmax.f32 %v2829_v44, 0.0 }
 0x1ad   : > { %2858 = vst.msk [vmem:[%s4913_s10 + $0x60] sm:$0xff] %vm480_vm3, %v2842_v37  ;;  %v2843_v30 = vmax.f32 %v2827_v14, 0.0 }
 0x1ae   : > { %2861 = vst.msk [vmem:[%s4913_s10 + $0x78] sm:$0xff] %vm480_vm3, %v2845_v36 }
 0x1af   : > { %2859 = vst.msk [vmem:[%s4913_s10 + $0x68] sm:$0xff] %vm480_vm3, %v2843_v30 }
 0x1b0   : > { %3834 = shalt.err (!%p3831_p6)
}
 0x1b1   : > { %s3835_s13 = scalar_lea.hbm %s4971_s27, 2048  ;;  %s3839_s12 = scalar_lea.hbm %s5039_s4, 8192 }
 0x1b2   : > { %p3836_p7 = scmp.ne.s32.totalorder %s4971_s27, %s3835_s13  ;;  %p3840_p11 = scmp.lt.u32.totalorder %s4971_s27, %s5039_s4 }
 0x1b3   : > { %p3841_p12 = scmp.lt.u32.totalorder %s3839_s12, %s3835_s13  ;;  %p3843_p0 = scmp.lt.u32.totalorder %s3835_s13, %s4971_s27 }
 0x1b4   : > { %p3837_p9 = pnand %p3836_p7, %p3996_p3 }
 0x1b5   : > { %p3842_p13 = por %p3841_p12, %p3840_p11 }
 0x1b6   : > { %p3838_p10 = pneg %p3837_p9 }
 0x1b7   : > { %p3844_p1 = por %p3843_p0, %p3842_p13 }
 0x1b9   : > { %p3845_p2 = pnand %p3844_p1, %p3838_p10 }
 0x1bb   : > { %3848 = shalt.err (!%p3845_p2)
}
 0x1bc   : > { %s3918_s23 = smov 128   ;;  %s3919_s24 = smov 8  }
 0x1bd   : > { %3704 = dma.vmem_to_hbm [thread:$0]  (%p3996_p3), %s4973_s14, 2048, %s4971_s27, %s4983_s30, %s3918_s23, %s3918_s23, %s3919_s24  }
 0x1be PF: > { %p3710_p4 = scmp.ge.s32.totalorder %s3915_s22, 2  ;;  %s2893_s5 = sand.u32 1, %s3887_s15  }
 0x1bf   : > { %s2894_s6 = scalar_lea.sflag [#allocation3], %s2893_s5 }
 0x1c0   : > { %p3707_p5 = pnand %p3710_p4, %p4005_p8 }
 0x1c2   : > { %3882 = dma.done.wait (!%p3707_p5), %s2894_s6, 2048  }
 0x1c3   : > { %3884 = vsyncadd (!%p3707_p5), %s2894_s6, 4294965248  ;;  %s17_s22 = sadd.s32 1, %s3915_s22   ;;  %s5063_s15 = smov %s3891_s16 }
 0x1c4   : > { %p14_p6 = scmp.ge.s32.totalorder %s17_s22, 6   ;;  %s5064_s16 = smov %s3895_s17 }
 0x1c5   : > { %s5065_s17 = smov %s4014_s7  ;;  %s5066_s18 = smov %s3907_s20 }
 0x1c6   : > { %s5067_s19 = smov %s3911_s21  ;;  %s5068_s20 = smov %s5071_s25 }
 0x1c7   : > { %s5069_s21 = smov %s5075_s26  ;;  %16 = sbr.rel (!%p14_p6) target bundleno = 5 (0x5), region = 82 }
 0x1ce   :  { %2899 = vsyncpa [#allocation3], 1 }
 0x1cf   :  { %2901 = vsyncpa [#allocation3 + $0x1], 1 }

</bundles_post_ra>
